<compile_context>
chip_gen: v7x
topology: tpu7x:2x2x1
jax: 0.10.0
libtpu: 0.0.40
codegen_flags: <defaults>
</compile_context>

<pallas_src>
import math

import jax
import jax.numpy as jnp
import numpy as np
from jax.experimental import pallas as pl
from jax.experimental.pallas import tpu as pltpu

# ---------------- configuration (small synthetic sizes) ----------------
D_MODEL = 32
N_LAYERS = 2
HEADS = 4
D_K = D_MODEL // HEADS
MAX_SEQ = 9                 # EmbedderNeuronGroup(100 features) -> 9 tokens
D_FF = 64
SRC_DIM = 100
CHUNK = 16 + 5              # token-major packed input width (16-chunk | 5-chunk)
BATCH = 2
ROWS = BATCH * MAX_SEQ      # fused batch*seq slab height
EPS = 1e-6
SQRT_D = math.sqrt(D_MODEL)
SQRT_DK = math.sqrt(D_K)
INV_SQRT_DK = 1.0 / math.sqrt(D_K)


# ---------------- fused kernel ----------------
def _norm_k(x, alpha, bias):
    """torch `Norm`: alpha * (x - mean) / (std_unbiased + eps) + bias over the last dim."""
    mean = jnp.mean(x, axis=-1, keepdims=True)
    var = jnp.sum((x - mean) ** 2, axis=-1, keepdims=True) * (1.0 / (x.shape[-1] - 1))
    inv = pl.reciprocal(jnp.sqrt(var) + EPS, approx=True)
    return alpha * (x - mean) * inv + bias


def encoder_group_kernel(u_ref, we_ref, bpe_ref,
                         a1_ref, g1_ref, wqkv_ref, bqkv_ref, wo_ref, bo_ref,
                         a2_ref, g2_ref, w1_ref, b1_ref, w2_ref, b2_ref,
                         na_ref, nb_ref,
                         out_ref, sc_ref,
                         qkv_scr, ctx_scr):
    # ---- EmbedderNeuronGroup + PositionalEncoder (sqrt(d) + PE folded host-side) ----
    # One (18,21)x(21,32) matmul covers all 9 tokens of both batch elements.
    x = jnp.dot(u_ref[...], we_ref[...], preferred_element_type=jnp.float32) + bpe_ref[...]

    for l in range(N_LAYERS):                                   # N=2, fully unrolled
        # ---- pre-norm multi-head self-attention sublayer ----
        x2 = _norm_k(x, a1_ref[l], g1_ref[l])
        # Fused Q|K|V projection for both batch elements: (18,32)x(32,96).
        qkv_scr[...] = (jnp.dot(x2, wqkv_ref[l], preferred_element_type=jnp.float32)
                        + bqkv_ref[l])

        for b in range(BATCH):                                  # B=2, fully unrolled
            r0 = b * MAX_SEQ
            r1 = r0 + MAX_SEQ
            for h in range(HEADS):                              # H=4, fully unrolled
                c0 = h * D_K
                q_h = qkv_scr[r0:r1, c0:c0 + D_K]                       # (S, DK)
                k_h = qkv_scr[r0:r1, D_MODEL + c0:D_MODEL + c0 + D_K]   # (S, DK)
                v_h = qkv_scr[r0:r1, 2 * D_MODEL + c0:2 * D_MODEL + c0 + D_K]

                s = jax.lax.dot_general(q_h, k_h, (((1,), (1,)), ((), ())),
                                        preferred_element_type=jnp.float32) * INV_SQRT_DK
                s = s - jnp.max(s, axis=-1, keepdims=True)
                e = jnp.exp(s)
                p = e * pl.reciprocal(jnp.sum(e, axis=-1, keepdims=True), approx=True)

                # Lane-packed softmax scores: (layer,batch) slab, heads along lanes.
                sc_ref[l * BATCH + b, :, h * MAX_SEQ:(h + 1) * MAX_SEQ] = p
                # Head context written head-major so the unsplit Wo applies directly.
                ctx_scr[r0:r1, c0:c0 + D_K] = jnp.dot(
                    p, v_h, preferred_element_type=jnp.float32)

        # Single fused output projection across heads AND batch: (18,32)x(32,32).
        x = x + jnp.dot(ctx_scr[...], wo_ref[l],
                        preferred_element_type=jnp.float32) + bo_ref[l]   # dropout_1 == id

        # ---- pre-norm feed-forward sublayer (batch fused) ----
        x2 = _norm_k(x, a2_ref[l], g2_ref[l])
        h1 = jnp.maximum(
            jnp.dot(x2, w1_ref[l], preferred_element_type=jnp.float32) + b1_ref[l], 0.0)
        x = x + jnp.dot(h1, w2_ref[l], preferred_element_type=jnp.float32) + b2_ref[l]

    # ---- final Norm ----
    out_ref[...] = _norm_k(x, na_ref[...], nb_ref[...])


def encoder_neuron_group_forward(src, kp):
    """src: (B, 100) -> (Norm(x): (B, 9, D), [scores_l: (B, H, 9, 9)] * N_LAYERS)."""
    # Token-major packing of the 100 input features (layout plumbing only):
    #   u[b, i, :16] = src[b, 16i:16i+16]   for tokens 0..4  (Linear(16, d_model))
    #   u[b, i, 16:] = src[b, 80+5j:85+5j]  for tokens 5..8  (Linear(5,  d_model))
    u = jnp.zeros((BATCH, MAX_SEQ, CHUNK), jnp.float32)
    u = u.at[:, :5, :16].set(src[:, :5 * 16].reshape(BATCH, 5, 16))
    u = u.at[:, 5:, 16:].set(src[:, 5 * 16:].reshape(BATCH, 4, 5))
    u = u.reshape(ROWS, CHUNK)

    in_arrays = [u, kp["we"], kp["bpe"],
                 kp["a1"], kp["g1"], kp["wqkv"], kp["bqkv"], kp["wo"], kp["bo"],
                 kp["a2"], kp["g2"], kp["w1"], kp["b1"], kp["w2"], kp["b2"],
                 kp["na"], kp["nb"]]

    out, sc = pl.pallas_call(
        encoder_group_kernel,
        out_shape=(jax.ShapeDtypeStruct((ROWS, D_MODEL), jnp.float32),
                   jax.ShapeDtypeStruct((N_LAYERS * BATCH, MAX_SEQ, HEADS * MAX_SEQ),
                                        jnp.float32)),
        scratch_shapes=[pltpu.VMEM((ROWS, 3 * D_MODEL), jnp.float32),   # fused QKV
                        pltpu.VMEM((ROWS, D_MODEL), jnp.float32)],      # head-major context
    )(*in_arrays)

    out = out.reshape(BATCH, MAX_SEQ, D_MODEL)
    # (L*B, S, H*S) -> (L, B, H, S, S)   (cheap XLA layout op outside the kernel)
    sc = sc.reshape(N_LAYERS, BATCH, MAX_SEQ, HEADS, MAX_SEQ).transpose(0, 1, 3, 2, 4)
    scores = [sc[l] for l in range(N_LAYERS)]
    return out, scores


# ---------------- parameter construction (deterministic, synthetic) ----------------
def make_positional_encoding():
    pe = np.zeros((MAX_SEQ, D_MODEL), np.float32)
    position = np.arange(MAX_SEQ, dtype=np.float32)[:, None]
    div = np.exp(np.arange(0, D_MODEL, 2, dtype=np.float32) * (-math.log(10000.0) / D_MODEL))
    pe[:, 0::2] = np.sin(position * div)
    pe[:, 1::2] = np.cos(position * div)
    return jnp.asarray(pe)


def init_params(key):
    keys = iter(jax.random.split(key, 64))

    def w(shape, fan_in):
        return jax.random.normal(next(keys), shape, jnp.float32) / math.sqrt(fan_in)

    def b(shape):
        return 0.02 * jax.random.normal(next(keys), shape, jnp.float32)

    def norm_pair():
        a = 1.0 + 0.02 * jax.random.normal(next(keys), (D_MODEL,), jnp.float32)
        g = 0.02 * jax.random.normal(next(keys), (D_MODEL,), jnp.float32)
        return a, g

    params = {
        "w_l1": w((16, D_MODEL), 16), "b_l1": b((D_MODEL,)),     # EmbedderNeuronGroup.neuron_l1
        "w_l2": w((5, D_MODEL), 5),  "b_l2": b((D_MODEL,)),      # EmbedderNeuronGroup.neuron_l2
        "pe": make_positional_encoding(),                        # (S, D)
    }
    layers = []
    for _ in range(N_LAYERS):
        a1, g1 = norm_pair()
        wq, bq = w((D_MODEL, D_MODEL), D_MODEL), b((D_MODEL,))
        wk, bk = w((D_MODEL, D_MODEL), D_MODEL), b((D_MODEL,))
        wv, bv = w((D_MODEL, D_MODEL), D_MODEL), b((D_MODEL,))
        wo, bo = w((D_MODEL, D_MODEL), D_MODEL), b((D_MODEL,))
        a2, g2 = norm_pair()
        w1, b1 = w((D_MODEL, D_FF), D_MODEL), b((D_FF,))
        w2, b2 = w((D_FF, D_MODEL), D_FF), b((D_MODEL,))
        layers.append((a1, g1, wq, bq, wk, bk, wv, bv, wo, bo, a2, g2, w1, b1, w2, b2))
    params["layers"] = layers
    params["norm_a"], params["norm_b"] = norm_pair()
    return params


def pack_params(params):
    """One-time host-side repacking of module params into kernel-friendly layouts."""
    L = params["layers"]

    def stack(i):
        return jnp.stack([lp[i] for lp in L], axis=0)

    # Per-token embedding bias (tokens 0..4 -> b_l1, 5..8 -> b_l2), with the sqrt(d_model)
    # scale and the positional encoding folded in, then tiled across the batch.
    bemb_tok = jnp.concatenate([jnp.tile(params["b_l1"][None], (5, 1)),
                                jnp.tile(params["b_l2"][None], (MAX_SEQ - 5, 1))], axis=0)
    bpe_tok = bemb_tok * SQRT_D + params["pe"]                                  # (S, D)

    wqkv = jnp.concatenate([stack(2), stack(4), stack(6)], axis=2)              # (N, D, 3D)
    bqkv = jnp.concatenate([stack(3), stack(5), stack(7)], axis=1)[:, None, :]  # (N, 1, 3D)

    return {
        "we": jnp.concatenate([params["w_l1"], params["w_l2"]], axis=0) * SQRT_D,  # (21, D)
        "bpe": jnp.tile(bpe_tok, (BATCH, 1)),                                      # (B*S, D)
        "a1": stack(0)[:, None, :], "g1": stack(1)[:, None, :],
        "wqkv": wqkv, "bqkv": bqkv,
        "wo": stack(8), "bo": stack(9)[:, None, :],                                # unsplit Wo
        "a2": stack(10)[:, None, :], "g2": stack(11)[:, None, :],
        "w1": stack(12), "b1": stack(13)[:, None, :],
        "w2": stack(14), "b2": stack(15)[:, None, :],
        "na": params["norm_a"][None, :], "nb": params["norm_b"][None, :],
    }


# ---------------- plain-JAX reference (same math, high precision) ----------------
def _norm_ref(x, alpha, bias):
    mean = jnp.mean(x, axis=-1, keepdims=True)
    var = jnp.sum((x - mean) ** 2, axis=-1, keepdims=True) / (x.shape[-1] - 1)
    return alpha * (x - mean) / (jnp.sqrt(var) + EPS) + bias


def ref_forward(src, params):
    P = jax.lax.Precision.HIGHEST
    toks = []
    for i in range(5):
        toks.append(jnp.dot(src[:, i * 16:(i + 1) * 16], params["w_l1"], precision=P) + params["b_l1"])
    for j in range(4):
        toks.append(jnp.dot(src[:, 80 + j * 5:80 + (j + 1) * 5], params["w_l2"], precision=P) + params["b_l2"])
    x = jnp.stack(toks, axis=1)                                 # (B, 9, D)
    x = x * SQRT_D + params["pe"][None]
    scores_all = []
    for (a1, g1, wq, bq, wk, bk, wv, bv, wo, bo, a2, g2, w1, b1, w2, b2) in params["layers"]:
        x2 = _norm_ref(x, a1, g1)
        q = jnp.einsum("bsd,de->bse", x2, wq, precision=P) + bq
        k = jnp.einsum("bsd,de->bse", x2, wk, precision=P) + bk
        v = jnp.einsum("bsd,de->bse", x2, wv, precision=P) + bv
        qh = q.reshape(BATCH, MAX_SEQ, HEADS, D_K).transpose(0, 2, 1, 3)
        kh = k.reshape(BATCH, MAX_SEQ, HEADS, D_K).transpose(0, 2, 1, 3)
        vh = v.reshape(BATCH, MAX_SEQ, HEADS, D_K).transpose(0, 2, 1, 3)
        s = jnp.einsum("bhqd,bhkd->bhqk", qh, kh, precision=P) / SQRT_DK
        p = jax.nn.softmax(s, axis=-1)
        o = jnp.einsum("bhqk,bhkd->bhqd", p, vh, precision=P)
        concat = o.transpose(0, 2, 1, 3).reshape(BATCH, MAX_SEQ, D_MODEL)
        x = x + jnp.einsum("bsd,de->bse", concat, wo, precision=P) + bo
        x2 = _norm_ref(x, a2, g2)
        h1 = jax.nn.relu(jnp.einsum("bsd,df->bsf", x2, w1, precision=P) + b1)
        x = x + jnp.einsum("bsf,fd->bsd", h1, w2, precision=P) + b2
        scores_all.append(p)
    return _norm_ref(x, params["norm_a"], params["norm_b"]), scores_all


if __name__ == "__main__":
    key = jax.random.PRNGKey(0)
    pkey, skey = jax.random.split(key)
    params = init_params(pkey)
    kparams = pack_params(params)
    src = jax.random.normal(skey, (BATCH, SRC_DIM), jnp.float32)   # EncoderNeuronGroup input: [batch, 100]

    fwd = jax.jit(encoder_neuron_group_forward)
    out, scores = fwd(src, kparams)
    out = jax.block_until_ready(out)
    scores = [jax.block_until_ready(s) for s in scores]

    assert out.shape == (BATCH, MAX_SEQ, D_MODEL)
    assert len(scores) == N_LAYERS and scores[0].shape == (BATCH, HEADS, MAX_SEQ, MAX_SEQ)

    ref_out, ref_scores = ref_forward(src, params)
    np.testing.assert_allclose(np.asarray(out), np.asarray(ref_out), atol=5e-3, rtol=5e-3)
    for s, rs in zip(scores, ref_scores):
        np.testing.assert_allclose(np.asarray(s), np.asarray(rs), atol=5e-3, rtol=5e-3)

    print("KERNEL_OK")
</pallas_src>

<mosaic_0001>
module attributes {stable_mosaic.version = 11 : i64} {
  func.func @encoder_group_kernel(%arg0: memref<18x21xf32, #tpu.memory_space<vmem>>, %arg1: memref<21x32xf32, #tpu.memory_space<vmem>>, %arg2: memref<18x32xf32, #tpu.memory_space<vmem>>, %arg3: memref<2x1x32xf32, #tpu.memory_space<vmem>>, %arg4: memref<2x1x32xf32, #tpu.memory_space<vmem>>, %arg5: memref<2x32x96xf32, #tpu.memory_space<vmem>>, %arg6: memref<2x1x96xf32, #tpu.memory_space<vmem>>, %arg7: memref<2x32x32xf32, #tpu.memory_space<vmem>>, %arg8: memref<2x1x32xf32, #tpu.memory_space<vmem>>, %arg9: memref<2x1x32xf32, #tpu.memory_space<vmem>>, %arg10: memref<2x1x32xf32, #tpu.memory_space<vmem>>, %arg11: memref<2x32x64xf32, #tpu.memory_space<vmem>>, %arg12: memref<2x1x64xf32, #tpu.memory_space<vmem>>, %arg13: memref<2x64x32xf32, #tpu.memory_space<vmem>>, %arg14: memref<2x1x32xf32, #tpu.memory_space<vmem>>, %arg15: memref<1x32xf32, #tpu.memory_space<vmem>>, %arg16: memref<1x32xf32, #tpu.memory_space<vmem>>, %arg17: memref<18x32xf32, #tpu.memory_space<vmem>>, %arg18: memref<4x9x36xf32, #tpu.memory_space<vmem>>, %arg19: memref<18x96xf32, #tpu.memory_space<vmem>>, %arg20: memref<18x32xf32, #tpu.memory_space<vmem>>) attributes {dimension_semantics = [], scalar_prefetch = 0 : i64, scratch_operands = 2 : i64, tpu.core_type = #tpu.core_type<tc>} {
    %c0 = arith.constant 0 : index
    %c0_0 = arith.constant 0 : index
    %0 = vector.load %arg0[%c0, %c0_0] : memref<18x21xf32, #tpu.memory_space<vmem>>, vector<18x21xf32>
    %c0_1 = arith.constant 0 : index
    %c0_2 = arith.constant 0 : index
    %1 = vector.load %arg1[%c0_1, %c0_2] : memref<21x32xf32, #tpu.memory_space<vmem>>, vector<21x32xf32>
    %cst = arith.constant dense<0.000000e+00> : vector<18x32xf32>
    %2 = tpu.matmul %0, %1, %cst {dimension_numbers = #tpu.dot_dimension_numbers<[1], [0], [0], [1], [0, 0, 1, 1], [], []>} : vector<18x21xf32>, vector<21x32xf32>, vector<18x32xf32> -> vector<18x32xf32>
    %c0_3 = arith.constant 0 : index
    %c0_4 = arith.constant 0 : index
    %3 = vector.load %arg2[%c0_3, %c0_4] : memref<18x32xf32, #tpu.memory_space<vmem>>, vector<18x32xf32>
    %4 = arith.addf %2, %3 : vector<18x32xf32>
    %c0_5 = arith.constant 0 : index
    %c0_6 = arith.constant 0 : index
    %c0_7 = arith.constant 0 : index
    %5 = vector.load %arg3[%c0_5, %c0_6, %c0_7] : memref<2x1x32xf32, #tpu.memory_space<vmem>>, vector<1x1x32xf32>
    %6 = vector.shape_cast %5 : vector<1x1x32xf32> to vector<1x32xf32>
    %c0_8 = arith.constant 0 : index
    %c0_9 = arith.constant 0 : index
    %c0_10 = arith.constant 0 : index
    %7 = vector.load %arg4[%c0_8, %c0_9, %c0_10] : memref<2x1x32xf32, #tpu.memory_space<vmem>>, vector<1x1x32xf32>
    %8 = vector.shape_cast %7 : vector<1x1x32xf32> to vector<1x32xf32>
    %cst_11 = arith.constant dense<0.000000e+00> : vector<18xf32>
    %9 = vector.multi_reduction <add>, %4, %cst_11 [1] : vector<18x32xf32> to vector<18xf32>
    %10 = vector.shape_cast %9 : vector<18xf32> to vector<18x1xf32>
    %cst_12 = arith.constant 3.200000e+01 : f32
    %11 = vector.broadcast %cst_12 : f32 to vector<18x1xf32>
    %12 = arith.divf %10, %11 : vector<18x1xf32>
    %13 = vector.broadcast %12 : vector<18x1xf32> to vector<18x32xf32>
    %14 = arith.subf %4, %13 : vector<18x32xf32>
    %15 = arith.mulf %14, %14 : vector<18x32xf32>
    %cst_13 = arith.constant dense<0.000000e+00> : vector<18xf32>
    %16 = vector.multi_reduction <add>, %15, %cst_13 [1] : vector<18x32xf32> to vector<18xf32>
    %17 = vector.shape_cast %16 : vector<18xf32> to vector<18x1xf32>
    %cst_14 = arith.constant 0.0322580636 : f32
    %18 = vector.broadcast %cst_14 : f32 to vector<18x1xf32>
    %19 = arith.mulf %17, %18 : vector<18x1xf32>
    %20 = math.sqrt %19 : vector<18x1xf32>
    %cst_15 = arith.constant 9.99999997E-7 : f32
    %21 = vector.broadcast %cst_15 : f32 to vector<18x1xf32>
    %22 = arith.addf %20, %21 : vector<18x1xf32>
    %23 = tpu.reciprocal %22 {approx = true} : vector<18x1xf32> -> vector<18x1xf32>
    %24 = vector.broadcast %12 : vector<18x1xf32> to vector<18x32xf32>
    %25 = arith.subf %4, %24 : vector<18x32xf32>
    %26 = vector.broadcast %6 : vector<1x32xf32> to vector<18x32xf32>
    %27 = arith.mulf %26, %25 : vector<18x32xf32>
    %28 = vector.broadcast %23 : vector<18x1xf32> to vector<18x32xf32>
    %29 = arith.mulf %27, %28 : vector<18x32xf32>
    %30 = vector.broadcast %8 : vector<1x32xf32> to vector<18x32xf32>
    %31 = arith.addf %29, %30 : vector<18x32xf32>
    %c0_16 = arith.constant 0 : index
    %c0_17 = arith.constant 0 : index
    %c0_18 = arith.constant 0 : index
    %32 = vector.load %arg5[%c0_16, %c0_17, %c0_18] : memref<2x32x96xf32, #tpu.memory_space<vmem>>, vector<1x32x96xf32>
    %33 = vector.shape_cast %32 : vector<1x32x96xf32> to vector<32x96xf32>
    %cst_19 = arith.constant dense<0.000000e+00> : vector<18x96xf32>
    %34 = tpu.matmul %31, %33, %cst_19 {dimension_numbers = #tpu.dot_dimension_numbers<[1], [0], [0], [1], [0, 0, 1, 1], [], []>} : vector<18x32xf32>, vector<32x96xf32>, vector<18x96xf32> -> vector<18x96xf32>
    %c0_20 = arith.constant 0 : index
    %c0_21 = arith.constant 0 : index
    %c0_22 = arith.constant 0 : index
    %35 = vector.load %arg6[%c0_20, %c0_21, %c0_22] : memref<2x1x96xf32, #tpu.memory_space<vmem>>, vector<1x1x96xf32>
    %36 = vector.shape_cast %35 : vector<1x1x96xf32> to vector<1x96xf32>
    %37 = vector.broadcast %36 : vector<1x96xf32> to vector<18x96xf32>
    %38 = arith.addf %34, %37 : vector<18x96xf32>
    %c0_23 = arith.constant 0 : index
    %c0_24 = arith.constant 0 : index
    %39 = vector.load %arg19[%c0_23, %c0_24] : memref<18x96xf32, #tpu.memory_space<vmem>>, vector<18x96xf32>
    tpu.vector_store %arg19[%c0_23, %c0_24], %38 {strides = array<i32>} : memref<18x96xf32, #tpu.memory_space<vmem>>, vector<18x96xf32>,
    %c0_25 = arith.constant 0 : index
    %c0_26 = arith.constant 0 : index
    %40 = vector.load %arg19[%c0_25, %c0_26] : memref<18x96xf32, #tpu.memory_space<vmem>>, vector<9x8xf32>
    %c0_27 = arith.constant 0 : index
    %c32 = arith.constant 32 : index
    %41 = vector.load %arg19[%c0_27, %c32] : memref<18x96xf32, #tpu.memory_space<vmem>>, vector<9x8xf32>
    %c0_28 = arith.constant 0 : index
    %c64 = arith.constant 64 : index
    %42 = vector.load %arg19[%c0_28, %c64] : memref<18x96xf32, #tpu.memory_space<vmem>>, vector<9x8xf32>
    %cst_29 = arith.constant dense<0.000000e+00> : vector<9x9xf32>
    %43 = tpu.matmul %40, %41, %cst_29 {dimension_numbers = #tpu.dot_dimension_numbers<[1], [1], [0], [0], [0, 0, 1, 0], [], []>} : vector<9x8xf32>, vector<9x8xf32>, vector<9x9xf32> -> vector<9x9xf32>
    %cst_30 = arith.constant 0.353553385 : f32
    %44 = vector.broadcast %cst_30 : f32 to vector<9x9xf32>
    %45 = arith.mulf %43, %44 : vector<9x9xf32>
    %cst_31 = arith.constant dense<0xFF800000> : vector<9xf32>
    %46 = vector.multi_reduction <maximumf>, %45, %cst_31 [1] : vector<9x9xf32> to vector<9xf32>
    %47 = vector.shape_cast %46 : vector<9xf32> to vector<9x1xf32>
    %48 = vector.broadcast %47 : vector<9x1xf32> to vector<9x9xf32>
    %49 = arith.subf %45, %48 : vector<9x9xf32>
    %50 = math.exp %49 : vector<9x9xf32>
    %cst_32 = arith.constant dense<0.000000e+00> : vector<9xf32>
    %51 = vector.multi_reduction <add>, %50, %cst_32 [1] : vector<9x9xf32> to vector<9xf32>
    %52 = vector.shape_cast %51 : vector<9xf32> to vector<9x1xf32>
    %53 = tpu.reciprocal %52 {approx = true} : vector<9x1xf32> -> vector<9x1xf32>
    %54 = vector.broadcast %53 : vector<9x1xf32> to vector<9x9xf32>
    %55 = arith.mulf %50, %54 : vector<9x9xf32>
    %c0_33 = arith.constant 0 : index
    %c0_34 = arith.constant 0 : index
    %c0_35 = arith.constant 0 : index
    %56 = vector.load %arg18[%c0_33, %c0_34, %c0_35] : memref<4x9x36xf32, #tpu.memory_space<vmem>>, vector<1x9x9xf32>
    %57 = vector.shape_cast %56 : vector<1x9x9xf32> to vector<9x9xf32>
    %58 = vector.shape_cast %55 : vector<9x9xf32> to vector<1x9x9xf32>
    tpu.vector_store %arg18[%c0_33, %c0_34, %c0_35], %58 {strides = array<i32>} : memref<4x9x36xf32, #tpu.memory_space<vmem>>, vector<1x9x9xf32>,
    %cst_36 = arith.constant dense<0.000000e+00> : vector<9x8xf32>
    %59 = tpu.matmul %55, %42, %cst_36 {dimension_numbers = #tpu.dot_dimension_numbers<[1], [0], [0], [1], [0, 0, 1, 1], [], []>} : vector<9x9xf32>, vector<9x8xf32>, vector<9x8xf32> -> vector<9x8xf32>
    %c0_37 = arith.constant 0 : index
    %c0_38 = arith.constant 0 : index
    %60 = vector.load %arg20[%c0_37, %c0_38] : memref<18x32xf32, #tpu.memory_space<vmem>>, vector<9x8xf32>
    tpu.vector_store %arg20[%c0_37, %c0_38], %59 {strides = array<i32>} : memref<18x32xf32, #tpu.memory_space<vmem>>, vector<9x8xf32>,
    %c0_39 = arith.constant 0 : index
    %c8 = arith.constant 8 : index
    %61 = vector.load %arg19[%c0_39, %c8] : memref<18x96xf32, #tpu.memory_space<vmem>>, vector<9x8xf32>
    %c0_40 = arith.constant 0 : index
    %c40 = arith.constant 40 : index
    %62 = vector.load %arg19[%c0_40, %c40] : memref<18x96xf32, #tpu.memory_space<vmem>>, vector<9x8xf32>
    %c0_41 = arith.constant 0 : index
    %c72 = arith.constant 72 : index
    %63 = vector.load %arg19[%c0_41, %c72] : memref<18x96xf32, #tpu.memory_space<vmem>>, vector<9x8xf32>
    %cst_42 = arith.constant dense<0.000000e+00> : vector<9x9xf32>
    %64 = tpu.matmul %61, %62, %cst_42 {dimension_numbers = #tpu.dot_dimension_numbers<[1], [1], [0], [0], [0, 0, 1, 0], [], []>} : vector<9x8xf32>, vector<9x8xf32>, vector<9x9xf32> -> vector<9x9xf32>
    %cst_43 = arith.constant 0.353553385 : f32
    %65 = vector.broadcast %cst_43 : f32 to vector<9x9xf32>
    %66 = arith.mulf %64, %65 : vector<9x9xf32>
    %cst_44 = arith.constant dense<0xFF800000> : vector<9xf32>
    %67 = vector.multi_reduction <maximumf>, %66, %cst_44 [1] : vector<9x9xf32> to vector<9xf32>
    %68 = vector.shape_cast %67 : vector<9xf32> to vector<9x1xf32>
    %69 = vector.broadcast %68 : vector<9x1xf32> to vector<9x9xf32>
    %70 = arith.subf %66, %69 : vector<9x9xf32>
    %71 = math.exp %70 : vector<9x9xf32>
    %cst_45 = arith.constant dense<0.000000e+00> : vector<9xf32>
    %72 = vector.multi_reduction <add>, %71, %cst_45 [1] : vector<9x9xf32> to vector<9xf32>
    %73 = vector.shape_cast %72 : vector<9xf32> to vector<9x1xf32>
    %74 = tpu.reciprocal %73 {approx = true} : vector<9x1xf32> -> vector<9x1xf32>
    %75 = vector.broadcast %74 : vector<9x1xf32> to vector<9x9xf32>
    %76 = arith.mulf %71, %75 : vector<9x9xf32>
    %c0_46 = arith.constant 0 : index
    %c0_47 = arith.constant 0 : index
    %c9 = arith.constant 9 : index
    %77 = vector.load %arg18[%c0_46, %c0_47, %c9] : memref<4x9x36xf32, #tpu.memory_space<vmem>>, vector<1x9x9xf32>
    %78 = vector.shape_cast %77 : vector<1x9x9xf32> to vector<9x9xf32>
    %79 = vector.shape_cast %76 : vector<9x9xf32> to vector<1x9x9xf32>
    tpu.vector_store %arg18[%c0_46, %c0_47, %c9], %79 {strides = array<i32>} : memref<4x9x36xf32, #tpu.memory_space<vmem>>, vector<1x9x9xf32>,
    %cst_48 = arith.constant dense<0.000000e+00> : vector<9x8xf32>
    %80 = tpu.matmul %76, %63, %cst_48 {dimension_numbers = #tpu.dot_dimension_numbers<[1], [0], [0], [1], [0, 0, 1, 1], [], []>} : vector<9x9xf32>, vector<9x8xf32>, vector<9x8xf32> -> vector<9x8xf32>
    %c0_49 = arith.constant 0 : index
    %c8_50 = arith.constant 8 : index
    %81 = vector.load %arg20[%c0_49, %c8_50] : memref<18x32xf32, #tpu.memory_space<vmem>>, vector<9x8xf32>
    tpu.vector_store %arg20[%c0_49, %c8_50], %80 {strides = array<i32>} : memref<18x32xf32, #tpu.memory_space<vmem>>, vector<9x8xf32>,
    %c0_51 = arith.constant 0 : index
    %c16 = arith.constant 16 : index
    %82 = vector.load %arg19[%c0_51, %c16] : memref<18x96xf32, #tpu.memory_space<vmem>>, vector<9x8xf32>
    %c0_52 = arith.constant 0 : index
    %c48 = arith.constant 48 : index
    %83 = vector.load %arg19[%c0_52, %c48] : memref<18x96xf32, #tpu.memory_space<vmem>>, vector<9x8xf32>
    %c0_53 = arith.constant 0 : index
    %c80 = arith.constant 80 : index
    %84 = vector.load %arg19[%c0_53, %c80] : memref<18x96xf32, #tpu.memory_space<vmem>>, vector<9x8xf32>
    %cst_54 = arith.constant dense<0.000000e+00> : vector<9x9xf32>
    %85 = tpu.matmul %82, %83, %cst_54 {dimension_numbers = #tpu.dot_dimension_numbers<[1], [1], [0], [0], [0, 0, 1, 0], [], []>} : vector<9x8xf32>, vector<9x8xf32>, vector<9x9xf32> -> vector<9x9xf32>
    %cst_55 = arith.constant 0.353553385 : f32
    %86 = vector.broadcast %cst_55 : f32 to vector<9x9xf32>
    %87 = arith.mulf %85, %86 : vector<9x9xf32>
    %cst_56 = arith.constant dense<0xFF800000> : vector<9xf32>
    %88 = vector.multi_reduction <maximumf>, %87, %cst_56 [1] : vector<9x9xf32> to vector<9xf32>
    %89 = vector.shape_cast %88 : vector<9xf32> to vector<9x1xf32>
    %90 = vector.broadcast %89 : vector<9x1xf32> to vector<9x9xf32>
    %91 = arith.subf %87, %90 : vector<9x9xf32>
    %92 = math.exp %91 : vector<9x9xf32>
    %cst_57 = arith.constant dense<0.000000e+00> : vector<9xf32>
    %93 = vector.multi_reduction <add>, %92, %cst_57 [1] : vector<9x9xf32> to vector<9xf32>
    %94 = vector.shape_cast %93 : vector<9xf32> to vector<9x1xf32>
    %95 = tpu.reciprocal %94 {approx = true} : vector<9x1xf32> -> vector<9x1xf32>
    %96 = vector.broadcast %95 : vector<9x1xf32> to vector<9x9xf32>
    %97 = arith.mulf %92, %96 : vector<9x9xf32>
    %c0_58 = arith.constant 0 : index
    %c0_59 = arith.constant 0 : index
    %c18 = arith.constant 18 : index
    %98 = vector.load %arg18[%c0_58, %c0_59, %c18] : memref<4x9x36xf32, #tpu.memory_space<vmem>>, vector<1x9x9xf32>
    %99 = vector.shape_cast %98 : vector<1x9x9xf32> to vector<9x9xf32>
    %100 = vector.shape_cast %97 : vector<9x9xf32> to vector<1x9x9xf32>
    tpu.vector_store %arg18[%c0_58, %c0_59, %c18], %100 {strides = array<i32>} : memref<4x9x36xf32, #tpu.memory_space<vmem>>, vector<1x9x9xf32>,
    %cst_60 = arith.constant dense<0.000000e+00> : vector<9x8xf32>
    %101 = tpu.matmul %97, %84, %cst_60 {dimension_numbers = #tpu.dot_dimension_numbers<[1], [0], [0], [1], [0, 0, 1, 1], [], []>} : vector<9x9xf32>, vector<9x8xf32>, vector<9x8xf32> -> vector<9x8xf32>
    %c0_61 = arith.constant 0 : index
    %c16_62 = arith.constant 16 : index
    %102 = vector.load %arg20[%c0_61, %c16_62] : memref<18x32xf32, #tpu.memory_space<vmem>>, vector<9x8xf32>
    tpu.vector_store %arg20[%c0_61, %c16_62], %101 {strides = array<i32>} : memref<18x32xf32, #tpu.memory_space<vmem>>, vector<9x8xf32>,
    %c0_63 = arith.constant 0 : index
    %c24 = arith.constant 24 : index
    %103 = vector.load %arg19[%c0_63, %c24] : memref<18x96xf32, #tpu.memory_space<vmem>>, vector<9x8xf32>
    %c0_64 = arith.constant 0 : index
    %c56 = arith.constant 56 : index
    %104 = vector.load %arg19[%c0_64, %c56] : memref<18x96xf32, #tpu.memory_space<vmem>>, vector<9x8xf32>
    %c0_65 = arith.constant 0 : index
    %c88 = arith.constant 88 : index
    %105 = vector.load %arg19[%c0_65, %c88] : memref<18x96xf32, #tpu.memory_space<vmem>>, vector<9x8xf32>
    %cst_66 = arith.constant dense<0.000000e+00> : vector<9x9xf32>
    %106 = tpu.matmul %103, %104, %cst_66 {dimension_numbers = #tpu.dot_dimension_numbers<[1], [1], [0], [0], [0, 0, 1, 0], [], []>} : vector<9x8xf32>, vector<9x8xf32>, vector<9x9xf32> -> vector<9x9xf32>
    %cst_67 = arith.constant 0.353553385 : f32
    %107 = vector.broadcast %cst_67 : f32 to vector<9x9xf32>
    %108 = arith.mulf %106, %107 : vector<9x9xf32>
    %cst_68 = arith.constant dense<0xFF800000> : vector<9xf32>
    %109 = vector.multi_reduction <maximumf>, %108, %cst_68 [1] : vector<9x9xf32> to vector<9xf32>
    %110 = vector.shape_cast %109 : vector<9xf32> to vector<9x1xf32>
    %111 = vector.broadcast %110 : vector<9x1xf32> to vector<9x9xf32>
    %112 = arith.subf %108, %111 : vector<9x9xf32>
    %113 = math.exp %112 : vector<9x9xf32>
    %cst_69 = arith.constant dense<0.000000e+00> : vector<9xf32>
    %114 = vector.multi_reduction <add>, %113, %cst_69 [1] : vector<9x9xf32> to vector<9xf32>
    %115 = vector.shape_cast %114 : vector<9xf32> to vector<9x1xf32>
    %116 = tpu.reciprocal %115 {approx = true} : vector<9x1xf32> -> vector<9x1xf32>
    %117 = vector.broadcast %116 : vector<9x1xf32> to vector<9x9xf32>
    %118 = arith.mulf %113, %117 : vector<9x9xf32>
    %c0_70 = arith.constant 0 : index
    %c0_71 = arith.constant 0 : index
    %c27 = arith.constant 27 : index
    %119 = vector.load %arg18[%c0_70, %c0_71, %c27] : memref<4x9x36xf32, #tpu.memory_space<vmem>>, vector<1x9x9xf32>
    %120 = vector.shape_cast %119 : vector<1x9x9xf32> to vector<9x9xf32>
    %121 = vector.shape_cast %118 : vector<9x9xf32> to vector<1x9x9xf32>
    tpu.vector_store %arg18[%c0_70, %c0_71, %c27], %121 {strides = array<i32>} : memref<4x9x36xf32, #tpu.memory_space<vmem>>, vector<1x9x9xf32>,
    %cst_72 = arith.constant dense<0.000000e+00> : vector<9x8xf32>
    %122 = tpu.matmul %118, %105, %cst_72 {dimension_numbers = #tpu.dot_dimension_numbers<[1], [0], [0], [1], [0, 0, 1, 1], [], []>} : vector<9x9xf32>, vector<9x8xf32>, vector<9x8xf32> -> vector<9x8xf32>
    %c0_73 = arith.constant 0 : index
    %c24_74 = arith.constant 24 : index
    %123 = vector.load %arg20[%c0_73, %c24_74] : memref<18x32xf32, #tpu.memory_space<vmem>>, vector<9x8xf32>
    tpu.vector_store %arg20[%c0_73, %c24_74], %122 {strides = array<i32>} : memref<18x32xf32, #tpu.memory_space<vmem>>, vector<9x8xf32>,
    %c9_75 = arith.constant 9 : index
    %c0_76 = arith.constant 0 : index
    %124 = vector.load %arg19[%c9_75, %c0_76] : memref<18x96xf32, #tpu.memory_space<vmem>>, vector<9x8xf32>
    %c9_77 = arith.constant 9 : index
    %c32_78 = arith.constant 32 : index
    %125 = vector.load %arg19[%c9_77, %c32_78] : memref<18x96xf32, #tpu.memory_space<vmem>>, vector<9x8xf32>
    %c9_79 = arith.constant 9 : index
    %c64_80 = arith.constant 64 : index
    %126 = vector.load %arg19[%c9_79, %c64_80] : memref<18x96xf32, #tpu.memory_space<vmem>>, vector<9x8xf32>
    %cst_81 = arith.constant dense<0.000000e+00> : vector<9x9xf32>
    %127 = tpu.matmul %124, %125, %cst_81 {dimension_numbers = #tpu.dot_dimension_numbers<[1], [1], [0], [0], [0, 0, 1, 0], [], []>} : vector<9x8xf32>, vector<9x8xf32>, vector<9x9xf32> -> vector<9x9xf32>
    %cst_82 = arith.constant 0.353553385 : f32
    %128 = vector.broadcast %cst_82 : f32 to vector<9x9xf32>
    %129 = arith.mulf %127, %128 : vector<9x9xf32>
    %cst_83 = arith.constant dense<0xFF800000> : vector<9xf32>
    %130 = vector.multi_reduction <maximumf>, %129, %cst_83 [1] : vector<9x9xf32> to vector<9xf32>
    %131 = vector.shape_cast %130 : vector<9xf32> to vector<9x1xf32>
    %132 = vector.broadcast %131 : vector<9x1xf32> to vector<9x9xf32>
    %133 = arith.subf %129, %132 : vector<9x9xf32>
    %134 = math.exp %133 : vector<9x9xf32>
    %cst_84 = arith.constant dense<0.000000e+00> : vector<9xf32>
    %135 = vector.multi_reduction <add>, %134, %cst_84 [1] : vector<9x9xf32> to vector<9xf32>
    %136 = vector.shape_cast %135 : vector<9xf32> to vector<9x1xf32>
    %137 = tpu.reciprocal %136 {approx = true} : vector<9x1xf32> -> vector<9x1xf32>
    %138 = vector.broadcast %137 : vector<9x1xf32> to vector<9x9xf32>
    %139 = arith.mulf %134, %138 : vector<9x9xf32>
    %c1 = arith.constant 1 : index
    %c0_85 = arith.constant 0 : index
    %c0_86 = arith.constant 0 : index
    %140 = vector.load %arg18[%c1, %c0_85, %c0_86] : memref<4x9x36xf32, #tpu.memory_space<vmem>>, vector<1x9x9xf32>
    %141 = vector.shape_cast %140 : vector<1x9x9xf32> to vector<9x9xf32>
    %142 = vector.shape_cast %139 : vector<9x9xf32> to vector<1x9x9xf32>
    tpu.vector_store %arg18[%c1, %c0_85, %c0_86], %142 {strides = array<i32>} : memref<4x9x36xf32, #tpu.memory_space<vmem>>, vector<1x9x9xf32>,
    %cst_87 = arith.constant dense<0.000000e+00> : vector<9x8xf32>
    %143 = tpu.matmul %139, %126, %cst_87 {dimension_numbers = #tpu.dot_dimension_numbers<[1], [0], [0], [1], [0, 0, 1, 1], [], []>} : vector<9x9xf32>, vector<9x8xf32>, vector<9x8xf32> -> vector<9x8xf32>
    %c9_88 = arith.constant 9 : index
    %c0_89 = arith.constant 0 : index
    %144 = vector.load %arg20[%c9_88, %c0_89] : memref<18x32xf32, #tpu.memory_space<vmem>>, vector<9x8xf32>
    tpu.vector_store %arg20[%c9_88, %c0_89], %143 {strides = array<i32>} : memref<18x32xf32, #tpu.memory_space<vmem>>, vector<9x8xf32>,
    %c9_90 = arith.constant 9 : index
    %c8_91 = arith.constant 8 : index
    %145 = vector.load %arg19[%c9_90, %c8_91] : memref<18x96xf32, #tpu.memory_space<vmem>>, vector<9x8xf32>
    %c9_92 = arith.constant 9 : index
    %c40_93 = arith.constant 40 : index
    %146 = vector.load %arg19[%c9_92, %c40_93] : memref<18x96xf32, #tpu.memory_space<vmem>>, vector<9x8xf32>
    %c9_94 = arith.constant 9 : index
    %c72_95 = arith.constant 72 : index
    %147 = vector.load %arg19[%c9_94, %c72_95] : memref<18x96xf32, #tpu.memory_space<vmem>>, vector<9x8xf32>
    %cst_96 = arith.constant dense<0.000000e+00> : vector<9x9xf32>
    %148 = tpu.matmul %145, %146, %cst_96 {dimension_numbers = #tpu.dot_dimension_numbers<[1], [1], [0], [0], [0, 0, 1, 0], [], []>} : vector<9x8xf32>, vector<9x8xf32>, vector<9x9xf32> -> vector<9x9xf32>
    %cst_97 = arith.constant 0.353553385 : f32
    %149 = vector.broadcast %cst_97 : f32 to vector<9x9xf32>
    %150 = arith.mulf %148, %149 : vector<9x9xf32>
    %cst_98 = arith.constant dense<0xFF800000> : vector<9xf32>
    %151 = vector.multi_reduction <maximumf>, %150, %cst_98 [1] : vector<9x9xf32> to vector<9xf32>
    %152 = vector.shape_cast %151 : vector<9xf32> to vector<9x1xf32>
    %153 = vector.broadcast %152 : vector<9x1xf32> to vector<9x9xf32>
    %154 = arith.subf %150, %153 : vector<9x9xf32>
    %155 = math.exp %154 : vector<9x9xf32>
    %cst_99 = arith.constant dense<0.000000e+00> : vector<9xf32>
    %156 = vector.multi_reduction <add>, %155, %cst_99 [1] : vector<9x9xf32> to vector<9xf32>
    %157 = vector.shape_cast %156 : vector<9xf32> to vector<9x1xf32>
    %158 = tpu.reciprocal %157 {approx = true} : vector<9x1xf32> -> vector<9x1xf32>
    %159 = vector.broadcast %158 : vector<9x1xf32> to vector<9x9xf32>
    %160 = arith.mulf %155, %159 : vector<9x9xf32>
    %c1_100 = arith.constant 1 : index
    %c0_101 = arith.constant 0 : index
    %c9_102 = arith.constant 9 : index
    %161 = vector.load %arg18[%c1_100, %c0_101, %c9_102] : memref<4x9x36xf32, #tpu.memory_space<vmem>>, vector<1x9x9xf32>
    %162 = vector.shape_cast %161 : vector<1x9x9xf32> to vector<9x9xf32>
    %163 = vector.shape_cast %160 : vector<9x9xf32> to vector<1x9x9xf32>
    tpu.vector_store %arg18[%c1_100, %c0_101, %c9_102], %163 {strides = array<i32>} : memref<4x9x36xf32, #tpu.memory_space<vmem>>, vector<1x9x9xf32>,
    %cst_103 = arith.constant dense<0.000000e+00> : vector<9x8xf32>
    %164 = tpu.matmul %160, %147, %cst_103 {dimension_numbers = #tpu.dot_dimension_numbers<[1], [0], [0], [1], [0, 0, 1, 1], [], []>} : vector<9x9xf32>, vector<9x8xf32>, vector<9x8xf32> -> vector<9x8xf32>
    %c9_104 = arith.constant 9 : index
    %c8_105 = arith.constant 8 : index
    %165 = vector.load %arg20[%c9_104, %c8_105] : memref<18x32xf32, #tpu.memory_space<vmem>>, vector<9x8xf32>
    tpu.vector_store %arg20[%c9_104, %c8_105], %164 {strides = array<i32>} : memref<18x32xf32, #tpu.memory_space<vmem>>, vector<9x8xf32>,
    %c9_106 = arith.constant 9 : index
    %c16_107 = arith.constant 16 : index
    %166 = vector.load %arg19[%c9_106, %c16_107] : memref<18x96xf32, #tpu.memory_space<vmem>>, vector<9x8xf32>
    %c9_108 = arith.constant 9 : index
    %c48_109 = arith.constant 48 : index
    %167 = vector.load %arg19[%c9_108, %c48_109] : memref<18x96xf32, #tpu.memory_space<vmem>>, vector<9x8xf32>
    %c9_110 = arith.constant 9 : index
    %c80_111 = arith.constant 80 : index
    %168 = vector.load %arg19[%c9_110, %c80_111] : memref<18x96xf32, #tpu.memory_space<vmem>>, vector<9x8xf32>
    %cst_112 = arith.constant dense<0.000000e+00> : vector<9x9xf32>
    %169 = tpu.matmul %166, %167, %cst_112 {dimension_numbers = #tpu.dot_dimension_numbers<[1], [1], [0], [0], [0, 0, 1, 0], [], []>} : vector<9x8xf32>, vector<9x8xf32>, vector<9x9xf32> -> vector<9x9xf32>
    %cst_113 = arith.constant 0.353553385 : f32
    %170 = vector.broadcast %cst_113 : f32 to vector<9x9xf32>
    %171 = arith.mulf %169, %170 : vector<9x9xf32>
    %cst_114 = arith.constant dense<0xFF800000> : vector<9xf32>
    %172 = vector.multi_reduction <maximumf>, %171, %cst_114 [1] : vector<9x9xf32> to vector<9xf32>
    %173 = vector.shape_cast %172 : vector<9xf32> to vector<9x1xf32>
    %174 = vector.broadcast %173 : vector<9x1xf32> to vector<9x9xf32>
    %175 = arith.subf %171, %174 : vector<9x9xf32>
    %176 = math.exp %175 : vector<9x9xf32>
    %cst_115 = arith.constant dense<0.000000e+00> : vector<9xf32>
    %177 = vector.multi_reduction <add>, %176, %cst_115 [1] : vector<9x9xf32> to vector<9xf32>
    %178 = vector.shape_cast %177 : vector<9xf32> to vector<9x1xf32>
    %179 = tpu.reciprocal %178 {approx = true} : vector<9x1xf32> -> vector<9x1xf32>
    %180 = vector.broadcast %179 : vector<9x1xf32> to vector<9x9xf32>
    %181 = arith.mulf %176, %180 : vector<9x9xf32>
    %c1_116 = arith.constant 1 : index
    %c0_117 = arith.constant 0 : index
    %c18_118 = arith.constant 18 : index
    %182 = vector.load %arg18[%c1_116, %c0_117, %c18_118] : memref<4x9x36xf32, #tpu.memory_space<vmem>>, vector<1x9x9xf32>
    %183 = vector.shape_cast %182 : vector<1x9x9xf32> to vector<9x9xf32>
    %184 = vector.shape_cast %181 : vector<9x9xf32> to vector<1x9x9xf32>
    tpu.vector_store %arg18[%c1_116, %c0_117, %c18_118], %184 {strides = array<i32>} : memref<4x9x36xf32, #tpu.memory_space<vmem>>, vector<1x9x9xf32>,
    %cst_119 = arith.constant dense<0.000000e+00> : vector<9x8xf32>
    %185 = tpu.matmul %181, %168, %cst_119 {dimension_numbers = #tpu.dot_dimension_numbers<[1], [0], [0], [1], [0, 0, 1, 1], [], []>} : vector<9x9xf32>, vector<9x8xf32>, vector<9x8xf32> -> vector<9x8xf32>
    %c9_120 = arith.constant 9 : index
    %c16_121 = arith.constant 16 : index
    %186 = vector.load %arg20[%c9_120, %c16_121] : memref<18x32xf32, #tpu.memory_space<vmem>>, vector<9x8xf32>
    tpu.vector_store %arg20[%c9_120, %c16_121], %185 {strides = array<i32>} : memref<18x32xf32, #tpu.memory_space<vmem>>, vector<9x8xf32>,
    %c9_122 = arith.constant 9 : index
    %c24_123 = arith.constant 24 : index
    %187 = vector.load %arg19[%c9_122, %c24_123] : memref<18x96xf32, #tpu.memory_space<vmem>>, vector<9x8xf32>
    %c9_124 = arith.constant 9 : index
    %c56_125 = arith.constant 56 : index
    %188 = vector.load %arg19[%c9_124, %c56_125] : memref<18x96xf32, #tpu.memory_space<vmem>>, vector<9x8xf32>
    %c9_126 = arith.constant 9 : index
    %c88_127 = arith.constant 88 : index
    %189 = vector.load %arg19[%c9_126, %c88_127] : memref<18x96xf32, #tpu.memory_space<vmem>>, vector<9x8xf32>
    %cst_128 = arith.constant dense<0.000000e+00> : vector<9x9xf32>
    %190 = tpu.matmul %187, %188, %cst_128 {dimension_numbers = #tpu.dot_dimension_numbers<[1], [1], [0], [0], [0, 0, 1, 0], [], []>} : vector<9x8xf32>, vector<9x8xf32>, vector<9x9xf32> -> vector<9x9xf32>
    %cst_129 = arith.constant 0.353553385 : f32
    %191 = vector.broadcast %cst_129 : f32 to vector<9x9xf32>
    %192 = arith.mulf %190, %191 : vector<9x9xf32>
    %cst_130 = arith.constant dense<0xFF800000> : vector<9xf32>
    %193 = vector.multi_reduction <maximumf>, %192, %cst_130 [1] : vector<9x9xf32> to vector<9xf32>
    %194 = vector.shape_cast %193 : vector<9xf32> to vector<9x1xf32>
    %195 = vector.broadcast %194 : vector<9x1xf32> to vector<9x9xf32>
    %196 = arith.subf %192, %195 : vector<9x9xf32>
    %197 = math.exp %196 : vector<9x9xf32>
    %cst_131 = arith.constant dense<0.000000e+00> : vector<9xf32>
    %198 = vector.multi_reduction <add>, %197, %cst_131 [1] : vector<9x9xf32> to vector<9xf32>
    %199 = vector.shape_cast %198 : vector<9xf32> to vector<9x1xf32>
    %200 = tpu.reciprocal %199 {approx = true} : vector<9x1xf32> -> vector<9x1xf32>
    %201 = vector.broadcast %200 : vector<9x1xf32> to vector<9x9xf32>
    %202 = arith.mulf %197, %201 : vector<9x9xf32>
    %c1_132 = arith.constant 1 : index
    %c0_133 = arith.constant 0 : index
    %c27_134 = arith.constant 27 : index
    %203 = vector.load %arg18[%c1_132, %c0_133, %c27_134] : memref<4x9x36xf32, #tpu.memory_space<vmem>>, vector<1x9x9xf32>
    %204 = vector.shape_cast %203 : vector<1x9x9xf32> to vector<9x9xf32>
    %205 = vector.shape_cast %202 : vector<9x9xf32> to vector<1x9x9xf32>
    tpu.vector_store %arg18[%c1_132, %c0_133, %c27_134], %205 {strides = array<i32>} : memref<4x9x36xf32, #tpu.memory_space<vmem>>, vector<1x9x9xf32>,
    %cst_135 = arith.constant dense<0.000000e+00> : vector<9x8xf32>
    %206 = tpu.matmul %202, %189, %cst_135 {dimension_numbers = #tpu.dot_dimension_numbers<[1], [0], [0], [1], [0, 0, 1, 1], [], []>} : vector<9x9xf32>, vector<9x8xf32>, vector<9x8xf32> -> vector<9x8xf32>
    %c9_136 = arith.constant 9 : index
    %c24_137 = arith.constant 24 : index
    %207 = vector.load %arg20[%c9_136, %c24_137] : memref<18x32xf32, #tpu.memory_space<vmem>>, vector<9x8xf32>
    tpu.vector_store %arg20[%c9_136, %c24_137], %206 {strides = array<i32>} : memref<18x32xf32, #tpu.memory_space<vmem>>, vector<9x8xf32>,
    %c0_138 = arith.constant 0 : index
    %c0_139 = arith.constant 0 : index
    %208 = vector.load %arg20[%c0_138, %c0_139] : memref<18x32xf32, #tpu.memory_space<vmem>>, vector<18x32xf32>
    %c0_140 = arith.constant 0 : index
    %c0_141 = arith.constant 0 : index
    %c0_142 = arith.constant 0 : index
    %209 = vector.load %arg7[%c0_140, %c0_141, %c0_142] : memref<2x32x32xf32, #tpu.memory_space<vmem>>, vector<1x32x32xf32>
    %210 = vector.shape_cast %209 : vector<1x32x32xf32> to vector<32x32xf32>
    %cst_143 = arith.constant dense<0.000000e+00> : vector<18x32xf32>
    %211 = tpu.matmul %208, %210, %cst_143 {dimension_numbers = #tpu.dot_dimension_numbers<[1], [0], [0], [1], [0, 0, 1, 1], [], []>} : vector<18x32xf32>, vector<32x32xf32>, vector<18x32xf32> -> vector<18x32xf32>
    %212 = arith.addf %4, %211 : vector<18x32xf32>
    %c0_144 = arith.constant 0 : index
    %c0_145 = arith.constant 0 : index
    %c0_146 = arith.constant 0 : index
    %213 = vector.load %arg8[%c0_144, %c0_145, %c0_146] : memref<2x1x32xf32, #tpu.memory_space<vmem>>, vector<1x1x32xf32>
    %214 = vector.shape_cast %213 : vector<1x1x32xf32> to vector<1x32xf32>
    %215 = vector.broadcast %214 : vector<1x32xf32> to vector<18x32xf32>
    %216 = arith.addf %212, %215 : vector<18x32xf32>
    %c0_147 = arith.constant 0 : index
    %c0_148 = arith.constant 0 : index
    %c0_149 = arith.constant 0 : index
    %217 = vector.load %arg9[%c0_147, %c0_148, %c0_149] : memref<2x1x32xf32, #tpu.memory_space<vmem>>, vector<1x1x32xf32>
    %218 = vector.shape_cast %217 : vector<1x1x32xf32> to vector<1x32xf32>
    %c0_150 = arith.constant 0 : index
    %c0_151 = arith.constant 0 : index
    %c0_152 = arith.constant 0 : index
    %219 = vector.load %arg10[%c0_150, %c0_151, %c0_152] : memref<2x1x32xf32, #tpu.memory_space<vmem>>, vector<1x1x32xf32>
    %220 = vector.shape_cast %219 : vector<1x1x32xf32> to vector<1x32xf32>
    %cst_153 = arith.constant dense<0.000000e+00> : vector<18xf32>
    %221 = vector.multi_reduction <add>, %216, %cst_153 [1] : vector<18x32xf32> to vector<18xf32>
    %222 = vector.shape_cast %221 : vector<18xf32> to vector<18x1xf32>
    %cst_154 = arith.constant 3.200000e+01 : f32
    %223 = vector.broadcast %cst_154 : f32 to vector<18x1xf32>
    %224 = arith.divf %222, %223 : vector<18x1xf32>
    %225 = vector.broadcast %224 : vector<18x1xf32> to vector<18x32xf32>
    %226 = arith.subf %216, %225 : vector<18x32xf32>
    %227 = arith.mulf %226, %226 : vector<18x32xf32>
    %cst_155 = arith.constant dense<0.000000e+00> : vector<18xf32>
    %228 = vector.multi_reduction <add>, %227, %cst_155 [1] : vector<18x32xf32> to vector<18xf32>
    %229 = vector.shape_cast %228 : vector<18xf32> to vector<18x1xf32>
    %cst_156 = arith.constant 0.0322580636 : f32
    %230 = vector.broadcast %cst_156 : f32 to vector<18x1xf32>
    %231 = arith.mulf %229, %230 : vector<18x1xf32>
    %232 = math.sqrt %231 : vector<18x1xf32>
    %cst_157 = arith.constant 9.99999997E-7 : f32
    %233 = vector.broadcast %cst_157 : f32 to vector<18x1xf32>
    %234 = arith.addf %232, %233 : vector<18x1xf32>
    %235 = tpu.reciprocal %234 {approx = true} : vector<18x1xf32> -> vector<18x1xf32>
    %236 = vector.broadcast %224 : vector<18x1xf32> to vector<18x32xf32>
    %237 = arith.subf %216, %236 : vector<18x32xf32>
    %238 = vector.broadcast %218 : vector<1x32xf32> to vector<18x32xf32>
    %239 = arith.mulf %238, %237 : vector<18x32xf32>
    %240 = vector.broadcast %235 : vector<18x1xf32> to vector<18x32xf32>
    %241 = arith.mulf %239, %240 : vector<18x32xf32>
    %242 = vector.broadcast %220 : vector<1x32xf32> to vector<18x32xf32>
    %243 = arith.addf %241, %242 : vector<18x32xf32>
    %c0_158 = arith.constant 0 : index
    %c0_159 = arith.constant 0 : index
    %c0_160 = arith.constant 0 : index
    %244 = vector.load %arg11[%c0_158, %c0_159, %c0_160] : memref<2x32x64xf32, #tpu.memory_space<vmem>>, vector<1x32x64xf32>
    %245 = vector.shape_cast %244 : vector<1x32x64xf32> to vector<32x64xf32>
    %cst_161 = arith.constant dense<0.000000e+00> : vector<18x64xf32>
    %246 = tpu.matmul %243, %245, %cst_161 {dimension_numbers = #tpu.dot_dimension_numbers<[1], [0], [0], [1], [0, 0, 1, 1], [], []>} : vector<18x32xf32>, vector<32x64xf32>, vector<18x64xf32> -> vector<18x64xf32>
    %c0_162 = arith.constant 0 : index
    %c0_163 = arith.constant 0 : index
    %c0_164 = arith.constant 0 : index
    %247 = vector.load %arg12[%c0_162, %c0_163, %c0_164] : memref<2x1x64xf32, #tpu.memory_space<vmem>>, vector<1x1x64xf32>
    %248 = vector.shape_cast %247 : vector<1x1x64xf32> to vector<1x64xf32>
    %249 = vector.broadcast %248 : vector<1x64xf32> to vector<18x64xf32>
    %250 = arith.addf %246, %249 : vector<18x64xf32>
    %cst_165 = arith.constant 0.000000e+00 : f32
    %251 = vector.broadcast %cst_165 : f32 to vector<18x64xf32>
    %252 = arith.maximumf %250, %251 : vector<18x64xf32>
    %c0_166 = arith.constant 0 : index
    %c0_167 = arith.constant 0 : index
    %c0_168 = arith.constant 0 : index
    %253 = vector.load %arg13[%c0_166, %c0_167, %c0_168] : memref<2x64x32xf32, #tpu.memory_space<vmem>>, vector<1x64x32xf32>
    %254 = vector.shape_cast %253 : vector<1x64x32xf32> to vector<64x32xf32>
    %cst_169 = arith.constant dense<0.000000e+00> : vector<18x32xf32>
    %255 = tpu.matmul %252, %254, %cst_169 {dimension_numbers = #tpu.dot_dimension_numbers<[1], [0], [0], [1], [0, 0, 1, 1], [], []>} : vector<18x64xf32>, vector<64x32xf32>, vector<18x32xf32> -> vector<18x32xf32>
    %256 = arith.addf %216, %255 : vector<18x32xf32>
    %c0_170 = arith.constant 0 : index
    %c0_171 = arith.constant 0 : index
    %c0_172 = arith.constant 0 : index
    %257 = vector.load %arg14[%c0_170, %c0_171, %c0_172] : memref<2x1x32xf32, #tpu.memory_space<vmem>>, vector<1x1x32xf32>
    %258 = vector.shape_cast %257 : vector<1x1x32xf32> to vector<1x32xf32>
    %259 = vector.broadcast %258 : vector<1x32xf32> to vector<18x32xf32>
    %260 = arith.addf %256, %259 : vector<18x32xf32>
    %c1_173 = arith.constant 1 : index
    %c0_174 = arith.constant 0 : index
    %c0_175 = arith.constant 0 : index
    %261 = vector.load %arg3[%c1_173, %c0_174, %c0_175] : memref<2x1x32xf32, #tpu.memory_space<vmem>>, vector<1x1x32xf32>
    %262 = vector.shape_cast %261 : vector<1x1x32xf32> to vector<1x32xf32>
    %c1_176 = arith.constant 1 : index
    %c0_177 = arith.constant 0 : index
    %c0_178 = arith.constant 0 : index
    %263 = vector.load %arg4[%c1_176, %c0_177, %c0_178] : memref<2x1x32xf32, #tpu.memory_space<vmem>>, vector<1x1x32xf32>
    %264 = vector.shape_cast %263 : vector<1x1x32xf32> to vector<1x32xf32>
    %cst_179 = arith.constant dense<0.000000e+00> : vector<18xf32>
    %265 = vector.multi_reduction <add>, %260, %cst_179 [1] : vector<18x32xf32> to vector<18xf32>
    %266 = vector.shape_cast %265 : vector<18xf32> to vector<18x1xf32>
    %cst_180 = arith.constant 3.200000e+01 : f32
    %267 = vector.broadcast %cst_180 : f32 to vector<18x1xf32>
    %268 = arith.divf %266, %267 : vector<18x1xf32>
    %269 = vector.broadcast %268 : vector<18x1xf32> to vector<18x32xf32>
    %270 = arith.subf %260, %269 : vector<18x32xf32>
    %271 = arith.mulf %270, %270 : vector<18x32xf32>
    %cst_181 = arith.constant dense<0.000000e+00> : vector<18xf32>
    %272 = vector.multi_reduction <add>, %271, %cst_181 [1] : vector<18x32xf32> to vector<18xf32>
    %273 = vector.shape_cast %272 : vector<18xf32> to vector<18x1xf32>
    %cst_182 = arith.constant 0.0322580636 : f32
    %274 = vector.broadcast %cst_182 : f32 to vector<18x1xf32>
    %275 = arith.mulf %273, %274 : vector<18x1xf32>
    %276 = math.sqrt %275 : vector<18x1xf32>
    %cst_183 = arith.constant 9.99999997E-7 : f32
    %277 = vector.broadcast %cst_183 : f32 to vector<18x1xf32>
    %278 = arith.addf %276, %277 : vector<18x1xf32>
    %279 = tpu.reciprocal %278 {approx = true} : vector<18x1xf32> -> vector<18x1xf32>
    %280 = vector.broadcast %268 : vector<18x1xf32> to vector<18x32xf32>
    %281 = arith.subf %260, %280 : vector<18x32xf32>
    %282 = vector.broadcast %262 : vector<1x32xf32> to vector<18x32xf32>
    %283 = arith.mulf %282, %281 : vector<18x32xf32>
    %284 = vector.broadcast %279 : vector<18x1xf32> to vector<18x32xf32>
    %285 = arith.mulf %283, %284 : vector<18x32xf32>
    %286 = vector.broadcast %264 : vector<1x32xf32> to vector<18x32xf32>
    %287 = arith.addf %285, %286 : vector<18x32xf32>
    %c1_184 = arith.constant 1 : index
    %c0_185 = arith.constant 0 : index
    %c0_186 = arith.constant 0 : index
    %288 = vector.load %arg5[%c1_184, %c0_185, %c0_186] : memref<2x32x96xf32, #tpu.memory_space<vmem>>, vector<1x32x96xf32>
    %289 = vector.shape_cast %288 : vector<1x32x96xf32> to vector<32x96xf32>
    %cst_187 = arith.constant dense<0.000000e+00> : vector<18x96xf32>
    %290 = tpu.matmul %287, %289, %cst_187 {dimension_numbers = #tpu.dot_dimension_numbers<[1], [0], [0], [1], [0, 0, 1, 1], [], []>} : vector<18x32xf32>, vector<32x96xf32>, vector<18x96xf32> -> vector<18x96xf32>
    %c1_188 = arith.constant 1 : index
    %c0_189 = arith.constant 0 : index
    %c0_190 = arith.constant 0 : index
    %291 = vector.load %arg6[%c1_188, %c0_189, %c0_190] : memref<2x1x96xf32, #tpu.memory_space<vmem>>, vector<1x1x96xf32>
    %292 = vector.shape_cast %291 : vector<1x1x96xf32> to vector<1x96xf32>
    %293 = vector.broadcast %292 : vector<1x96xf32> to vector<18x96xf32>
    %294 = arith.addf %290, %293 : vector<18x96xf32>
    %c0_191 = arith.constant 0 : index
    %c0_192 = arith.constant 0 : index
    %295 = vector.load %arg19[%c0_191, %c0_192] : memref<18x96xf32, #tpu.memory_space<vmem>>, vector<18x96xf32>
    tpu.vector_store %arg19[%c0_191, %c0_192], %294 {strides = array<i32>} : memref<18x96xf32, #tpu.memory_space<vmem>>, vector<18x96xf32>,
    %c0_193 = arith.constant 0 : index
    %c0_194 = arith.constant 0 : index
    %296 = vector.load %arg19[%c0_193, %c0_194] : memref<18x96xf32, #tpu.memory_space<vmem>>, vector<9x8xf32>
    %c0_195 = arith.constant 0 : index
    %c32_196 = arith.constant 32 : index
    %297 = vector.load %arg19[%c0_195, %c32_196] : memref<18x96xf32, #tpu.memory_space<vmem>>, vector<9x8xf32>
    %c0_197 = arith.constant 0 : index
    %c64_198 = arith.constant 64 : index
    %298 = vector.load %arg19[%c0_197, %c64_198] : memref<18x96xf32, #tpu.memory_space<vmem>>, vector<9x8xf32>
    %cst_199 = arith.constant dense<0.000000e+00> : vector<9x9xf32>
    %299 = tpu.matmul %296, %297, %cst_199 {dimension_numbers = #tpu.dot_dimension_numbers<[1], [1], [0], [0], [0, 0, 1, 0], [], []>} : vector<9x8xf32>, vector<9x8xf32>, vector<9x9xf32> -> vector<9x9xf32>
    %cst_200 = arith.constant 0.353553385 : f32
    %300 = vector.broadcast %cst_200 : f32 to vector<9x9xf32>
    %301 = arith.mulf %299, %300 : vector<9x9xf32>
    %cst_201 = arith.constant dense<0xFF800000> : vector<9xf32>
    %302 = vector.multi_reduction <maximumf>, %301, %cst_201 [1] : vector<9x9xf32> to vector<9xf32>
    %303 = vector.shape_cast %302 : vector<9xf32> to vector<9x1xf32>
    %304 = vector.broadcast %303 : vector<9x1xf32> to vector<9x9xf32>
    %305 = arith.subf %301, %304 : vector<9x9xf32>
    %306 = math.exp %305 : vector<9x9xf32>
    %cst_202 = arith.constant dense<0.000000e+00> : vector<9xf32>
    %307 = vector.multi_reduction <add>, %306, %cst_202 [1] : vector<9x9xf32> to vector<9xf32>
    %308 = vector.shape_cast %307 : vector<9xf32> to vector<9x1xf32>
    %309 = tpu.reciprocal %308 {approx = true} : vector<9x1xf32> -> vector<9x1xf32>
    %310 = vector.broadcast %309 : vector<9x1xf32> to vector<9x9xf32>
    %311 = arith.mulf %306, %310 : vector<9x9xf32>
    %c2 = arith.constant 2 : index
    %c0_203 = arith.constant 0 : index
    %c0_204 = arith.constant 0 : index
    %312 = vector.load %arg18[%c2, %c0_203, %c0_204] : memref<4x9x36xf32, #tpu.memory_space<vmem>>, vector<1x9x9xf32>
    %313 = vector.shape_cast %312 : vector<1x9x9xf32> to vector<9x9xf32>
    %314 = vector.shape_cast %311 : vector<9x9xf32> to vector<1x9x9xf32>
    tpu.vector_store %arg18[%c2, %c0_203, %c0_204], %314 {strides = array<i32>} : memref<4x9x36xf32, #tpu.memory_space<vmem>>, vector<1x9x9xf32>,
    %cst_205 = arith.constant dense<0.000000e+00> : vector<9x8xf32>
    %315 = tpu.matmul %311, %298, %cst_205 {dimension_numbers = #tpu.dot_dimension_numbers<[1], [0], [0], [1], [0, 0, 1, 1], [], []>} : vector<9x9xf32>, vector<9x8xf32>, vector<9x8xf32> -> vector<9x8xf32>
    %c0_206 = arith.constant 0 : index
    %c0_207 = arith.constant 0 : index
    %316 = vector.load %arg20[%c0_206, %c0_207] : memref<18x32xf32, #tpu.memory_space<vmem>>, vector<9x8xf32>
    tpu.vector_store %arg20[%c0_206, %c0_207], %315 {strides = array<i32>} : memref<18x32xf32, #tpu.memory_space<vmem>>, vector<9x8xf32>,
    %c0_208 = arith.constant 0 : index
    %c8_209 = arith.constant 8 : index
    %317 = vector.load %arg19[%c0_208, %c8_209] : memref<18x96xf32, #tpu.memory_space<vmem>>, vector<9x8xf32>
    %c0_210 = arith.constant 0 : index
    %c40_211 = arith.constant 40 : index
    %318 = vector.load %arg19[%c0_210, %c40_211] : memref<18x96xf32, #tpu.memory_space<vmem>>, vector<9x8xf32>
    %c0_212 = arith.constant 0 : index
    %c72_213 = arith.constant 72 : index
    %319 = vector.load %arg19[%c0_212, %c72_213] : memref<18x96xf32, #tpu.memory_space<vmem>>, vector<9x8xf32>
    %cst_214 = arith.constant dense<0.000000e+00> : vector<9x9xf32>
    %320 = tpu.matmul %317, %318, %cst_214 {dimension_numbers = #tpu.dot_dimension_numbers<[1], [1], [0], [0], [0, 0, 1, 0], [], []>} : vector<9x8xf32>, vector<9x8xf32>, vector<9x9xf32> -> vector<9x9xf32>
    %cst_215 = arith.constant 0.353553385 : f32
    %321 = vector.broadcast %cst_215 : f32 to vector<9x9xf32>
    %322 = arith.mulf %320, %321 : vector<9x9xf32>
    %cst_216 = arith.constant dense<0xFF800000> : vector<9xf32>
    %323 = vector.multi_reduction <maximumf>, %322, %cst_216 [1] : vector<9x9xf32> to vector<9xf32>
    %324 = vector.shape_cast %323 : vector<9xf32> to vector<9x1xf32>
    %325 = vector.broadcast %324 : vector<9x1xf32> to vector<9x9xf32>
    %326 = arith.subf %322, %325 : vector<9x9xf32>
    %327 = math.exp %326 : vector<9x9xf32>
    %cst_217 = arith.constant dense<0.000000e+00> : vector<9xf32>
    %328 = vector.multi_reduction <add>, %327, %cst_217 [1] : vector<9x9xf32> to vector<9xf32>
    %329 = vector.shape_cast %328 : vector<9xf32> to vector<9x1xf32>
    %330 = tpu.reciprocal %329 {approx = true} : vector<9x1xf32> -> vector<9x1xf32>
    %331 = vector.broadcast %330 : vector<9x1xf32> to vector<9x9xf32>
    %332 = arith.mulf %327, %331 : vector<9x9xf32>
    %c2_218 = arith.constant 2 : index
    %c0_219 = arith.constant 0 : index
    %c9_220 = arith.constant 9 : index
    %333 = vector.load %arg18[%c2_218, %c0_219, %c9_220] : memref<4x9x36xf32, #tpu.memory_space<vmem>>, vector<1x9x9xf32>
    %334 = vector.shape_cast %333 : vector<1x9x9xf32> to vector<9x9xf32>
    %335 = vector.shape_cast %332 : vector<9x9xf32> to vector<1x9x9xf32>
    tpu.vector_store %arg18[%c2_218, %c0_219, %c9_220], %335 {strides = array<i32>} : memref<4x9x36xf32, #tpu.memory_space<vmem>>, vector<1x9x9xf32>,
    %cst_221 = arith.constant dense<0.000000e+00> : vector<9x8xf32>
    %336 = tpu.matmul %332, %319, %cst_221 {dimension_numbers = #tpu.dot_dimension_numbers<[1], [0], [0], [1], [0, 0, 1, 1], [], []>} : vector<9x9xf32>, vector<9x8xf32>, vector<9x8xf32> -> vector<9x8xf32>
    %c0_222 = arith.constant 0 : index
    %c8_223 = arith.constant 8 : index
    %337 = vector.load %arg20[%c0_222, %c8_223] : memref<18x32xf32, #tpu.memory_space<vmem>>, vector<9x8xf32>
    tpu.vector_store %arg20[%c0_222, %c8_223], %336 {strides = array<i32>} : memref<18x32xf32, #tpu.memory_space<vmem>>, vector<9x8xf32>,
    %c0_224 = arith.constant 0 : index
    %c16_225 = arith.constant 16 : index
    %338 = vector.load %arg19[%c0_224, %c16_225] : memref<18x96xf32, #tpu.memory_space<vmem>>, vector<9x8xf32>
    %c0_226 = arith.constant 0 : index
    %c48_227 = arith.constant 48 : index
    %339 = vector.load %arg19[%c0_226, %c48_227] : memref<18x96xf32, #tpu.memory_space<vmem>>, vector<9x8xf32>
    %c0_228 = arith.constant 0 : index
    %c80_229 = arith.constant 80 : index
    %340 = vector.load %arg19[%c0_228, %c80_229] : memref<18x96xf32, #tpu.memory_space<vmem>>, vector<9x8xf32>
    %cst_230 = arith.constant dense<0.000000e+00> : vector<9x9xf32>
    %341 = tpu.matmul %338, %339, %cst_230 {dimension_numbers = #tpu.dot_dimension_numbers<[1], [1], [0], [0], [0, 0, 1, 0], [], []>} : vector<9x8xf32>, vector<9x8xf32>, vector<9x9xf32> -> vector<9x9xf32>
    %cst_231 = arith.constant 0.353553385 : f32
    %342 = vector.broadcast %cst_231 : f32 to vector<9x9xf32>
    %343 = arith.mulf %341, %342 : vector<9x9xf32>
    %cst_232 = arith.constant dense<0xFF800000> : vector<9xf32>
    %344 = vector.multi_reduction <maximumf>, %343, %cst_232 [1] : vector<9x9xf32> to vector<9xf32>
    %345 = vector.shape_cast %344 : vector<9xf32> to vector<9x1xf32>
    %346 = vector.broadcast %345 : vector<9x1xf32> to vector<9x9xf32>
    %347 = arith.subf %343, %346 : vector<9x9xf32>
    %348 = math.exp %347 : vector<9x9xf32>
    %cst_233 = arith.constant dense<0.000000e+00> : vector<9xf32>
    %349 = vector.multi_reduction <add>, %348, %cst_233 [1] : vector<9x9xf32> to vector<9xf32>
    %350 = vector.shape_cast %349 : vector<9xf32> to vector<9x1xf32>
    %351 = tpu.reciprocal %350 {approx = true} : vector<9x1xf32> -> vector<9x1xf32>
    %352 = vector.broadcast %351 : vector<9x1xf32> to vector<9x9xf32>
    %353 = arith.mulf %348, %352 : vector<9x9xf32>
    %c2_234 = arith.constant 2 : index
    %c0_235 = arith.constant 0 : index
    %c18_236 = arith.constant 18 : index
    %354 = vector.load %arg18[%c2_234, %c0_235, %c18_236] : memref<4x9x36xf32, #tpu.memory_space<vmem>>, vector<1x9x9xf32>
    %355 = vector.shape_cast %354 : vector<1x9x9xf32> to vector<9x9xf32>
    %356 = vector.shape_cast %353 : vector<9x9xf32> to vector<1x9x9xf32>
    tpu.vector_store %arg18[%c2_234, %c0_235, %c18_236], %356 {strides = array<i32>} : memref<4x9x36xf32, #tpu.memory_space<vmem>>, vector<1x9x9xf32>,
    %cst_237 = arith.constant dense<0.000000e+00> : vector<9x8xf32>
    %357 = tpu.matmul %353, %340, %cst_237 {dimension_numbers = #tpu.dot_dimension_numbers<[1], [0], [0], [1], [0, 0, 1, 1], [], []>} : vector<9x9xf32>, vector<9x8xf32>, vector<9x8xf32> -> vector<9x8xf32>
    %c0_238 = arith.constant 0 : index
    %c16_239 = arith.constant 16 : index
    %358 = vector.load %arg20[%c0_238, %c16_239] : memref<18x32xf32, #tpu.memory_space<vmem>>, vector<9x8xf32>
    tpu.vector_store %arg20[%c0_238, %c16_239], %357 {strides = array<i32>} : memref<18x32xf32, #tpu.memory_space<vmem>>, vector<9x8xf32>,
    %c0_240 = arith.constant 0 : index
    %c24_241 = arith.constant 24 : index
    %359 = vector.load %arg19[%c0_240, %c24_241] : memref<18x96xf32, #tpu.memory_space<vmem>>, vector<9x8xf32>
    %c0_242 = arith.constant 0 : index
    %c56_243 = arith.constant 56 : index
    %360 = vector.load %arg19[%c0_242, %c56_243] : memref<18x96xf32, #tpu.memory_space<vmem>>, vector<9x8xf32>
    %c0_244 = arith.constant 0 : index
    %c88_245 = arith.constant 88 : index
    %361 = vector.load %arg19[%c0_244, %c88_245] : memref<18x96xf32, #tpu.memory_space<vmem>>, vector<9x8xf32>
    %cst_246 = arith.constant dense<0.000000e+00> : vector<9x9xf32>
    %362 = tpu.matmul %359, %360, %cst_246 {dimension_numbers = #tpu.dot_dimension_numbers<[1], [1], [0], [0], [0, 0, 1, 0], [], []>} : vector<9x8xf32>, vector<9x8xf32>, vector<9x9xf32> -> vector<9x9xf32>
    %cst_247 = arith.constant 0.353553385 : f32
    %363 = vector.broadcast %cst_247 : f32 to vector<9x9xf32>
    %364 = arith.mulf %362, %363 : vector<9x9xf32>
    %cst_248 = arith.constant dense<0xFF800000> : vector<9xf32>
    %365 = vector.multi_reduction <maximumf>, %364, %cst_248 [1] : vector<9x9xf32> to vector<9xf32>
    %366 = vector.shape_cast %365 : vector<9xf32> to vector<9x1xf32>
    %367 = vector.broadcast %366 : vector<9x1xf32> to vector<9x9xf32>
    %368 = arith.subf %364, %367 : vector<9x9xf32>
    %369 = math.exp %368 : vector<9x9xf32>
    %cst_249 = arith.constant dense<0.000000e+00> : vector<9xf32>
    %370 = vector.multi_reduction <add>, %369, %cst_249 [1] : vector<9x9xf32> to vector<9xf32>
    %371 = vector.shape_cast %370 : vector<9xf32> to vector<9x1xf32>
    %372 = tpu.reciprocal %371 {approx = true} : vector<9x1xf32> -> vector<9x1xf32>
    %373 = vector.broadcast %372 : vector<9x1xf32> to vector<9x9xf32>
    %374 = arith.mulf %369, %373 : vector<9x9xf32>
    %c2_250 = arith.constant 2 : index
    %c0_251 = arith.constant 0 : index
    %c27_252 = arith.constant 27 : index
    %375 = vector.load %arg18[%c2_250, %c0_251, %c27_252] : memref<4x9x36xf32, #tpu.memory_space<vmem>>, vector<1x9x9xf32>
    %376 = vector.shape_cast %375 : vector<1x9x9xf32> to vector<9x9xf32>
    %377 = vector.shape_cast %374 : vector<9x9xf32> to vector<1x9x9xf32>
    tpu.vector_store %arg18[%c2_250, %c0_251, %c27_252], %377 {strides = array<i32>} : memref<4x9x36xf32, #tpu.memory_space<vmem>>, vector<1x9x9xf32>,
    %cst_253 = arith.constant dense<0.000000e+00> : vector<9x8xf32>
    %378 = tpu.matmul %374, %361, %cst_253 {dimension_numbers = #tpu.dot_dimension_numbers<[1], [0], [0], [1], [0, 0, 1, 1], [], []>} : vector<9x9xf32>, vector<9x8xf32>, vector<9x8xf32> -> vector<9x8xf32>
    %c0_254 = arith.constant 0 : index
    %c24_255 = arith.constant 24 : index
    %379 = vector.load %arg20[%c0_254, %c24_255] : memref<18x32xf32, #tpu.memory_space<vmem>>, vector<9x8xf32>
    tpu.vector_store %arg20[%c0_254, %c24_255], %378 {strides = array<i32>} : memref<18x32xf32, #tpu.memory_space<vmem>>, vector<9x8xf32>,
    %c9_256 = arith.constant 9 : index
    %c0_257 = arith.constant 0 : index
    %380 = vector.load %arg19[%c9_256, %c0_257] : memref<18x96xf32, #tpu.memory_space<vmem>>, vector<9x8xf32>
    %c9_258 = arith.constant 9 : index
    %c32_259 = arith.constant 32 : index
    %381 = vector.load %arg19[%c9_258, %c32_259] : memref<18x96xf32, #tpu.memory_space<vmem>>, vector<9x8xf32>
    %c9_260 = arith.constant 9 : index
    %c64_261 = arith.constant 64 : index
    %382 = vector.load %arg19[%c9_260, %c64_261] : memref<18x96xf32, #tpu.memory_space<vmem>>, vector<9x8xf32>
    %cst_262 = arith.constant dense<0.000000e+00> : vector<9x9xf32>
    %383 = tpu.matmul %380, %381, %cst_262 {dimension_numbers = #tpu.dot_dimension_numbers<[1], [1], [0], [0], [0, 0, 1, 0], [], []>} : vector<9x8xf32>, vector<9x8xf32>, vector<9x9xf32> -> vector<9x9xf32>
    %cst_263 = arith.constant 0.353553385 : f32
    %384 = vector.broadcast %cst_263 : f32 to vector<9x9xf32>
    %385 = arith.mulf %383, %384 : vector<9x9xf32>
    %cst_264 = arith.constant dense<0xFF800000> : vector<9xf32>
    %386 = vector.multi_reduction <maximumf>, %385, %cst_264 [1] : vector<9x9xf32> to vector<9xf32>
    %387 = vector.shape_cast %386 : vector<9xf32> to vector<9x1xf32>
    %388 = vector.broadcast %387 : vector<9x1xf32> to vector<9x9xf32>
    %389 = arith.subf %385, %388 : vector<9x9xf32>
    %390 = math.exp %389 : vector<9x9xf32>
    %cst_265 = arith.constant dense<0.000000e+00> : vector<9xf32>
    %391 = vector.multi_reduction <add>, %390, %cst_265 [1] : vector<9x9xf32> to vector<9xf32>
    %392 = vector.shape_cast %391 : vector<9xf32> to vector<9x1xf32>
    %393 = tpu.reciprocal %392 {approx = true} : vector<9x1xf32> -> vector<9x1xf32>
    %394 = vector.broadcast %393 : vector<9x1xf32> to vector<9x9xf32>
    %395 = arith.mulf %390, %394 : vector<9x9xf32>
    %c3 = arith.constant 3 : index
    %c0_266 = arith.constant 0 : index
    %c0_267 = arith.constant 0 : index
    %396 = vector.load %arg18[%c3, %c0_266, %c0_267] : memref<4x9x36xf32, #tpu.memory_space<vmem>>, vector<1x9x9xf32>
    %397 = vector.shape_cast %396 : vector<1x9x9xf32> to vector<9x9xf32>
    %398 = vector.shape_cast %395 : vector<9x9xf32> to vector<1x9x9xf32>
    tpu.vector_store %arg18[%c3, %c0_266, %c0_267], %398 {strides = array<i32>} : memref<4x9x36xf32, #tpu.memory_space<vmem>>, vector<1x9x9xf32>,
    %cst_268 = arith.constant dense<0.000000e+00> : vector<9x8xf32>
    %399 = tpu.matmul %395, %382, %cst_268 {dimension_numbers = #tpu.dot_dimension_numbers<[1], [0], [0], [1], [0, 0, 1, 1], [], []>} : vector<9x9xf32>, vector<9x8xf32>, vector<9x8xf32> -> vector<9x8xf32>
    %c9_269 = arith.constant 9 : index
    %c0_270 = arith.constant 0 : index
    %400 = vector.load %arg20[%c9_269, %c0_270] : memref<18x32xf32, #tpu.memory_space<vmem>>, vector<9x8xf32>
    tpu.vector_store %arg20[%c9_269, %c0_270], %399 {strides = array<i32>} : memref<18x32xf32, #tpu.memory_space<vmem>>, vector<9x8xf32>,
    %c9_271 = arith.constant 9 : index
    %c8_272 = arith.constant 8 : index
    %401 = vector.load %arg19[%c9_271, %c8_272] : memref<18x96xf32, #tpu.memory_space<vmem>>, vector<9x8xf32>
    %c9_273 = arith.constant 9 : index
    %c40_274 = arith.constant 40 : index
    %402 = vector.load %arg19[%c9_273, %c40_274] : memref<18x96xf32, #tpu.memory_space<vmem>>, vector<9x8xf32>
    %c9_275 = arith.constant 9 : index
    %c72_276 = arith.constant 72 : index
    %403 = vector.load %arg19[%c9_275, %c72_276] : memref<18x96xf32, #tpu.memory_space<vmem>>, vector<9x8xf32>
    %cst_277 = arith.constant dense<0.000000e+00> : vector<9x9xf32>
    %404 = tpu.matmul %401, %402, %cst_277 {dimension_numbers = #tpu.dot_dimension_numbers<[1], [1], [0], [0], [0, 0, 1, 0], [], []>} : vector<9x8xf32>, vector<9x8xf32>, vector<9x9xf32> -> vector<9x9xf32>
    %cst_278 = arith.constant 0.353553385 : f32
    %405 = vector.broadcast %cst_278 : f32 to vector<9x9xf32>
    %406 = arith.mulf %404, %405 : vector<9x9xf32>
    %cst_279 = arith.constant dense<0xFF800000> : vector<9xf32>
    %407 = vector.multi_reduction <maximumf>, %406, %cst_279 [1] : vector<9x9xf32> to vector<9xf32>
    %408 = vector.shape_cast %407 : vector<9xf32> to vector<9x1xf32>
    %409 = vector.broadcast %408 : vector<9x1xf32> to vector<9x9xf32>
    %410 = arith.subf %406, %409 : vector<9x9xf32>
    %411 = math.exp %410 : vector<9x9xf32>
    %cst_280 = arith.constant dense<0.000000e+00> : vector<9xf32>
    %412 = vector.multi_reduction <add>, %411, %cst_280 [1] : vector<9x9xf32> to vector<9xf32>
    %413 = vector.shape_cast %412 : vector<9xf32> to vector<9x1xf32>
    %414 = tpu.reciprocal %413 {approx = true} : vector<9x1xf32> -> vector<9x1xf32>
    %415 = vector.broadcast %414 : vector<9x1xf32> to vector<9x9xf32>
    %416 = arith.mulf %411, %415 : vector<9x9xf32>
    %c3_281 = arith.constant 3 : index
    %c0_282 = arith.constant 0 : index
    %c9_283 = arith.constant 9 : index
    %417 = vector.load %arg18[%c3_281, %c0_282, %c9_283] : memref<4x9x36xf32, #tpu.memory_space<vmem>>, vector<1x9x9xf32>
    %418 = vector.shape_cast %417 : vector<1x9x9xf32> to vector<9x9xf32>
    %419 = vector.shape_cast %416 : vector<9x9xf32> to vector<1x9x9xf32>
    tpu.vector_store %arg18[%c3_281, %c0_282, %c9_283], %419 {strides = array<i32>} : memref<4x9x36xf32, #tpu.memory_space<vmem>>, vector<1x9x9xf32>,
    %cst_284 = arith.constant dense<0.000000e+00> : vector<9x8xf32>
    %420 = tpu.matmul %416, %403, %cst_284 {dimension_numbers = #tpu.dot_dimension_numbers<[1], [0], [0], [1], [0, 0, 1, 1], [], []>} : vector<9x9xf32>, vector<9x8xf32>, vector<9x8xf32> -> vector<9x8xf32>
    %c9_285 = arith.constant 9 : index
    %c8_286 = arith.constant 8 : index
    %421 = vector.load %arg20[%c9_285, %c8_286] : memref<18x32xf32, #tpu.memory_space<vmem>>, vector<9x8xf32>
    tpu.vector_store %arg20[%c9_285, %c8_286], %420 {strides = array<i32>} : memref<18x32xf32, #tpu.memory_space<vmem>>, vector<9x8xf32>,
    %c9_287 = arith.constant 9 : index
    %c16_288 = arith.constant 16 : index
    %422 = vector.load %arg19[%c9_287, %c16_288] : memref<18x96xf32, #tpu.memory_space<vmem>>, vector<9x8xf32>
    %c9_289 = arith.constant 9 : index
    %c48_290 = arith.constant 48 : index
    %423 = vector.load %arg19[%c9_289, %c48_290] : memref<18x96xf32, #tpu.memory_space<vmem>>, vector<9x8xf32>
    %c9_291 = arith.constant 9 : index
    %c80_292 = arith.constant 80 : index
    %424 = vector.load %arg19[%c9_291, %c80_292] : memref<18x96xf32, #tpu.memory_space<vmem>>, vector<9x8xf32>
    %cst_293 = arith.constant dense<0.000000e+00> : vector<9x9xf32>
    %425 = tpu.matmul %422, %423, %cst_293 {dimension_numbers = #tpu.dot_dimension_numbers<[1], [1], [0], [0], [0, 0, 1, 0], [], []>} : vector<9x8xf32>, vector<9x8xf32>, vector<9x9xf32> -> vector<9x9xf32>
    %cst_294 = arith.constant 0.353553385 : f32
    %426 = vector.broadcast %cst_294 : f32 to vector<9x9xf32>
    %427 = arith.mulf %425, %426 : vector<9x9xf32>
    %cst_295 = arith.constant dense<0xFF800000> : vector<9xf32>
    %428 = vector.multi_reduction <maximumf>, %427, %cst_295 [1] : vector<9x9xf32> to vector<9xf32>
    %429 = vector.shape_cast %428 : vector<9xf32> to vector<9x1xf32>
    %430 = vector.broadcast %429 : vector<9x1xf32> to vector<9x9xf32>
    %431 = arith.subf %427, %430 : vector<9x9xf32>
    %432 = math.exp %431 : vector<9x9xf32>
    %cst_296 = arith.constant dense<0.000000e+00> : vector<9xf32>
    %433 = vector.multi_reduction <add>, %432, %cst_296 [1] : vector<9x9xf32> to vector<9xf32>
    %434 = vector.shape_cast %433 : vector<9xf32> to vector<9x1xf32>
    %435 = tpu.reciprocal %434 {approx = true} : vector<9x1xf32> -> vector<9x1xf32>
    %436 = vector.broadcast %435 : vector<9x1xf32> to vector<9x9xf32>
    %437 = arith.mulf %432, %436 : vector<9x9xf32>
    %c3_297 = arith.constant 3 : index
    %c0_298 = arith.constant 0 : index
    %c18_299 = arith.constant 18 : index
    %438 = vector.load %arg18[%c3_297, %c0_298, %c18_299] : memref<4x9x36xf32, #tpu.memory_space<vmem>>, vector<1x9x9xf32>
    %439 = vector.shape_cast %438 : vector<1x9x9xf32> to vector<9x9xf32>
    %440 = vector.shape_cast %437 : vector<9x9xf32> to vector<1x9x9xf32>
    tpu.vector_store %arg18[%c3_297, %c0_298, %c18_299], %440 {strides = array<i32>} : memref<4x9x36xf32, #tpu.memory_space<vmem>>, vector<1x9x9xf32>,
    %cst_300 = arith.constant dense<0.000000e+00> : vector<9x8xf32>
    %441 = tpu.matmul %437, %424, %cst_300 {dimension_numbers = #tpu.dot_dimension_numbers<[1], [0], [0], [1], [0, 0, 1, 1], [], []>} : vector<9x9xf32>, vector<9x8xf32>, vector<9x8xf32> -> vector<9x8xf32>
    %c9_301 = arith.constant 9 : index
    %c16_302 = arith.constant 16 : index
    %442 = vector.load %arg20[%c9_301, %c16_302] : memref<18x32xf32, #tpu.memory_space<vmem>>, vector<9x8xf32>
    tpu.vector_store %arg20[%c9_301, %c16_302], %441 {strides = array<i32>} : memref<18x32xf32, #tpu.memory_space<vmem>>, vector<9x8xf32>,
    %c9_303 = arith.constant 9 : index
    %c24_304 = arith.constant 24 : index
    %443 = vector.load %arg19[%c9_303, %c24_304] : memref<18x96xf32, #tpu.memory_space<vmem>>, vector<9x8xf32>
    %c9_305 = arith.constant 9 : index
    %c56_306 = arith.constant 56 : index
    %444 = vector.load %arg19[%c9_305, %c56_306] : memref<18x96xf32, #tpu.memory_space<vmem>>, vector<9x8xf32>
    %c9_307 = arith.constant 9 : index
    %c88_308 = arith.constant 88 : index
    %445 = vector.load %arg19[%c9_307, %c88_308] : memref<18x96xf32, #tpu.memory_space<vmem>>, vector<9x8xf32>
    %cst_309 = arith.constant dense<0.000000e+00> : vector<9x9xf32>
    %446 = tpu.matmul %443, %444, %cst_309 {dimension_numbers = #tpu.dot_dimension_numbers<[1], [1], [0], [0], [0, 0, 1, 0], [], []>} : vector<9x8xf32>, vector<9x8xf32>, vector<9x9xf32> -> vector<9x9xf32>
    %cst_310 = arith.constant 0.353553385 : f32
    %447 = vector.broadcast %cst_310 : f32 to vector<9x9xf32>
    %448 = arith.mulf %446, %447 : vector<9x9xf32>
    %cst_311 = arith.constant dense<0xFF800000> : vector<9xf32>
    %449 = vector.multi_reduction <maximumf>, %448, %cst_311 [1] : vector<9x9xf32> to vector<9xf32>
    %450 = vector.shape_cast %449 : vector<9xf32> to vector<9x1xf32>
    %451 = vector.broadcast %450 : vector<9x1xf32> to vector<9x9xf32>
    %452 = arith.subf %448, %451 : vector<9x9xf32>
    %453 = math.exp %452 : vector<9x9xf32>
    %cst_312 = arith.constant dense<0.000000e+00> : vector<9xf32>
    %454 = vector.multi_reduction <add>, %453, %cst_312 [1] : vector<9x9xf32> to vector<9xf32>
    %455 = vector.shape_cast %454 : vector<9xf32> to vector<9x1xf32>
    %456 = tpu.reciprocal %455 {approx = true} : vector<9x1xf32> -> vector<9x1xf32>
    %457 = vector.broadcast %456 : vector<9x1xf32> to vector<9x9xf32>
    %458 = arith.mulf %453, %457 : vector<9x9xf32>
    %c3_313 = arith.constant 3 : index
    %c0_314 = arith.constant 0 : index
    %c27_315 = arith.constant 27 : index
    %459 = vector.load %arg18[%c3_313, %c0_314, %c27_315] : memref<4x9x36xf32, #tpu.memory_space<vmem>>, vector<1x9x9xf32>
    %460 = vector.shape_cast %459 : vector<1x9x9xf32> to vector<9x9xf32>
    %461 = vector.shape_cast %458 : vector<9x9xf32> to vector<1x9x9xf32>
    tpu.vector_store %arg18[%c3_313, %c0_314, %c27_315], %461 {strides = array<i32>} : memref<4x9x36xf32, #tpu.memory_space<vmem>>, vector<1x9x9xf32>,
    %cst_316 = arith.constant dense<0.000000e+00> : vector<9x8xf32>
    %462 = tpu.matmul %458, %445, %cst_316 {dimension_numbers = #tpu.dot_dimension_numbers<[1], [0], [0], [1], [0, 0, 1, 1], [], []>} : vector<9x9xf32>, vector<9x8xf32>, vector<9x8xf32> -> vector<9x8xf32>
    %c9_317 = arith.constant 9 : index
    %c24_318 = arith.constant 24 : index
    %463 = vector.load %arg20[%c9_317, %c24_318] : memref<18x32xf32, #tpu.memory_space<vmem>>, vector<9x8xf32>
    tpu.vector_store %arg20[%c9_317, %c24_318], %462 {strides = array<i32>} : memref<18x32xf32, #tpu.memory_space<vmem>>, vector<9x8xf32>,
    %c0_319 = arith.constant 0 : index
    %c0_320 = arith.constant 0 : index
    %464 = vector.load %arg20[%c0_319, %c0_320] : memref<18x32xf32, #tpu.memory_space<vmem>>, vector<18x32xf32>
    %c1_321 = arith.constant 1 : index
    %c0_322 = arith.constant 0 : index
    %c0_323 = arith.constant 0 : index
    %465 = vector.load %arg7[%c1_321, %c0_322, %c0_323] : memref<2x32x32xf32, #tpu.memory_space<vmem>>, vector<1x32x32xf32>
    %466 = vector.shape_cast %465 : vector<1x32x32xf32> to vector<32x32xf32>
    %cst_324 = arith.constant dense<0.000000e+00> : vector<18x32xf32>
    %467 = tpu.matmul %464, %466, %cst_324 {dimension_numbers = #tpu.dot_dimension_numbers<[1], [0], [0], [1], [0, 0, 1, 1], [], []>} : vector<18x32xf32>, vector<32x32xf32>, vector<18x32xf32> -> vector<18x32xf32>
    %468 = arith.addf %260, %467 : vector<18x32xf32>
    %c1_325 = arith.constant 1 : index
    %c0_326 = arith.constant 0 : index
    %c0_327 = arith.constant 0 : index
    %469 = vector.load %arg8[%c1_325, %c0_326, %c0_327] : memref<2x1x32xf32, #tpu.memory_space<vmem>>, vector<1x1x32xf32>
    %470 = vector.shape_cast %469 : vector<1x1x32xf32> to vector<1x32xf32>
    %471 = vector.broadcast %470 : vector<1x32xf32> to vector<18x32xf32>
    %472 = arith.addf %468, %471 : vector<18x32xf32>
    %c1_328 = arith.constant 1 : index
    %c0_329 = arith.constant 0 : index
    %c0_330 = arith.constant 0 : index
    %473 = vector.load %arg9[%c1_328, %c0_329, %c0_330] : memref<2x1x32xf32, #tpu.memory_space<vmem>>, vector<1x1x32xf32>
    %474 = vector.shape_cast %473 : vector<1x1x32xf32> to vector<1x32xf32>
    %c1_331 = arith.constant 1 : index
    %c0_332 = arith.constant 0 : index
    %c0_333 = arith.constant 0 : index
    %475 = vector.load %arg10[%c1_331, %c0_332, %c0_333] : memref<2x1x32xf32, #tpu.memory_space<vmem>>, vector<1x1x32xf32>
    %476 = vector.shape_cast %475 : vector<1x1x32xf32> to vector<1x32xf32>
    %cst_334 = arith.constant dense<0.000000e+00> : vector<18xf32>
    %477 = vector.multi_reduction <add>, %472, %cst_334 [1] : vector<18x32xf32> to vector<18xf32>
    %478 = vector.shape_cast %477 : vector<18xf32> to vector<18x1xf32>
    %cst_335 = arith.constant 3.200000e+01 : f32
    %479 = vector.broadcast %cst_335 : f32 to vector<18x1xf32>
    %480 = arith.divf %478, %479 : vector<18x1xf32>
    %481 = vector.broadcast %480 : vector<18x1xf32> to vector<18x32xf32>
    %482 = arith.subf %472, %481 : vector<18x32xf32>
    %483 = arith.mulf %482, %482 : vector<18x32xf32>
    %cst_336 = arith.constant dense<0.000000e+00> : vector<18xf32>
    %484 = vector.multi_reduction <add>, %483, %cst_336 [1] : vector<18x32xf32> to vector<18xf32>
    %485 = vector.shape_cast %484 : vector<18xf32> to vector<18x1xf32>
    %cst_337 = arith.constant 0.0322580636 : f32
    %486 = vector.broadcast %cst_337 : f32 to vector<18x1xf32>
    %487 = arith.mulf %485, %486 : vector<18x1xf32>
    %488 = math.sqrt %487 : vector<18x1xf32>
    %cst_338 = arith.constant 9.99999997E-7 : f32
    %489 = vector.broadcast %cst_338 : f32 to vector<18x1xf32>
    %490 = arith.addf %488, %489 : vector<18x1xf32>
    %491 = tpu.reciprocal %490 {approx = true} : vector<18x1xf32> -> vector<18x1xf32>
    %492 = vector.broadcast %480 : vector<18x1xf32> to vector<18x32xf32>
    %493 = arith.subf %472, %492 : vector<18x32xf32>
    %494 = vector.broadcast %474 : vector<1x32xf32> to vector<18x32xf32>
    %495 = arith.mulf %494, %493 : vector<18x32xf32>
    %496 = vector.broadcast %491 : vector<18x1xf32> to vector<18x32xf32>
    %497 = arith.mulf %495, %496 : vector<18x32xf32>
    %498 = vector.broadcast %476 : vector<1x32xf32> to vector<18x32xf32>
    %499 = arith.addf %497, %498 : vector<18x32xf32>
    %c1_339 = arith.constant 1 : index
    %c0_340 = arith.constant 0 : index
    %c0_341 = arith.constant 0 : index
    %500 = vector.load %arg11[%c1_339, %c0_340, %c0_341] : memref<2x32x64xf32, #tpu.memory_space<vmem>>, vector<1x32x64xf32>
    %501 = vector.shape_cast %500 : vector<1x32x64xf32> to vector<32x64xf32>
    %cst_342 = arith.constant dense<0.000000e+00> : vector<18x64xf32>
    %502 = tpu.matmul %499, %501, %cst_342 {dimension_numbers = #tpu.dot_dimension_numbers<[1], [0], [0], [1], [0, 0, 1, 1], [], []>} : vector<18x32xf32>, vector<32x64xf32>, vector<18x64xf32> -> vector<18x64xf32>
    %c1_343 = arith.constant 1 : index
    %c0_344 = arith.constant 0 : index
    %c0_345 = arith.constant 0 : index
    %503 = vector.load %arg12[%c1_343, %c0_344, %c0_345] : memref<2x1x64xf32, #tpu.memory_space<vmem>>, vector<1x1x64xf32>
    %504 = vector.shape_cast %503 : vector<1x1x64xf32> to vector<1x64xf32>
    %505 = vector.broadcast %504 : vector<1x64xf32> to vector<18x64xf32>
    %506 = arith.addf %502, %505 : vector<18x64xf32>
    %cst_346 = arith.constant 0.000000e+00 : f32
    %507 = vector.broadcast %cst_346 : f32 to vector<18x64xf32>
    %508 = arith.maximumf %506, %507 : vector<18x64xf32>
    %c1_347 = arith.constant 1 : index
    %c0_348 = arith.constant 0 : index
    %c0_349 = arith.constant 0 : index
    %509 = vector.load %arg13[%c1_347, %c0_348, %c0_349] : memref<2x64x32xf32, #tpu.memory_space<vmem>>, vector<1x64x32xf32>
    %510 = vector.shape_cast %509 : vector<1x64x32xf32> to vector<64x32xf32>
    %cst_350 = arith.constant dense<0.000000e+00> : vector<18x32xf32>
    %511 = tpu.matmul %508, %510, %cst_350 {dimension_numbers = #tpu.dot_dimension_numbers<[1], [0], [0], [1], [0, 0, 1, 1], [], []>} : vector<18x64xf32>, vector<64x32xf32>, vector<18x32xf32> -> vector<18x32xf32>
    %512 = arith.addf %472, %511 : vector<18x32xf32>
    %c1_351 = arith.constant 1 : index
    %c0_352 = arith.constant 0 : index
    %c0_353 = arith.constant 0 : index
    %513 = vector.load %arg14[%c1_351, %c0_352, %c0_353] : memref<2x1x32xf32, #tpu.memory_space<vmem>>, vector<1x1x32xf32>
    %514 = vector.shape_cast %513 : vector<1x1x32xf32> to vector<1x32xf32>
    %515 = vector.broadcast %514 : vector<1x32xf32> to vector<18x32xf32>
    %516 = arith.addf %512, %515 : vector<18x32xf32>
    %c0_354 = arith.constant 0 : index
    %c0_355 = arith.constant 0 : index
    %517 = vector.load %arg15[%c0_354, %c0_355] : memref<1x32xf32, #tpu.memory_space<vmem>>, vector<1x32xf32>
    %c0_356 = arith.constant 0 : index
    %c0_357 = arith.constant 0 : index
    %518 = vector.load %arg16[%c0_356, %c0_357] : memref<1x32xf32, #tpu.memory_space<vmem>>, vector<1x32xf32>
    %cst_358 = arith.constant dense<0.000000e+00> : vector<18xf32>
    %519 = vector.multi_reduction <add>, %516, %cst_358 [1] : vector<18x32xf32> to vector<18xf32>
    %520 = vector.shape_cast %519 : vector<18xf32> to vector<18x1xf32>
    %cst_359 = arith.constant 3.200000e+01 : f32
    %521 = vector.broadcast %cst_359 : f32 to vector<18x1xf32>
    %522 = arith.divf %520, %521 : vector<18x1xf32>
    %523 = vector.broadcast %522 : vector<18x1xf32> to vector<18x32xf32>
    %524 = arith.subf %516, %523 : vector<18x32xf32>
    %525 = arith.mulf %524, %524 : vector<18x32xf32>
    %cst_360 = arith.constant dense<0.000000e+00> : vector<18xf32>
    %526 = vector.multi_reduction <add>, %525, %cst_360 [1] : vector<18x32xf32> to vector<18xf32>
    %527 = vector.shape_cast %526 : vector<18xf32> to vector<18x1xf32>
    %cst_361 = arith.constant 0.0322580636 : f32
    %528 = vector.broadcast %cst_361 : f32 to vector<18x1xf32>
    %529 = arith.mulf %527, %528 : vector<18x1xf32>
    %530 = math.sqrt %529 : vector<18x1xf32>
    %cst_362 = arith.constant 9.99999997E-7 : f32
    %531 = vector.broadcast %cst_362 : f32 to vector<18x1xf32>
    %532 = arith.addf %530, %531 : vector<18x1xf32>
    %533 = tpu.reciprocal %532 {approx = true} : vector<18x1xf32> -> vector<18x1xf32>
    %534 = vector.broadcast %522 : vector<18x1xf32> to vector<18x32xf32>
    %535 = arith.subf %516, %534 : vector<18x32xf32>
    %536 = vector.broadcast %517 : vector<1x32xf32> to vector<18x32xf32>
    %537 = arith.mulf %536, %535 : vector<18x32xf32>
    %538 = vector.broadcast %533 : vector<18x1xf32> to vector<18x32xf32>
    %539 = arith.mulf %537, %538 : vector<18x32xf32>
    %540 = vector.broadcast %518 : vector<1x32xf32> to vector<18x32xf32>
    %541 = arith.addf %539, %540 : vector<18x32xf32>
    %c0_363 = arith.constant 0 : index
    %c0_364 = arith.constant 0 : index
    %542 = vector.load %arg17[%c0_363, %c0_364] : memref<18x32xf32, #tpu.memory_space<vmem>>, vector<18x32xf32>
    tpu.vector_store %arg17[%c0_363, %c0_364], %541 {strides = array<i32>} : memref<18x32xf32, #tpu.memory_space<vmem>>, vector<18x32xf32>,
    return
  }
}

</mosaic_0001>

<bundles_post_ra>
// kernel: encoder_neuron_group_forward.1
= control target key start
LH: loop header
LB: loop body
LE: loop exit
PB: predicated region body
PF: predicated region fallthrough
CT: control target
= control target key end

     0   :  { %v6415_v0 = vmov 0.0|0.0   ;;  %vm6416_vm0 = vmmov 0   ;;  %v6417_v3 = vmov 0.0   ;;  %vm77_vm1 = vcmask 1044480   ;;  %s6419_s19 = smov 96   ;;  %s6423_s23 = smov 80   ;;  %s7759_s1 = inlined_call_operand.vmem [shape: f32[21,32], index: 1, kind: input, shape index: {}]   ;;  %s7760_s0 = inlined_call_operand.vmem [shape: f32[18,21], index: 0, kind: input, shape index: {}]   ;;  %s7761_s2 = inlined_call_operand.vmem [shape: f32[18,32], index: 2, kind: input, shape index: {}]   ;;  %s7762_s5 = inlined_call_operand.vmem [shape: f32[2,32,96], index: 5, kind: input, shape index: {}]   ;;  %s7763_s3 = inlined_call_operand.vmem [shape: f32[2,1,32], index: 3, kind: input, shape index: {}]   ;;  %s7764_s4 = inlined_call_operand.vmem [shape: f32[2,1,32], index: 4, kind: input, shape index: {}]   ;;  %s7765_s6 = inlined_call_operand.vmem [shape: f32[2,1,96], index: 6, kind: input, shape index: {}]   ;;  %s7766_s18 = inlined_call_operand.vmem [shape: f32[4,9,36], index: 18, kind: output, shape index: {1}]   ;;  %s7767_s7 = inlined_call_operand.vmem [shape: f32[2,32,32], index: 7, kind: input, shape index: {}]   ;;  %s7768_s8 = inlined_call_operand.vmem [shape: f32[2,1,32], index: 8, kind: input, shape index: {}]   ;;  %s7769_s11 = inlined_call_operand.vmem [shape: f32[2,32,64], index: 11, kind: input, shape index: {}]   ;;  %s7770_s9 = inlined_call_operand.vmem [shape: f32[2,1,32], index: 9, kind: input, shape index: {}]   ;;  %s7771_s10 = inlined_call_operand.vmem [shape: f32[2,1,32], index: 10, kind: input, shape index: {}]   ;;  %s7772_s13 = inlined_call_operand.vmem [shape: f32[2,64,32], index: 13, kind: input, shape index: {}]   ;;  %s7773_s12 = inlined_call_operand.vmem [shape: f32[2,1,64], index: 12, kind: input, shape index: {}]   ;;  %s7774_s14 = inlined_call_operand.vmem [shape: f32[2,1,32], index: 14, kind: input, shape index: {}]   ;;  %s7775_s15 = inlined_call_operand.vmem [shape: f32[1,32], index: 15, kind: input, shape index: {}]   ;;  %s7776_s16 = inlined_call_operand.vmem [shape: f32[1,32], index: 16, kind: input, shape index: {}]   ;;  %s7777_s17 = inlined_call_operand.vmem [shape: f32[18,32], index: 17, kind: output, shape index: {0}]  }
   0x1   :  { %7801 = sst [smem:[#allocation4_spill]] %s7759_s1  ;;  %5787 = vmatprep.subr.bf16.mxu0 %v6415_v0  ;;  %5402 = vmatprep.mubr.msk.f32.mxu0 %vm6416_vm0, %v6417_v3  ;;  %vm67_vm2 = vcmask 171008   ;;  %vm163_vm3 = vcmask 261120   ;;  %v244_v29 = vld [vmem:[%s7762_s5] sm:$0xff]  ;;  %v245_v30 = vld [vmem:[%s7762_s5 + $0x8] sm:$0xff]  ;;  %v246_v31 = vld [vmem:[%s7762_s5 + $0x10] sm:$0xff] }
   0x2   :  { %7802 = sst [smem:[#allocation5_spill]] %s7760_s0  ;;  %s7804_s29 = sld [smem:[#allocation4_spill]]  ;;  %6042 = vmatprep.subr.bf16.mxu1 %v6415_v0  ;;  %5425 = vmatprep.mubr.msk.f32.mxu1 %vm6416_vm0, %v6417_v3  ;;  %v5791_v32 = vpack.c.bf16 %v245_v30, %v244_v29  ;;  %v247_v33 = vld [vmem:[%s7762_s5 + $0x18] sm:$0xff]  ;;  %v6601_v51 = vld [vmem:[%s7763_s3] ss:$0 sm:$0xff]  ;;  %vm344_vm8 = vcmask 785408  }
   0x3   :  { %7803 = sst [smem:[#allocation6_spill]] %s7761_s2  ;;  %s7805_s22 = sld [smem:[#allocation5_spill]]  ;;  %v5794_v34 = vpack.c.bf16 %v247_v33, %v246_v31  ;;  %v6607_v54 = vld [vmem:[%s7764_s4] ss:$0 sm:$0xff]  ;;  %vm357_vm9 = vcmask 64512   ;;  %vm170_vm10 = vcmask 254976  }
   0x4   :  { %s7806_s26 = sld [smem:[#allocation6_spill]]  ;;  %6044 = vmatpush3.bf16.msra.mxu1 %v5791_v32  ;;  %v6619_v63 = vld [vmem:[%s7765_s6] ss:$0 sm:$0xff]  ;;  %s6418_s1 = smov 88   ;;  %vm6651_vm11 = vmpackc.low %vm357_vm9, %vm357_vm9  ;;  %vm447_vm12 = vcmask 65536   ;;  %vm443_vm13 = vcmask 72704  }
   0x5   :  { %6043 = vmatprep.subr.bf16.mxu1 %v6415_v0  ;;  %s6420_s0 = smov 120   ;;  %s6422_s2 = smov 64  }
   0x6   :  { %s7790_s24 = smov 112   ;;  %s7786_s30 = smov 104  }
   0x7   :  { %s7784_s20 = smov 72   ;;  %s7782_s21 = smov 40  }
   0x8   :  { %v61_v1 = vld [vmem:[%s7804_s29] sm:$0xff]  ;;  %v62_v2 = vld [vmem:[%s7804_s29 + $0x8] sm:$0xff]  ;;  %v63_v5 = vld [vmem:[%s7804_s29 + $0x10] sm:$0x1f]  ;;  %6045 = vmatpush3.bf16.msra.mxu1 %v5794_v34  ;;  %s7788_s29 = smov 48   ;;  %s7794_s25 = smov 24  }
   0x9   :  { %v5788_v4 = vpack.c.bf16 %v62_v2, %v61_v1  ;;  %v58_v6 = vld [vmem:[%s7805_s22] sm:$0xff]  ;;  %v59_v7 = vld [vmem:[%s7805_s22 + $0x8] sm:$0xff]  ;;  %v60_v28 = vld [vmem:[%s7805_s22 + $0x10] sm:$0x3]  ;;  %s7798_s22 = smov 16   ;;  %s7792_s27 = smov 8  }
   0xa   :  { %v64_v8 = vld [vmem:[%s7806_s26] sm:$0xff]  ;;  %v65_v12 = vld [vmem:[%s7806_s26 + $0x8] sm:$0xff]  ;;  %s7816_s28 = smov 40  }
   0xb   :  { %5789 = vmatpush3.bf16.msra.mxu0 %v5788_v4 }
   0xc   :  { %5400 = vmatprep.subr.mxu0 %v6417_v3 }
   0xf   :  { %5401 = vmatpush3.msk.msra.mxu0 %vm77_vm1, %v63_v5  ;;  %vm480_vm1 = vcmask 1040384  }
  0x10   :  { %5403 = vmatmul.mubr.msk.f32.vlgmr.msra.gmra.mrb[0].mxu0 %vm67_vm2, %v58_v6  ;;  %5790 = vmatprep.subr.bf16.mxu0 %v6415_v0 }
  0x11   :  { %5405 = vmatprep.mubr.msk.f32.mxu0 %vm6416_vm0, %v6417_v3  ;;  %5792 = vmatpush3.bf16.msra.mxu0 %v5791_v32 }
  0x12   :  { %5793 = vmatprep.subr.bf16.mxu0 %v6415_v0 }
  0x14   :  { %5406 = vmatmul.mubr.msk.f32.gmra.mrb[2].mxu0 %vm67_vm2, %v59_v7 }
  0x15   :  { %5408 = vmatprep.mubr.msk.f32.mxu0 %vm6416_vm0, %v6417_v3  ;;  %5795 = vmatpush3.bf16.msra.mxu0 %v5794_v34 }
  0x18   :  { %5409 = vmatmul.mubr.msk.f32.gmra.mrb[4].mxu0 %vm67_vm2, %v60_v28  ;;  %vm6425_vm2 = vmmov 1  }
  0x19   :  { %5419 = vmatprep.mubr.msk.f32.mxu0 %vm6416_vm0, %v6417_v3 }
  0xe3   :  { %v147_v9 = vpop.f32.mrb[0].mxu0 }
  0xe4   :  { %v6563_v10 = vadd.f32 %v147_v9, %v64_v8  ;;  %v5404_v11 = vpop.f32.mrb[1].mxu0 }
  0xe6   :  { %v164_v13 = vsel %vm163_vm3, %v6563_v10, 0.0 }
  0xe7   :  { %165 = vadd.xlane.f32.xlu0 %v164_v13  ;;  %v152_v14 = vpop.f32.mrb[2].mxu0 }
  0xe8   :  { %v6570_v15 = vadd.f32 %v152_v14, %v65_v12  ;;  %v5407_v16 = vpop.f32.mrb[3].mxu0  ;;  %v66_v14 = vld [vmem:[%s7806_s26 + $0x10] sm:$0x3]  ;;  %s6421_s26 = smov 56  }
  0xea   :  { %v167_v17 = vsel %vm163_vm3, %v6570_v15, 0.0 }
  0xeb   :  { %168 = vadd.xlane.f32.xlu0 %v167_v17  ;;  %v157_v61 = vpop.f32.mrb[4].mxu0 }
  0xec   :  { %v5410_v62 = vpop.f32.mrb[5].mxu0  ;;  %v6645_v16 = vadd.f32 %v157_v61, %v66_v14 }
  0xee   :  { %v171_v17 = vsel %vm170_vm10, %v6645_v16, 0.0 }
 0x174   :  { %v166_v18 = vpop.xlane.xlu0 %165 }
 0x175   :  { %v175_v19 = vmul.f32 0.03125, %v166_v18 }
 0x177   :  { %v178_v20 = vsub.f32 %v6563_v10, %v175_v19 }
 0x178   :  { %v169_v21 = vpop.xlane.xlu0 %168 }
 0x179   :  { %v176_v22 = vmul.f32 0.03125, %v169_v21  ;;  %v181_v23 = vmul.f32 %v178_v20, %v178_v20  ;;  %v229_v52 = vmul.f32 %v6601_v51, %v178_v20 }
 0x17b   :  { %v179_v24 = vsub.f32 %v6570_v15, %v176_v22  ;;  %v184_v25 = vsel %vm163_vm3, %v181_v23, 0.0 }
 0x17c   :  { %185 = vadd.xlane.f32.xlu1 %v184_v25 }
 0x17d   :  { %v182_v26 = vmul.f32 %v179_v24, %v179_v24  ;;  %v230_v56 = vmul.f32 %v6601_v51, %v179_v24 }
 0x17f   :  { %v187_v27 = vsel %vm163_vm3, %v182_v26, 0.0 }
 0x180   :  { %188 = vadd.xlane.f32.xlu1 %v187_v27 }
 0x209   :  { %v186_v35 = vpop.xlane.xlu1 %185 }
 0x20a   :  { %v193_v36 = vmul.f32 0.032258064, %v186_v35 }
 0x20c   :  { %6227 = vrsqrt.f32 %v193_v36  ;;  %vm198_vm4 = vcmp.eq.f32.partialorder %v193_v36, inf  ;;  %v201_v41 = vand.u32 2147483648, %v193_v36  ;;  %vm200_vm5 = vcmp.eq.f32.partialorder %v193_v36, 0.0 }
 0x20d   :  { %v189_v37 = vpop.xlane.xlu1 %188 }
 0x20e   :  { %v194_v38 = vmul.f32 0.032258064, %v189_v37 }
 0x210   :  { %6229 = vrsqrt.f32 %v194_v38  ;;  %vm205_vm6 = vcmp.eq.f32.partialorder %v194_v38, inf  ;;  %v208_v47 = vand.u32 2147483648, %v194_v38  ;;  %vm207_vm7 = vcmp.eq.f32.partialorder %v194_v38, 0.0 }
 0x216   :  { %v6228_v39 = vpop.eup %6227 }
 0x217   :  { %v197_v40 = vmul.f32 %v6228_v39, %v193_v36 }
 0x219   :  { %v199_v42 = vsel %vm198_vm4, %v193_v36, %v197_v40  ;;  %vm6696_vm4 = vmpackc.low %vm480_vm1, %vm6425_vm2  ;;  %vm7800_vm1 = vcmask 130112   ;;  %vm7797_vm2 = vcmask 195712  }
 0x21a   :  { %v6230_v43 = vpop.eup %6229  ;;  %v202_v44 = vsel %vm200_vm5, %v201_v41, %v199_v42  ;;  %vm347_vm5 = vcmask 779264  }
 0x21b   :  { %v217_v45 = vadd.f32 1e-06, %v202_v44  ;;  %v204_v46 = vmul.f32 %v6230_v43, %v194_v38 }
 0x21d   :  { %6231 = vrcp.f32 %v217_v45  ;;  %v206_v48 = vsel %vm205_vm6, %v194_v38, %v204_v46  ;;  %vm7781_vm6 = vcmask 57344  }
 0x21e   :  { %v209_v49 = vsel %vm207_vm7, %v208_v47, %v206_v48  ;;  %vm788_vm7 = vcmask 122944  }
 0x21f   :  { %v218_v50 = vadd.f32 1e-06, %v209_v49 }
 0x221   :  { %6233 = vrcp.f32 %v218_v50 }
 0x227   :  { %v6232_v53 = vpop.eup %6231 }
 0x228   :  { %v232_v55 = vmul.f32 %v6232_v53, %v229_v52 }
 0x22a   :  { %v241_v57 = vadd.f32 %v6607_v54, %v232_v55 }
 0x22b   :  { %v6234_v58 = vpop.eup %6233 }
 0x22c   :  { %5420 = vmatmul.mubr.msk.f32.vlgmr.msra.gmra.mrb[6].mxu0 %vm163_vm3, %v241_v57  ;;  %v233_v59 = vmul.f32 %v6234_v58, %v230_v56 }
 0x22d   :  { %5422 = vmatprep.mubr.msk.f32.mxu0 %vm6416_vm0, %v6417_v3 }
 0x22e   :  { %v242_v60 = vadd.f32 %v6607_v54, %v233_v59 }
 0x230   :  { %5423 = vmatmul.mubr.msk.f32.gmra.mrb[8].mxu0 %vm163_vm3, %v242_v60 }
 0x2ff   :  { %v330_v1 = vpop.f32.mrb[6].mxu0 }
 0x300   :  { %v331_v2 = vadd.f32 %v6619_v63, %v330_v1  ;;  %v5421_v4 = vpop.f32.mrb[7].mxu0 }
 0x302   :  { %345 = vst.msk [vmem:[#allocation2] sm:$0xff] %vm344_vm8, %v331_v2 }
 0x303   :  { %v335_v5 = vpop.f32.mrb[8].mxu0 }
 0x304   :  { %v336_v6 = vadd.f32 %v6619_v63, %v335_v5  ;;  %v5424_v7 = vpop.f32.mrb[9].mxu0 }
 0x306   :  { %346 = vst.msk [vmem:[#allocation2 + $0x8] sm:$0xff] %vm344_vm8, %v336_v6 }
 0x309   :  { %v6625_v8 = vld [vmem:[#allocation2] sm:$0xff] }
 0x30a   :  { %5432 = vmatprep.mubr.msk.f32.mxu0 %vm357_vm9, %v6625_v8 }
 0x30d   :  { %v562_v9 = vld [vmem:[#allocation2 + $0x8] sm:$0x1] }
 0x30e   :  { %v350_v11 = vld [vmem:[#allocation2 + $0x8] sm:$0x1]  ;;  %v6630_v12 = vpack.i.bf16 %v562_v9, %v6625_v8 }
 0x30f   :  { %v6633_v13 = vpack.i.bf16 %v350_v11, %v6625_v8 }
 0x310   :  { %6073 = vrot.lane.b32.xlu1 %v6630_v12, %s6418_s1 }
 0x311   :  { %6068 = vrot.lane.b32.xlu0 %v6633_v13, %s6419_s19 }
 0x314   :  { %565 = vrot.lane.b32.xlu1 %v6625_v8, %s6420_s0 }
 0x318   :  { %567 = vrot.lane.b32.xlu1 %v562_v9, %s6420_s0 }
 0x330   :  { %172 = vadd.xlane.f32.xlu0 %v171_v17 }
 0x382   :  { %v6074_v18 = vpop.permute.xlu1 %6073 }
 0x383   :  { %v6069_v19 = vpop.permute.xlu0 %6068  ;;  %v6076_v20 = vunpack.i.h.bf16 %v6074_v18  ;;  %v6075_v21 = vunpack.i.l.bf16 %v6074_v18 }
 0x384   :  { %v6071_v22 = vunpack.i.h.bf16 %v6069_v19  ;;  %v6070_v23 = vunpack.i.l.bf16 %v6069_v19 }
 0x385   :  { %v5808_v26 = vpack.c.bf16 %v6076_v20, %v6075_v21 }
 0x386   :  { %v5796_v25 = vpack.c.bf16 %v6071_v22, %v6070_v23  ;;  %v566_v27 = vpop.permute.xlu1 %565 }
 0x388   :  { %5798 = vmatprep.subr.msk.bf16.mxu0 %vm6651_vm11, %v5796_v25 }
 0x389   :  { %5801 = vmatpush3.bf16.xpose.msk.msra.mxu0 %vm6651_vm11, %v5796_v25 }
 0x38a   :  { %5810 = vmatprep.subr.msk.bf16.mxu0 %vm6651_vm11, %v5808_v26  ;;  %v568_v28 = vpop.permute.xlu1 %567 }
 0x390   :  { %5433 = vmatmul.mubr.msk.f32.vlgmr.msra.gmra.mrb[10].mxu0 %vm357_vm9, %v350_v11 }
 0x391   :  { %5813 = vmatpush3.bf16.xpose.msk.msra.mxu0 %vm6651_vm11, %v5808_v26  ;;  %5446 = vmatprep.mubr.msk.f32.mxu0 %vm357_vm9, %v566_v27  ;;  %v791_v26 = vld [vmem:[#allocation2 + $0x8] sm:$0x1] }
 0x392   :  { %v6684_v27 = vpack.i.bf16 %v791_v26, %v6625_v8 }
 0x398   :  { %5447 = vmatmul.mubr.msk.f32.vlgmr.msra.gmra.mrb[12].mxu0 %vm357_vm9, %v568_v28 }
 0x3bd   :  { %v173_v29 = vpop.xlane.xlu0 %172 }
 0x3be   :  { %v177_v30 = vmul.f32 0.03125, %v173_v29 }
 0x3c0   :  { %v180_v31 = vsub.f32 %v6645_v16, %v177_v30 }
 0x3c2   :  { %v183_v38 = vmul.f32 %v180_v31, %v180_v31  ;;  %v231_v21 = vmul.f32 %v6601_v51, %v180_v31 }
 0x3c4   :  { %v190_v40 = vsel %vm170_vm10, %v183_v38, 0.0 }
 0x463   :  { %v5434_v32 = vpop.f32.mrb[10].mxu0 }
 0x464   :  { %v442_v33 = vmul.f32 0.35355338, %v5434_v32  ;;  %v432_v34 = vpop.f32.mrb[11].mxu0 }
 0x465   :  { %v441_v35 = vmul.f32 0.35355338, %v432_v34 }
 0x466   :  { %v448_v36 = vsel %vm447_vm12, %v442_v33, -inf }
 0x467   :  { %449 = vmax.xlane.f32.xlu0 %v448_v36  ;;  %v444_v37 = vsel %vm443_vm13, %v441_v35, -inf }
 0x468   :  { %445 = vmax.xlane.f32.xlu1 %v444_v37 }
 0x46b   :  { %v5448_v39 = vpop.f32.mrb[12].mxu0 }
 0x46c   :  { %v647_v41 = vpop.f32.mrb[13].mxu0  ;;  %191 = vadd.xlane.f32.xlu1 %v190_v40  ;;  %v657_v43 = vmul.f32 0.35355338, %v5448_v39 }
 0x46d   :  { %v656_v42 = vmul.f32 0.35355338, %v647_v41 }
 0x46e   :  { %v661_v45 = vsel %vm447_vm12, %v657_v43, -inf }
 0x46f   :  { %v658_v44 = vsel %vm443_vm13, %v656_v42, -inf }
 0x470   :  { %659 = vmax.xlane.f32.xlu0 %v658_v44 }
 0x474   :  { %662 = vmax.xlane.f32.xlu0 %v661_v45 }
 0x4f4   :  { %v450_v46 = vpop.xlane.xlu0 %449 }
 0x4f5   :  { %v452_v47 = vsub.f32 %v442_v33, %v450_v46  ;;  %v446_v48 = vpop.xlane.xlu1 %445 }
 0x4f6   :  { %v451_v49 = vsub.f32 %v441_v35, %v446_v48 }
 0x4f7   :  { %v455_v50 = vmul.f32 1.442695, %v452_v47 }
 0x4f8   :  { %v453_v52 = vmul.f32 1.442695, %v451_v49 }
 0x4f9   :  { %6235 = vpow2.f32 %v455_v50  ;;  %v192_v53 = vpop.xlane.xlu1 %191 }
 0x4fa   :  { %6237 = vpow2.f32 %v453_v52  ;;  %v195_v55 = vmul.f32 0.032258064, %v192_v53 }
 0x4fc   :  { %6239 = vrsqrt.f32 %v195_v55  ;;  %vm212_vm14 = vcmp.eq.f32.partialorder %v195_v55, inf  ;;  %v215_v7 = vand.u32 2147483648, %v195_v55  ;;  %vm214_vm15 = vcmp.eq.f32.partialorder %v195_v55, 0.0 }
 0x4fd   :  { %v660_v56 = vpop.xlane.xlu0 %659 }
 0x4fe   :  { %v664_v57 = vsub.f32 %v656_v42, %v660_v56 }
 0x500   :  { %v666_v58 = vmul.f32 1.442695, %v664_v57 }
 0x501   :  { %v663_v59 = vpop.xlane.xlu0 %662 }
 0x502   :  { %6241 = vpow2.f32 %v666_v58  ;;  %v665_v60 = vsub.f32 %v657_v43, %v663_v59 }
 0x503   :  { %v6236_v61 = vpop.eup %6235 }
 0x504   :  { %v6238_v62 = vpop.eup %6237  ;;  %v668_v1 = vmul.f32 1.442695, %v665_v60  ;;  %v460_v2 = vsel %vm447_vm12, %v6236_v61, 0.0 }
 0x505   :  { %461 = vadd.xlane.f32.xlu1 %v460_v2  ;;  %v457_v4 = vsel %vm443_vm13, %v6238_v62, 0.0 }
 0x506   :  { %v6240_v5 = vpop.eup %6239  ;;  %6243 = vpow2.f32 %v668_v1  ;;  %458 = vadd.xlane.f32.xlu0 %v457_v4  ;;  %v1020_v4 = vld [vmem:[#allocation2 + $0x8] sm:$0x1] }
 0x507   :  { %v211_v6 = vmul.f32 %v6240_v5, %v195_v55 }
 0x509   :  { %v213_v9 = vsel %vm212_vm14, %v195_v55, %v211_v6  ;;  %vm1017_vm14 = vcmask 188544  }
 0x50a   :  { %v216_v11 = vsel %vm214_vm15, %v215_v7, %v213_v9  ;;  %vm1246_vm15 = vcmask 254144  }
 0x50b   :  { %v219_v14 = vadd.f32 1e-06, %v216_v11 }
 0x50c   :  { %v6242_v17 = vpop.eup %6241 }
 0x50d   :  { %v670_v18 = vsel %vm443_vm13, %v6242_v17, 0.0  ;;  %6245 = vrcp.f32 %v219_v14 }
 0x50e   :  { %671 = vadd.xlane.f32.xlu0 %v670_v18 }
 0x510   :  { %v6244_v19 = vpop.eup %6243 }
 0x511   :  { %v673_v20 = vsel %vm447_vm12, %v6244_v19, 0.0 }
 0x512   :  { %674 = vadd.xlane.f32.xlu1 %v673_v20 }
 0x517   :  { %v6246_v22 = vpop.eup %6245 }
 0x518   :  { %v234_v23 = vmul.f32 %v6246_v22, %v231_v21 }
 0x51a   :  { %v243_v25 = vadd.f32 %v6607_v54, %v234_v23 }
 0x51c   :  { %5426 = vmatmul.mubr.msk.f32.vlgmr.msra.gmra.mrb[0].mxu1 %vm163_vm3, %v243_v25 }
 0x523   :  { %6083 = vrot.lane.b32.xlu1 %v6630_v12, %s6421_s26 }
 0x524   :  { %6078 = vrot.lane.b32.xlu0 %v6633_v13, %s6422_s2 }
 0x527   :  { %6088 = vrot.lane.b32.xlu1 %v6684_v27, %s6423_s23 }
 0x528   :  { %796 = vrot.lane.b32.xlu0 %v791_v26, %s7790_s24  ;;  %v6097_v26 = vpack.i.bf16 %v1020_v4, %v6625_v8 }
 0x52b   :  { %794 = vrot.lane.b32.xlu1 %v6625_v8, %s7790_s24 }
 0x592   :  { %v462_v51 = vpop.xlane.xlu1 %461 }
 0x593   :  { %6247 = vrcp.f32 %v462_v51  ;;  %v459_v54 = vpop.xlane.xlu0 %458 }
 0x594   :  { %6249 = vrcp.f32 %v459_v54 }
 0x59b   :  { %v672_v12 = vpop.xlane.xlu0 %671 }
 0x59c   :  { %6251 = vrcp.f32 %v672_v12 }
 0x59d   :  { %v6248_v13 = vpop.eup %6247 }
 0x59e   :  { %v6250_v28 = vpop.eup %6249  ;;  %v466_v29 = vmul.f32 %v6248_v13, %v6236_v61 }
 0x59f   :  { %v6079_v30 = vpop.permute.xlu0 %6078  ;;  %v675_v31 = vpop.xlane.xlu1 %674  ;;  %v465_v32 = vmul.f32 %v6250_v28, %v6238_v62 }
 0x5a0   :  { %v6081_v33 = vunpack.i.h.bf16 %v6079_v30  ;;  %v6080_v34 = vunpack.i.l.bf16 %v6079_v30  ;;  %6253 = vrcp.f32 %v675_v31  ;;  %468 = vst.msk [vmem:[%s7766_s18 + $0x8] sm:$0x1] %vm447_vm12, %v466_v29 }
 0x5a1   :  { %5439 = vmatprep.mubr.msk.f32.mxu1 %vm443_vm13, %v465_v32  ;;  %467 = vst.msk [vmem:[%s7766_s18] sm:$0xff] %vm443_vm13, %v465_v32 }
 0x5a2   :  { %v5802_v36 = vpack.c.bf16 %v6081_v33, %v6080_v34 }
 0x5a3   :  { %v6084_v37 = vpop.permute.xlu1 %6083  ;;  %v797_v50 = vpop.permute.xlu0 %796 }
 0x5a4   :  { %v6086_v38 = vunpack.i.h.bf16 %v6084_v37  ;;  %v6085_v39 = vunpack.i.l.bf16 %v6084_v37  ;;  %5804 = vmatprep.subr.msk.bf16.mxu1 %vm6696_vm4, %v5802_v36 }
 0x5a5   :  { %5807 = vmatpush3.bf16.msk.msra.mxu1 %vm6696_vm4, %v5802_v36 }
 0x5a6   :  { %v6252_v40 = vpop.eup %6251  ;;  %v5814_v41 = vpack.c.bf16 %v6086_v38, %v6085_v39 }
 0x5a7   :  { %v6089_v42 = vpop.permute.xlu1 %6088  ;;  %v6708_v43 = vmul.f32 %v6252_v40, %v6242_v17 }
 0x5a8   :  { %v6091_v44 = vunpack.i.h.bf16 %v6089_v42  ;;  %v6090_v45 = vunpack.i.l.bf16 %v6089_v42  ;;  %5440 = vmatmul.mubr.msk.f32.vlgmr.msra.gmra.mrb[2].mxu1 %vm443_vm13, %v466_v29  ;;  %5816 = vmatprep.subr.msk.bf16.mxu1 %vm6696_vm4, %v5814_v41 }
 0x5a9   :  { %5819 = vmatpush3.bf16.msk.msra.mxu1 %vm6696_vm4, %v5814_v41  ;;  %5453 = vmatprep.mubr.msk.f32.mxu1 %vm443_vm13, %v6708_v43 }
 0x5aa   :  { %v6254_v46 = vpop.eup %6253  ;;  %v5820_v47 = vpack.c.bf16 %v6091_v44, %v6090_v45 }
 0x5ab   :  { %v6717_v48 = vmul.f32 %v6254_v46, %v6244_v19  ;;  %v795_v49 = vpop.permute.xlu1 %794 }
 0x5ac   :  { %5822 = vmatprep.subr.msk.bf16.mxu1 %vm6651_vm11, %v5820_v47 }
 0x5ad   :  { %5454 = vmatmul.mubr.msk.f32.vlgmr.msra.gmra.mrb[4].mxu1 %vm443_vm13, %v6717_v48 }
 0x5ae   :  { %5460 = vmatprep.mubr.msk.f32.mxu1 %vm357_vm9, %v795_v49 }
 0x5b2   :  { %5825 = vmatpush3.bf16.xpose.msk.msra.mxu1 %vm6651_vm11, %v5820_v47 }
 0x5b9   :  { %5461 = vmatmul.mubr.msk.f32.vlgmr.msra.gmra.mrb[6].mxu1 %vm357_vm9, %v797_v50 }
 0x5ef   :  { %v340_v52 = vpop.f32.mrb[0].mxu1 }
 0x5f0   :  { %v341_v53 = vadd.f32 %v6619_v63, %v340_v52  ;;  %v5427_v55 = vpop.f32.mrb[1].mxu1 }
 0x5f2   :  { %348 = vst.msk [vmem:[#allocation2 + $0x10] sm:$0x3] %vm347_vm5, %v341_v53 }
 0x67b   :  { %v5441_v56 = vpop.f32.mrb[2].mxu1 }
 0x67c   :  { %560 = vst.msk [vmem:[#allocation3 + $0x8] sm:$0x1] %vm7781_vm6, %v5441_v56  ;;  %v549_v57 = vpop.f32.mrb[3].mxu1 }
 0x67d   :  { %558 = vst.msk [vmem:[#allocation3] sm:$0xff] %vm357_vm9, %v549_v57 }
 0x680   :  { %v6731_v58 = vpop.f32.mrb[4].mxu1 }
 0x681   :  { %v6733_v59 = vpop.f32.mrb[5].mxu1 }
 0x68c   :  { %v5462_v60 = vpop.f32.mrb[6].mxu1 }
 0x68d   :  { %v886_v61 = vmul.f32 0.35355338, %v5462_v60  ;;  %v876_v62 = vpop.f32.mrb[7].mxu1 }
 0x68e   :  { %v885_v1 = vmul.f32 0.35355338, %v876_v62 }
 0x68f   :  { %v890_v63 = vsel %vm447_vm12, %v886_v61, -inf }
 0x690   :  { %891 = vmax.xlane.f32.xlu0 %v890_v63  ;;  %v887_v2 = vsel %vm443_vm13, %v885_v1, -inf  ;;  %v1249_v63 = vld [vmem:[#allocation2 + $0x11] sm:$0x1] }
 0x691   :  { %888 = vmax.xlane.f32.xlu1 %v887_v2 }
 0x6a2   :  { %6093 = vrot.lane.b32.xlu1 %v6684_v27, %s7788_s29 }
 0x6a6   :  { %1023 = vrot.lane.b32.xlu1 %v6625_v8, %s7786_s30 }
 0x6aa   :  { %1025 = vrot.lane.b32.xlu1 %v1020_v4, %s7786_s30 }
 0x71d   :  { %v892_v5 = vpop.xlane.xlu0 %891 }
 0x71e   :  { %v894_v6 = vsub.f32 %v886_v61, %v892_v5  ;;  %v889_v7 = vpop.xlane.xlu1 %888 }
 0x71f   :  { %v893_v9 = vsub.f32 %v885_v1, %v889_v7  ;;  %v6777_v1 = vld [vmem:[#allocation2 + $0x9] sm:$0xff] }
 0x720   :  { %v897_v11 = vmul.f32 1.442695, %v894_v6  ;;  %v6107_v2 = vpack.i.bf16 %v1249_v63, %v6777_v1 }
 0x721   :  { %v895_v14 = vmul.f32 1.442695, %v893_v9 }
 0x722   :  { %6255 = vpow2.f32 %v897_v11  ;;  %v6094_v17 = vpop.permute.xlu1 %6093 }
 0x723   :  { %v6096_v18 = vunpack.i.h.bf16 %v6094_v17  ;;  %v6095_v19 = vunpack.i.l.bf16 %v6094_v17  ;;  %6257 = vpow2.f32 %v895_v14 }
 0x725   :  { %v5826_v20 = vpack.c.bf16 %v6096_v18, %v6095_v19 }
 0x726   :  { %v1024_v8 = vpop.permute.xlu1 %1023 }
 0x727   :  { %5828 = vmatprep.subr.msk.bf16.mxu0 %vm6696_vm4, %v5826_v20 }
 0x728   :  { %5831 = vmatpush3.bf16.msk.msra.mxu0 %vm6696_vm4, %v5826_v20 }
 0x72a   :  { %v1026_v33 = vpop.permute.xlu1 %1025 }
 0x72c   :  { %v6256_v21 = vpop.eup %6255 }
 0x72d   :  { %v902_v22 = vsel %vm447_vm12, %v6256_v21, 0.0  ;;  %v6258_v23 = vpop.eup %6257 }
 0x72e   :  { %903 = vadd.xlane.f32.xlu0 %v902_v22  ;;  %v899_v25 = vsel %vm443_vm13, %v6258_v23, 0.0 }
 0x732   :  { %900 = vadd.xlane.f32.xlu0 %v899_v25 }
 0x748   :  { %6098 = vrot.lane.b32.xlu0 %v6097_v26, %s7784_s20 }
 0x7bb   :  { %v904_v27 = vpop.xlane.xlu0 %903 }
 0x7bc   :  { %6259 = vrcp.f32 %v904_v27 }
 0x7bf   :  { %v901_v51 = vpop.xlane.xlu0 %900 }
 0x7c0   :  { %6261 = vrcp.f32 %v901_v51 }
 0x7c3   :  { %v6099_v54 = vpop.permute.xlu0 %6098 }
 0x7c4   :  { %v6101_v12 = vunpack.i.h.bf16 %v6099_v54  ;;  %v6100_v13 = vunpack.i.l.bf16 %v6099_v54 }
 0x7c6   :  { %v5832_v28 = vpack.c.bf16 %v6101_v12, %v6100_v13  ;;  %v6260_v29 = vpop.eup %6259 }
 0x7c7   :  { %v6754_v32 = vmul.f32 %v6260_v29, %v6256_v21 }
 0x7c8   :  { %5834 = vmatprep.subr.msk.bf16.mxu0 %vm6651_vm11, %v5832_v28 }
 0x7ca   :  { %v6262_v30 = vpop.eup %6261 }
 0x7cb   :  { %v6752_v31 = vmul.f32 %v6262_v30, %v6258_v23 }
 0x7cd   :  { %5467 = vmatprep.mubr.msk.f32.mxu0 %vm443_vm13, %v6752_v31 }
 0x7ce   :  { %5468 = vmatmul.mubr.msk.f32.vlgmr.msra.gmra.mrb[14].mxu0 %vm443_vm13, %v6754_v32 }
 0x7cf   :  { %5837 = vmatpush3.bf16.xpose.msk.msra.mxu0 %vm6651_vm11, %v5832_v28  ;;  %5474 = vmatprep.mubr.msk.f32.mxu0 %vm357_vm9, %v1024_v8 }
 0x7d6   :  { %5475 = vmatmul.mubr.msk.f32.vlgmr.msra.gmra.mrb[16].mxu0 %vm357_vm9, %v1026_v33 }
 0x8a1   :  { %v6764_v34 = vpop.f32.mrb[14].mxu0 }
 0x8a2   :  { %v6766_v36 = vpop.f32.mrb[15].mxu0 }
 0x8a9   :  { %v5476_v37 = vpop.f32.mrb[16].mxu0 }
 0x8aa   :  { %v1115_v38 = vmul.f32 0.35355338, %v5476_v37  ;;  %v1105_v39 = vpop.f32.mrb[17].mxu0 }
 0x8ab   :  { %v1114_v40 = vmul.f32 0.35355338, %v1105_v39 }
 0x8ac   :  { %v1119_v41 = vsel %vm447_vm12, %v1115_v38, -inf }
 0x8ad   :  { %1120 = vmax.xlane.f32.xlu0 %v1119_v41  ;;  %v1116_v42 = vsel %vm443_vm13, %v1114_v40, -inf }
 0x8ae   :  { %1117 = vmax.xlane.f32.xlu1 %v1116_v42 }
 0x8bf   :  { %6103 = vrot.lane.b32.xlu1 %v6097_v26, %s7782_s21 }
 0x93a   :  { %v1121_v44 = vpop.xlane.xlu0 %1120 }
 0x93b   :  { %v1123_v45 = vsub.f32 %v1115_v38, %v1121_v44  ;;  %v1118_v46 = vpop.xlane.xlu1 %1117  ;;  %v1457_v44 = vld [vmem:[#allocation2 + $0x11] sm:$0x1] }
 0x93c   :  { %v1122_v47 = vsub.f32 %v1114_v40, %v1118_v46 }
 0x93d   :  { %v1126_v49 = vmul.f32 1.442695, %v1123_v45  ;;  %v6117_v45 = vpack.i.bf16 %v1457_v44, %v6777_v1 }
 0x93e   :  { %v1124_v50 = vmul.f32 1.442695, %v1122_v47 }
 0x93f   :  { %6263 = vpow2.f32 %v1126_v49  ;;  %v6104_v52 = vpop.permute.xlu1 %6103 }
 0x940   :  { %v6106_v53 = vunpack.i.h.bf16 %v6104_v52  ;;  %v6105_v55 = vunpack.i.l.bf16 %v6104_v52  ;;  %6265 = vpow2.f32 %v1124_v50 }
 0x942   :  { %v5838_v56 = vpack.c.bf16 %v6106_v53, %v6105_v55 }
 0x944   :  { %5840 = vmatprep.subr.msk.bf16.mxu1 %vm6696_vm4, %v5838_v56 }
 0x945   :  { %5843 = vmatpush3.bf16.msk.msra.mxu1 %vm6696_vm4, %v5838_v56 }
 0x949   :  { %v6264_v57 = vpop.eup %6263 }
 0x94a   :  { %v1131_v60 = vsel %vm447_vm12, %v6264_v57, 0.0  ;;  %v6266_v61 = vpop.eup %6265 }
 0x94b   :  { %1132 = vadd.xlane.f32.xlu0 %v1131_v60  ;;  %v1128_v62 = vsel %vm443_vm13, %v6266_v61, 0.0 }
 0x94f   :  { %1129 = vadd.xlane.f32.xlu0 %v1128_v62 }
 0x965   :  { %6108 = vrot.lane.b32.xlu0 %v6107_v2, %s6419_s19 }
 0x9d8   :  { %v1133_v4 = vpop.xlane.xlu0 %1132 }
 0x9d9   :  { %6267 = vrcp.f32 %v1133_v4 }
 0x9dc   :  { %v1130_v5 = vpop.xlane.xlu0 %1129 }
 0x9dd   :  { %6269 = vrcp.f32 %v1130_v5 }
 0x9e0   :  { %v6109_v6 = vpop.permute.xlu0 %6108 }
 0x9e1   :  { %v6111_v7 = vunpack.i.h.bf16 %v6109_v6  ;;  %v6110_v9 = vunpack.i.l.bf16 %v6109_v6 }
 0x9e3   :  { %v5844_v11 = vpack.c.bf16 %v6111_v7, %v6110_v9  ;;  %v6268_v14 = vpop.eup %6267 }
 0x9e4   :  { %v6785_v19 = vmul.f32 %v6268_v14, %v6264_v57  ;;  %v1682_v14 = vld [vmem:[#allocation2 + $0x11] sm:$0x1] }
 0x9e5   :  { %5846 = vmatprep.subr.msk.bf16.mxu1 %vm6651_vm11, %v5844_v11 }
 0x9e7   :  { %v6270_v17 = vpop.eup %6269 }
 0x9e8   :  { %v6783_v18 = vmul.f32 %v6270_v17, %v6266_v61 }
 0x9ea   :  { %5481 = vmatprep.mubr.msk.f32.mxu1 %vm443_vm13, %v6783_v18 }
 0x9eb   :  { %5482 = vmatmul.mubr.msk.f32.vlgmr.msra.gmra.mrb[8].mxu1 %vm443_vm13, %v6785_v19 }
 0x9ec   :  { %5849 = vmatpush3.bf16.xpose.msk.msra.mxu1 %vm6651_vm11, %v5844_v11  ;;  %5488 = vmatprep.mubr.msk.f32.mxu1 %vm357_vm9, %v6777_v1 }
 0x9f3   :  { %5489 = vmatmul.mubr.msk.f32.vlgmr.msra.gmra.mrb[10].mxu1 %vm357_vm9, %v1249_v63 }
 0xabe   :  { %v6796_v20 = vpop.f32.mrb[8].mxu1 }
 0xabf   :  { %v6798_v21 = vpop.f32.mrb[9].mxu1 }
 0xac6   :  { %v5490_v22 = vpop.f32.mrb[10].mxu1 }
 0xac7   :  { %v1340_v23 = vmul.f32 0.35355338, %v5490_v22  ;;  %v1330_v25 = vpop.f32.mrb[11].mxu1 }
 0xac8   :  { %v1339_v26 = vmul.f32 0.35355338, %v1330_v25 }
 0xac9   :  { %v1344_v27 = vsel %vm447_vm12, %v1340_v23, -inf }
 0xaca   :  { %1345 = vmax.xlane.f32.xlu0 %v1344_v27  ;;  %v1341_v51 = vsel %vm443_vm13, %v1339_v26, -inf }
 0xacb   :  { %1342 = vmax.xlane.f32.xlu1 %v1341_v51 }
 0xadc   :  { %6113 = vrot.lane.b32.xlu1 %v6107_v2, %s6422_s2 }
 0xae0   :  { %1460 = vrot.lane.b32.xlu1 %v6777_v1, %s6420_s0 }
 0xb57   :  { %v1346_v54 = vpop.xlane.xlu0 %1345 }
 0xb58   :  { %v1348_v12 = vsub.f32 %v1340_v23, %v1346_v54  ;;  %v1343_v13 = vpop.xlane.xlu1 %1342 }
 0xb59   :  { %v1347_v28 = vsub.f32 %v1339_v26, %v1343_v13 }
 0xb5a   :  { %v1351_v29 = vmul.f32 1.442695, %v1348_v12 }
 0xb5b   :  { %v1349_v30 = vmul.f32 1.442695, %v1347_v28 }
 0xb5c   :  { %6271 = vpow2.f32 %v1351_v29  ;;  %v6114_v8 = vpop.permute.xlu1 %6113 }
 0xb5d   :  { %6273 = vpow2.f32 %v1349_v30  ;;  %v6116_v33 = vunpack.i.h.bf16 %v6114_v8  ;;  %v6115_v37 = vunpack.i.l.bf16 %v6114_v8 }
 0xb5f   :  { %v5850_v38 = vpack.c.bf16 %v6116_v33, %v6115_v37  ;;  %v6127_v33 = vpack.i.bf16 %v1682_v14, %v6777_v1 }
 0xb60   :  { %v1461_v46 = vpop.permute.xlu1 %1460 }
 0xb61   :  { %5852 = vmatprep.subr.msk.bf16.mxu0 %vm6696_vm4, %v5850_v38 }
 0xb62   :  { %5855 = vmatpush3.bf16.msk.msra.mxu0 %vm6696_vm4, %v5850_v38 }
 0xb66   :  { %v6272_v39 = vpop.eup %6271 }
 0xb67   :  { %v6274_v40 = vpop.eup %6273  ;;  %v1356_v41 = vsel %vm447_vm12, %v6272_v39, 0.0 }
 0xb68   :  { %1357 = vadd.xlane.f32.xlu0 %v1356_v41  ;;  %v1353_v42 = vsel %vm443_vm13, %v6274_v40, 0.0 }
 0xb69   :  { %1354 = vadd.xlane.f32.xlu1 %v1353_v42 }
 0xb7a   :  { %1462 = vrot.lane.b32.xlu1 %v1457_v44, %s6420_s0 }
 0xb7e   :  { %6118 = vrot.lane.b32.xlu0 %v6117_v45, %s6418_s1 }
 0xbf5   :  { %v1358_v47 = vpop.xlane.xlu0 %1357 }
 0xbf6   :  { %6275 = vrcp.f32 %v1358_v47  ;;  %v1355_v49 = vpop.xlane.xlu1 %1354 }
 0xbf7   :  { %6277 = vrcp.f32 %v1355_v49 }
 0xbf9   :  { %v6119_v50 = vpop.permute.xlu0 %6118 }
 0xbfa   :  { %v6121_v52 = vunpack.i.h.bf16 %v6119_v50  ;;  %v6120_v53 = vunpack.i.l.bf16 %v6119_v50  ;;  %v1463_v62 = vpop.permute.xlu1 %1462 }
 0xbfc   :  { %v5856_v55 = vpack.c.bf16 %v6121_v52, %v6120_v53 }
 0xbfe   :  { %5858 = vmatprep.subr.msk.bf16.mxu0 %vm6651_vm11, %v5856_v55 }
 0xc00   :  { %v6276_v56 = vpop.eup %6275 }
 0xc01   :  { %v6278_v57 = vpop.eup %6277  ;;  %v1362_v60 = vmul.f32 %v6276_v56, %v6272_v39 }
 0xc02   :  { %v1361_v61 = vmul.f32 %v6278_v57, %v6274_v40 }
 0xc03   :  { %5031 = vst.msk [vmem:[%s7766_s18 + $0x18] sm:$0x1] %vm447_vm12, %v1362_v60 }
 0xc04   :  { %5495 = vmatprep.mubr.msk.f32.mxu0 %vm443_vm13, %v1361_v61  ;;  %5030 = vst.msk [vmem:[%s7766_s18 + $0x10] sm:$0xff] %vm443_vm13, %v1361_v61 }
 0xc05   :  { %5496 = vmatmul.mubr.msk.f32.vlgmr.msra.gmra.mrb[18].mxu0 %vm443_vm13, %v1362_v60 }
 0xc06   :  { %5861 = vmatpush3.bf16.xpose.msk.msra.mxu0 %vm6651_vm11, %v5856_v55  ;;  %5502 = vmatprep.mubr.msk.f32.mxu0 %vm357_vm9, %v1461_v46 }
 0xc0d   :  { %5503 = vmatmul.mubr.msk.f32.vlgmr.msra.gmra.mrb[20].mxu0 %vm357_vm9, %v1463_v62 }
 0xcd8   :  { %v5497_v63 = vpop.f32.mrb[18].mxu0 }
 0xcd9   :  { %1455 = vst.msk [vmem:[#allocation3 + $0x11] sm:$0x1] %vm7781_vm6, %v5497_v63  ;;  %v1445_v2 = vpop.f32.mrb[19].mxu0  ;;  %v1907_v63 = vld [vmem:[#allocation2 + $0x11] sm:$0x1]  ;;  %vm7796_vm6 = vcmask 261312  }
 0xcda   :  { %1454 = vst.msk [vmem:[#allocation3 + $0x9] sm:$0xff] %vm357_vm9, %v1445_v2 }
 0xce0   :  { %v5504_v4 = vpop.f32.mrb[20].mxu0 }
 0xce1   :  { %v1552_v5 = vmul.f32 0.35355338, %v5504_v4  ;;  %v1542_v6 = vpop.f32.mrb[21].mxu0 }
 0xce2   :  { %v1551_v7 = vmul.f32 0.35355338, %v1542_v6 }
 0xce3   :  { %v1556_v9 = vsel %vm447_vm12, %v1552_v5, -inf }
 0xce4   :  { %1557 = vmax.xlane.f32.xlu0 %v1556_v9  ;;  %v1553_v11 = vsel %vm443_vm13, %v1551_v7, -inf }
 0xce5   :  { %1554 = vmax.xlane.f32.xlu1 %v1553_v11 }
 0xcf6   :  { %6123 = vrot.lane.b32.xlu1 %v6117_v45, %s6421_s26 }
 0xcfa   :  { %1685 = vrot.lane.b32.xlu1 %v6777_v1, %s7790_s24 }
 0xcfe   :  { %1687 = vrot.lane.b32.xlu1 %v1682_v14, %s7790_s24  ;;  %s7820_s24 = smov 8  }
 0xd71   :  { %v1558_v17 = vpop.xlane.xlu0 %1557 }
 0xd72   :  { %v1560_v22 = vsub.f32 %v1552_v5, %v1558_v17  ;;  %v1555_v23 = vpop.xlane.xlu1 %1554 }
 0xd73   :  { %v1559_v25 = vsub.f32 %v1551_v7, %v1555_v23 }
 0xd74   :  { %v1563_v26 = vmul.f32 1.442695, %v1560_v22 }
 0xd75   :  { %v1561_v27 = vmul.f32 1.442695, %v1559_v25 }
 0xd76   :  { %6279 = vpow2.f32 %v1563_v26  ;;  %v6124_v51 = vpop.permute.xlu1 %6123 }
 0xd77   :  { %v6126_v54 = vunpack.i.h.bf16 %v6124_v51  ;;  %v6125_v12 = vunpack.i.l.bf16 %v6124_v51  ;;  %6281 = vpow2.f32 %v1561_v27  ;;  %v6137_v51 = vpack.i.bf16 %v1907_v63, %v6777_v1 }
 0xd79   :  { %v5862_v13 = vpack.c.bf16 %v6126_v54, %v6125_v12 }
 0xd7a   :  { %v1686_v49 = vpop.permute.xlu1 %1685 }
 0xd7b   :  { %5864 = vmatprep.subr.msk.bf16.mxu1 %vm6696_vm4, %v5862_v13 }
 0xd7c   :  { %5867 = vmatpush3.bf16.msk.msra.mxu1 %vm6696_vm4, %v5862_v13 }
 0xd7e   :  { %v1688_v50 = vpop.permute.xlu1 %1687 }
 0xd80   :  { %v6280_v28 = vpop.eup %6279 }
 0xd81   :  { %v1568_v29 = vsel %vm447_vm12, %v6280_v28, 0.0  ;;  %v6282_v30 = vpop.eup %6281 }
 0xd82   :  { %1569 = vadd.xlane.f32.xlu0 %v1568_v29  ;;  %v1565_v8 = vsel %vm443_vm13, %v6282_v30, 0.0 }
 0xd86   :  { %1566 = vadd.xlane.f32.xlu0 %v1565_v8 }
 0xd9c   :  { %6128 = vrot.lane.b32.xlu0 %v6127_v33, %s6423_s23 }
 0xe0f   :  { %v1570_v37 = vpop.xlane.xlu0 %1569 }
 0xe10   :  { %6283 = vrcp.f32 %v1570_v37 }
 0xe13   :  { %v1567_v38 = vpop.xlane.xlu0 %1566 }
 0xe14   :  { %6285 = vrcp.f32 %v1567_v38 }
 0xe17   :  { %v6129_v39 = vpop.permute.xlu0 %6128 }
 0xe18   :  { %v6131_v40 = vunpack.i.h.bf16 %v6129_v39  ;;  %v6130_v41 = vunpack.i.l.bf16 %v6129_v39 }
 0xe1a   :  { %v5868_v42 = vpack.c.bf16 %v6131_v40, %v6130_v41  ;;  %v6284_v44 = vpop.eup %6283 }
 0xe1b   :  { %v6850_v47 = vmul.f32 %v6284_v44, %v6280_v28 }
 0xe1c   :  { %5870 = vmatprep.subr.msk.bf16.mxu1 %vm6651_vm11, %v5868_v42 }
 0xe1e   :  { %v6286_v45 = vpop.eup %6285 }
 0xe1f   :  { %v6848_v46 = vmul.f32 %v6286_v45, %v6282_v30 }
 0xe21   :  { %5509 = vmatprep.mubr.msk.f32.mxu1 %vm443_vm13, %v6848_v46 }
 0xe22   :  { %5510 = vmatmul.mubr.msk.f32.vlgmr.msra.gmra.mrb[12].mxu1 %vm443_vm13, %v6850_v47 }
 0xe23   :  { %5873 = vmatpush3.bf16.xpose.msk.msra.mxu1 %vm6651_vm11, %v5868_v42  ;;  %5516 = vmatprep.mubr.msk.f32.mxu1 %vm357_vm9, %v1686_v49 }
 0xe2a   :  { %5517 = vmatmul.mubr.msk.f32.vlgmr.msra.gmra.mrb[14].mxu1 %vm357_vm9, %v1688_v50 }
 0xef5   :  { %v6860_v52 = vpop.f32.mrb[12].mxu1 }
 0xef6   :  { %v6862_v53 = vpop.f32.mrb[13].mxu1 }
 0xefd   :  { %v5518_v55 = vpop.f32.mrb[14].mxu1 }
 0xefe   :  { %v1777_v56 = vmul.f32 0.35355338, %v5518_v55  ;;  %v1767_v57 = vpop.f32.mrb[15].mxu1 }
 0xeff   :  { %v1776_v60 = vmul.f32 0.35355338, %v1767_v57 }
 0xf00   :  { %v1781_v61 = vsel %vm447_vm12, %v1777_v56, -inf }
 0xf01   :  { %1782 = vmax.xlane.f32.xlu0 %v1781_v61  ;;  %v1778_v62 = vsel %vm443_vm13, %v1776_v60, -inf }
 0xf02   :  { %1779 = vmax.xlane.f32.xlu1 %v1778_v62 }
 0xf13   :  { %6133 = vrot.lane.b32.xlu1 %v6127_v33, %s7788_s29 }
 0xf17   :  { %1910 = vrot.lane.b32.xlu1 %v6777_v1, %s7786_s30 }
 0xf1b   :  { %1912 = vrot.lane.b32.xlu1 %v1907_v63, %s7786_s30 }
 0xf8e   :  { %v1783_v2 = vpop.xlane.xlu0 %1782 }
 0xf8f   :  { %v1785_v4 = vsub.f32 %v1777_v56, %v1783_v2  ;;  %v1780_v5 = vpop.xlane.xlu1 %1779 }
 0xf90   :  { %v1784_v6 = vsub.f32 %v1776_v60, %v1780_v5 }
 0xf91   :  { %v1788_v7 = vmul.f32 1.442695, %v1785_v4 }
 0xf92   :  { %v1786_v9 = vmul.f32 1.442695, %v1784_v6 }
 0xf93   :  { %6287 = vpow2.f32 %v1788_v7  ;;  %v6134_v11 = vpop.permute.xlu1 %6133 }
 0xf94   :  { %v6136_v14 = vunpack.i.h.bf16 %v6134_v11  ;;  %v6135_v17 = vunpack.i.l.bf16 %v6134_v11  ;;  %6289 = vpow2.f32 %v1786_v9 }
 0xf96   :  { %v5874_v22 = vpack.c.bf16 %v6136_v14, %v6135_v17 }
 0xf97   :  { %v1911_v1 = vpop.permute.xlu1 %1910 }
 0xf98   :  { %5876 = vmatprep.subr.msk.bf16.mxu0 %vm6696_vm4, %v5874_v22 }
 0xf99   :  { %5879 = vmatpush3.bf16.msk.msra.mxu0 %vm6696_vm4, %v5874_v22 }
 0xf9b   :  { %v1913_v39 = vpop.permute.xlu1 %1912 }
 0xf9d   :  { %v6288_v23 = vpop.eup %6287 }
 0xf9e   :  { %v1793_v25 = vsel %vm447_vm12, %v6288_v23, 0.0  ;;  %v6290_v26 = vpop.eup %6289 }
 0xf9f   :  { %1794 = vadd.xlane.f32.xlu0 %v1793_v25  ;;  %v1790_v27 = vsel %vm443_vm13, %v6290_v26, 0.0 }
 0xfa3   :  { %1791 = vadd.xlane.f32.xlu0 %v1790_v27  ;;  %v2135_v27 = vld [vmem:[%s7767_s7 + $0x8] sm:$0xff] }
 0xfb9   :  { %6138 = vrot.lane.b32.xlu0 %v6137_v51, %s7784_s20  ;;  %s7813_s20 = smov 48  }
0x102c   :  { %v1795_v54 = vpop.xlane.xlu0 %1794 }
0x102d   :  { %6291 = vrcp.f32 %v1795_v54 }
0x1030   :  { %v1792_v12 = vpop.xlane.xlu0 %1791 }
0x1031   :  { %6293 = vrcp.f32 %v1792_v12 }
0x1034   :  { %v6139_v13 = vpop.permute.xlu0 %6138 }
0x1035   :  { %v6141_v28 = vunpack.i.h.bf16 %v6139_v13  ;;  %v6140_v29 = vunpack.i.l.bf16 %v6139_v13 }
0x1037   :  { %v5880_v30 = vpack.c.bf16 %v6141_v28, %v6140_v29  ;;  %v6292_v8 = vpop.eup %6291  ;;  %v2136_v28 = vld [vmem:[%s7767_s7 + $0x10] sm:$0xff]  ;;  %v2137_v29 = vld [vmem:[%s7767_s7 + $0x18] sm:$0xff] }
0x1038   :  { %v6882_v38 = vmul.f32 %v6292_v8, %v6288_v23 }
0x1039   :  { %5882 = vmatprep.subr.msk.bf16.mxu0 %vm6651_vm11, %v5880_v30 }
0x103b   :  { %v6294_v33 = vpop.eup %6293 }
0x103c   :  { %v6880_v37 = vmul.f32 %v6294_v33, %v6290_v26 }
0x103e   :  { %5523 = vmatprep.mubr.msk.f32.mxu0 %vm443_vm13, %v6880_v37 }
0x103f   :  { %5524 = vmatmul.mubr.msk.f32.vlgmr.msra.gmra.mrb[22].mxu0 %vm443_vm13, %v6882_v38 }
0x1040   :  { %5885 = vmatpush3.bf16.xpose.msk.msra.mxu0 %vm6651_vm11, %v5880_v30  ;;  %5530 = vmatprep.mubr.msk.f32.mxu0 %vm357_vm9, %v1911_v1  ;;  %v5896_v30 = vpack.c.bf16 %v2137_v29, %v2136_v28  ;;  %v7015_v28 = vld [vmem:[%s7770_s9] ss:$0 sm:$0xff] }
0x1041   :  { %5898 = vmatprep.subr.bf16.mxu0 %v6415_v0 }
0x1047   :  { %5531 = vmatmul.mubr.msk.f32.vlgmr.msra.gmra.mrb[24].mxu0 %vm357_vm9, %v1913_v39 }
0x1048   :  { %5565 = vmatprep.mubr.msk.f32.mxu0 %vm6416_vm0, %v6417_v3 }
0x1112   :  { %v6895_v40 = vpop.f32.mrb[22].mxu0 }
0x1113   :  { %v1887_v41 = vpop.f32.mrb[23].mxu0 }
0x111a   :  { %v5532_v42 = vpop.f32.mrb[24].mxu0 }
0x111b   :  { %v2002_v44 = vmul.f32 0.35355338, %v5532_v42  ;;  %v1992_v45 = vpop.f32.mrb[25].mxu0 }
0x111c   :  { %v2001_v49 = vmul.f32 0.35355338, %v1992_v45 }
0x111d   :  { %v2006_v50 = vsel %vm447_vm12, %v2002_v44, -inf }
0x111e   :  { %2007 = vmax.xlane.f32.xlu0 %v2006_v50  ;;  %v2003_v55 = vsel %vm443_vm13, %v2001_v49, -inf }
0x111f   :  { %2004 = vmax.xlane.f32.xlu1 %v2003_v55 }
0x1130   :  { %6143 = vrot.lane.b32.xlu1 %v6137_v51, %s7782_s21  ;;  %s7814_s21 = smov 104  }
0x1134   :  { %1009 = vrot.lane.b32.xlu1 %v6766_v36, %s7798_s22 }
0x1138   :  { %1238 = vrot.lane.b32.xlu1 %v6798_v21, %s7794_s25 }
0x113c   :  { %782 = vrot.lane.b32.xlu1 %v6731_v58, %s7792_s27 }
0x1140   :  { %1011 = vrot.lane.b32.xlu1 %v6764_v34, %s7798_s22 }
0x1144   :  { %1240 = vrot.lane.b32.xlu1 %v6796_v20, %s7794_s25 }
0x11ab   :  { %v2008_v56 = vpop.xlane.xlu0 %2007 }
0x11ac   :  { %v2010_v57 = vsub.f32 %v2002_v44, %v2008_v56  ;;  %v2005_v60 = vpop.xlane.xlu1 %2004 }
0x11ad   :  { %v2009_v61 = vsub.f32 %v2001_v49, %v2005_v60 }
0x11ae   :  { %v2013_v62 = vmul.f32 1.442695, %v2010_v57 }
0x11af   :  { %v2011_v36 = vmul.f32 1.442695, %v2009_v61 }
0x11b0   :  { %v6144_v63 = vpop.permute.xlu1 %6143 }
0x11b1   :  { %6295 = vpow2.f32 %v2011_v36  ;;  %v6146_v2 = vunpack.i.h.bf16 %v6144_v63  ;;  %v6145_v21 = vunpack.i.l.bf16 %v6144_v63 }
0x11b2   :  { %6297 = vpow2.f32 %v2013_v62 }
0x11b3   :  { %v5886_v4 = vpack.c.bf16 %v6146_v2, %v6145_v21  ;;  %v2321_v21 = vld [vmem:[%s7769_s11 + $0x8] sm:$0xff] }
0x11b4   :  { %v1010_v5 = vpop.permute.xlu1 %1009 }
0x11b5   :  { %5888 = vmatprep.subr.msk.bf16.mxu1 %vm6696_vm4, %v5886_v4 }
0x11b6   :  { %5891 = vmatpush3.bf16.msk.msra.mxu1 %vm6696_vm4, %v5886_v4 }
0x11b7   :  { %5892 = vmatprep.subr.bf16.mxu1 %v6415_v0 }
0x11b8   :  { %v1239_v58 = vpop.permute.xlu1 %1238 }
0x11bb   :  { %v6296_v34 = vpop.eup %6295 }
0x11bc   :  { %v783_v20 = vpop.permute.xlu1 %782  ;;  %v2015_v6 = vsel %vm443_vm13, %v6296_v34, 0.0  ;;  %v6298_v7 = vpop.eup %6297 }
0x11bd   :  { %789 = vst.msk [vmem:[#allocation3 + $0x8] sm:$0x1] %vm788_vm7, %v783_v20  ;;  %2016 = vadd.xlane.f32.xlu0 %v2015_v6  ;;  %v2018_v11 = vsel %vm447_vm12, %v6298_v7, 0.0 }
0x11c0   :  { %v1012_v9 = vpop.permute.xlu1 %1011 }
0x11c1   :  { %1018 = vst.msk [vmem:[#allocation3 + $0x8] sm:$0x1] %vm1017_vm14, %v1012_v9  ;;  %2019 = vadd.xlane.f32.xlu0 %v2018_v11 }
0x11c4   :  { %v1241_v14 = vpop.permute.xlu1 %1240 }
0x11c5   :  { %1247 = vst.msk [vmem:[#allocation3 + $0x8] sm:$0x1] %vm1246_vm15, %v1241_v14 }
0x11d7   :  { %780 = vrot.lane.b32.xlu0 %v6733_v59, %s7792_s27 }
0x11db   :  { %1673 = vrot.lane.b32.xlu0 %v6862_v53, %s7792_s27  ;;  %v2134_v53 = vld [vmem:[%s7767_s7] sm:$0xff] }
0x11dc   :  { %v5893_v54 = vpack.c.bf16 %v2135_v27, %v2134_v53 }
0x11df   :  { %1898 = vrot.lane.b32.xlu0 %v1887_v41, %s7798_s22  ;;  %v6961_v41 = vld [vmem:[%s7768_s8] ss:$0 sm:$0xff] }
0x124a   :  { %v2017_v17 = vpop.xlane.xlu0 %2016 }
0x124b   :  { %6299 = vrcp.f32 %v2017_v17 }
0x124e   :  { %v2020_v22 = vpop.xlane.xlu0 %2019 }
0x124f   :  { %6301 = vrcp.f32 %v2020_v22 }
0x1252   :  { %v781_v23 = vpop.permute.xlu0 %780 }
0x1253   :  { %787 = vst.msk [vmem:[#allocation3] sm:$0xff] %vm7800_vm1, %v781_v23 }
0x1254   :  { %1016 = vst.msk [vmem:[#allocation3] sm:$0xff] %vm7797_vm2, %v1010_v5  ;;  %v2323_v5 = vld [vmem:[%s7769_s11 + $0x18] sm:$0xff] }
0x1255   :  { %v6300_v25 = vpop.eup %6299  ;;  %1245 = vst.msk [vmem:[#allocation3] sm:$0xff] %vm7796_vm6, %v1239_v58 }
0x1256   :  { %v1674_v59 = vpop.permute.xlu0 %1673  ;;  %v6928_v26 = vmul.f32 %v6300_v25, %v6296_v34 }
0x1257   :  { %1679 = vst.msk [vmem:[#allocation3 + $0x9] sm:$0xff] %vm7800_vm1, %v1674_v59 }
0x1258   :  { %5537 = vmatprep.mubr.msk.f32.mxu1 %vm443_vm13, %v6928_v26 }
0x1259   :  { %v6302_v51 = vpop.eup %6301 }
0x125a   :  { %v1899_v12 = vpop.permute.xlu0 %1898  ;;  %v6939_v13 = vmul.f32 %v6302_v51, %v6298_v7 }
0x125b   :  { %1904 = vst.msk [vmem:[#allocation3 + $0x9] sm:$0xff] %vm7797_vm2, %v1899_v12 }
0x125c   :  { %5538 = vmatmul.mubr.msk.f32.vlgmr.msra.gmra.mrb[16].mxu1 %vm443_vm13, %v6939_v13  ;;  %v2131_v8 = vld [vmem:[#allocation3] sm:$0xff] }
0x125d   :  { %5894 = vmatpush3.bf16.msra.mxu1 %v5893_v54  ;;  %5548 = vmatprep.mubr.msk.f32.mxu1 %vm6416_vm0, %v6417_v3 }
0x125e   :  { %5895 = vmatprep.subr.bf16.mxu1 %v6415_v0 }
0x1261   :  { %5897 = vmatpush3.bf16.msra.mxu1 %v5896_v30 }
0x1262   :  { %5904 = vmatprep.subr.bf16.mxu1 %v6415_v0 }
0x1264   :  { %5549 = vmatmul.mubr.msk.f32.vlgmr.msra.gmra.mrb[18].mxu1 %vm163_vm3, %v2131_v8  ;;  %v7021_v8 = vld [vmem:[%s7771_s10] ss:$0 sm:$0xff] }
0x1265   :  { %5551 = vmatprep.mubr.msk.f32.mxu1 %vm6416_vm0, %v6417_v3 }
0x132f   :  { %v5539_v33 = vpop.f32.mrb[16].mxu1 }
0x1330   :  { %v2112_v1 = vpop.f32.mrb[17].mxu1 }
0x1331   :  { %2123 = vrot.lane.b32.xlu0 %v2112_v1, %s7794_s25 }
0x1337   :  { %v2213_v39 = vpop.f32.mrb[18].mxu1 }
0x1338   :  { %v2227_v42 = vadd.f32 %v2213_v39, %v6563_v10  ;;  %v5550_v44 = vpop.f32.mrb[19].mxu1  ;;  %v2423_v39 = vld [vmem:[%s7772_s13] sm:$0xff] }
0x1339   :  { %v2425_v44 = vld [vmem:[%s7772_s13 + $0x10] sm:$0xff] }
0x133a   :  { %v6965_v45 = vadd.f32 %v6961_v41, %v2227_v42  ;;  %v2424_v42 = vld [vmem:[%s7772_s13 + $0x8] sm:$0xff] }
0x133c   :  { %v2242_v49 = vsel %vm163_vm3, %v6965_v45, 0.0 }
0x133d   :  { %2243 = vadd.xlane.f32.xlu1 %v2242_v49  ;;  %v5905_v49 = vpack.c.bf16 %v2424_v42, %v2423_v39  ;;  %v7084_v39 = vld [vmem:[%s7774_s14] ss:$0 sm:$0xff] }
0x133f   :  { %5906 = vmatpush3.bf16.msra.mxu1 %v5905_v49 }
0x1340   :  { %5907 = vmatprep.subr.bf16.mxu1 %v6415_v0 }
0x134e   :  { %1900 = vrot.lane.b32.xlu1 %v6895_v40, %s7798_s22 }
0x1352   :  { %2125 = vrot.lane.b32.xlu1 %v5539_v33, %s7794_s25 }
0x13a3   :  { %v2124_v50 = vpop.permute.xlu0 %2123 }
0x13a4   :  { %2129 = vst.msk [vmem:[#allocation3 + $0x9] sm:$0xff] %vm7796_vm6, %v2124_v50  ;;  %v2426_v50 = vld [vmem:[%s7772_s13 + $0x18] sm:$0xff] }
0x13ab   :  { %v2132_v55 = vld [vmem:[#allocation3 + $0x8] sm:$0xff] }
0x13ac   :  { %5552 = vmatmul.mubr.msk.f32.gmra.mrb[20].mxu1 %vm163_vm3, %v2132_v55  ;;  %v5908_v55 = vpack.c.bf16 %v2426_v50, %v2425_v44 }
0x13ad   :  { %5554 = vmatprep.mubr.msk.f32.mxu1 %vm6416_vm0, %v6417_v3 }
0x13ae   :  { %5909 = vmatpush3.bf16.msra.mxu1 %v5908_v55 }
0x13af   :  { %5910 = vmatprep.subr.bf16.mxu1 %v6415_v0 }
0x13ca   :  { %v2244_v61 = vpop.xlane.xlu1 %2243 }
0x13cb   :  { %v2251_v62 = vmul.f32 0.03125, %v2244_v61 }
0x13cd   :  { %v2254_v36 = vsub.f32 %v6965_v45, %v2251_v62 }
0x13ce   :  { %v1901_v34 = vpop.permute.xlu1 %1900 }
0x13cf   :  { %v2257_v63 = vmul.f32 %v2254_v36, %v2254_v36  ;;  %v2305_v29 = vmul.f32 %v7015_v28, %v2254_v36 }
0x13d1   :  { %v2260_v2 = vsel %vm163_vm3, %v2257_v63, 0.0 }
0x13d2   :  { %v2126_v14 = vpop.permute.xlu1 %2125 }
0x147f   :  { %v2218_v10 = vpop.f32.mrb[20].mxu1 }
0x1480   :  { %v2228_v56 = vadd.f32 %v2218_v10, %v6570_v15  ;;  %v5553_v57 = vpop.f32.mrb[21].mxu1  ;;  %v2320_v15 = vld [vmem:[%s7769_s11] sm:$0xff] }
0x1481   :  { %v5899_v4 = vpack.c.bf16 %v2321_v21, %v2320_v15  ;;  %v2427_v10 = vld [vmem:[%s7772_s13 + $0x20] sm:$0xff] }
0x1482   :  { %v6978_v60 = vadd.f32 %v6961_v41, %v2228_v56  ;;  %v2428_v56 = vld [vmem:[%s7772_s13 + $0x28] sm:$0xff] }
0x1483   :  { %5900 = vmatpush3.bf16.msra.mxu0 %v5899_v4  ;;  %v5911_v57 = vpack.c.bf16 %v2428_v56, %v2427_v10  ;;  %v2430_v4 = vld [vmem:[%s7772_s13 + $0x38] sm:$0xff] }
0x1484   :  { %v2245_v40 = vsel %vm163_vm3, %v6978_v60, 0.0  ;;  %5901 = vmatprep.subr.bf16.mxu0 %v6415_v0 }
0x1485   :  { %2246 = vadd.xlane.f32.xlu0 %v2245_v40  ;;  %5912 = vmatpush3.bf16.msra.mxu1 %v5911_v57 }
0x1486   :  { %5913 = vmatprep.subr.bf16.mxu1 %v6415_v0 }
0x149b   :  { %1675 = vrot.lane.b32.xlu0 %v6860_v52, %s7792_s27  ;;  %v2322_v52 = vld [vmem:[%s7769_s11 + $0x10] sm:$0xff] }
0x149c   :  { %v5902_v58 = vpack.c.bf16 %v2323_v5, %v2322_v52  ;;  %v2429_v52 = vld [vmem:[%s7772_s13 + $0x30] sm:$0xff] }
0x149d   :  { %v5914_v5 = vpack.c.bf16 %v2430_v4, %v2429_v52 }
0x149e   :  { %5903 = vmatpush3.bf16.msra.mxu0 %v5902_v58 }
0x149f   :  { %5916 = vmatprep.subr.bf16.mxu0 %v6415_v0  ;;  %5915 = vmatpush3.bf16.msra.mxu1 %v5914_v5 }
0x14ba   :  { %2261 = vadd.xlane.f32.xlu0 %v2260_v2 }
0x1512   :  { %v2247_v20 = vpop.xlane.xlu0 %2246 }
0x1513   :  { %v2252_v6 = vmul.f32 0.03125, %v2247_v20 }
0x1515   :  { %v7001_v7 = vsub.f32 %v6978_v60, %v2252_v6 }
0x1516   :  { %v1676_v9 = vpop.permute.xlu0 %1675 }
0x1517   :  { %1680 = vst.msk [vmem:[#allocation3 + $0x11] sm:$0x1] %vm788_vm7, %v1676_v9  ;;  %v2258_v11 = vmul.f32 %v7001_v7, %v7001_v7  ;;  %v2306_v58 = vmul.f32 %v7015_v28, %v7001_v7  ;;  %v7069_v7 = vld [vmem:[%s7773_s12] ss:$0 sm:$0xff] }
0x1518   :  { %1905 = vst.msk [vmem:[#allocation3 + $0x11] sm:$0x1] %vm1017_vm14, %v1901_v34 }
0x1519   :  { %2130 = vst.msk [vmem:[#allocation3 + $0x11] sm:$0x1] %vm1246_vm15, %v2126_v14  ;;  %v2263_v17 = vsel %vm163_vm3, %v2258_v11, 0.0 }
0x151a   :  { %2264 = vadd.xlane.f32.xlu1 %v2263_v17 }
0x1520   :  { %v2133_v22 = vld [vmem:[#allocation3 + $0x10] sm:$0x3] }
0x1521   :  { %5555 = vmatmul.mubr.msk.f32.gmra.mrb[22].mxu1 %vm163_vm3, %v2133_v22 }
0x1522   :  { %5590 = vmatprep.mubr.msk.f32.mxu1 %vm6416_vm0, %v6417_v3 }
0x1547   :  { %v2262_v23 = vpop.xlane.xlu0 %2261 }
0x1548   :  { %v2269_v25 = vmul.f32 0.032258064, %v2262_v23 }
0x154a   :  { %6303 = vrsqrt.f32 %v2269_v25  ;;  %vm2274_vm6 = vcmp.eq.f32.partialorder %v2269_v25, inf  ;;  %v2277_v27 = vand.u32 2147483648, %v2269_v25  ;;  %vm2276_vm2 = vcmp.eq.f32.partialorder %v2269_v25, 0.0 }
0x1554   :  { %v6304_v59 = vpop.eup %6303 }
0x1555   :  { %v2273_v53 = vmul.f32 %v6304_v59, %v2269_v25 }
0x1557   :  { %v2275_v51 = vsel %vm2274_vm6, %v2269_v25, %v2273_v53 }
0x1558   :  { %v2278_v54 = vsel %vm2276_vm2, %v2277_v27, %v2275_v51 }
0x1559   :  { %v2293_v12 = vadd.f32 1e-06, %v2278_v54 }
0x155b   :  { %6305 = vrcp.f32 %v2293_v12 }
0x1565   :  { %v6306_v30 = vpop.eup %6305 }
0x1566   :  { %v2308_v33 = vmul.f32 %v6306_v30, %v2305_v29 }
0x1568   :  { %v2317_v1 = vadd.f32 %v7021_v8, %v2308_v33 }
0x156a   :  { %5566 = vmatmul.mubr.msk.f32.vlgmr.msra.gmra.mrb[26].mxu0 %vm163_vm3, %v2317_v1 }
0x156b   :  { %5568 = vmatprep.mubr.msk.f32.mxu0 %vm6416_vm0, %v6417_v3 }
0x15a7   :  { %v2265_v40 = vpop.xlane.xlu1 %2264 }
0x15a8   :  { %v2270_v61 = vmul.f32 0.032258064, %v2265_v40 }
0x15aa   :  { %6307 = vrsqrt.f32 %v2270_v61  ;;  %vm2281_vm6 = vcmp.eq.f32.partialorder %v2270_v61, inf  ;;  %v2284_v63 = vand.u32 2147483648, %v2270_v61  ;;  %vm2283_vm2 = vcmp.eq.f32.partialorder %v2270_v61, 0.0 }
0x15b4   :  { %v6308_v62 = vpop.eup %6307 }
0x15b5   :  { %v2280_v36 = vmul.f32 %v6308_v62, %v2270_v61 }
0x15b7   :  { %v2282_v2 = vsel %vm2281_vm6, %v2270_v61, %v2280_v36  ;;  %vm2431_vm6 = vcmask 523264  }
0x15b8   :  { %v2285_v15 = vsel %vm2283_vm2, %v2284_v63, %v2282_v2 }
0x15b9   :  { %v2294_v21 = vadd.f32 1e-06, %v2285_v15 }
0x15bb   :  { %6309 = vrcp.f32 %v2294_v21 }
0x15c5   :  { %v6310_v34 = vpop.eup %6309 }
0x15c6   :  { %v2309_v20 = vmul.f32 %v6310_v34, %v2306_v58 }
0x15c8   :  { %v2318_v6 = vadd.f32 %v7021_v8, %v2309_v20 }
0x15ca   :  { %5569 = vmatmul.mubr.msk.f32.gmra.mrb[28].mxu0 %vm163_vm3, %v2318_v6 }
0x15cb   :  { %5571 = vmatprep.mubr.msk.f32.mxu0 %vm6416_vm0, %v6417_v3 }
0x15f4   :  { %v2223_v9 = vpop.f32.mrb[22].mxu1 }
0x15f5   :  { %v2229_v11 = vadd.f32 %v2223_v9, %v6645_v16  ;;  %v5556_v14 = vpop.f32.mrb[23].mxu1  ;;  %v5081_v9 = vld [vmem:[%s7762_s5 + $0x28] sm:$0xff] }
0x15f7   :  { %v7062_v17 = vadd.f32 %v6961_v41, %v2229_v11  ;;  %v5082_v11 = vld [vmem:[%s7762_s5 + $0x30] sm:$0xff] }
0x15f9   :  { %v2248_v22 = vsel %vm170_vm10, %v7062_v17, 0.0 }
0x15fa   :  { %2249 = vadd.xlane.f32.xlu0 %v2248_v22  ;;  %v5083_v22 = vld [vmem:[%s7762_s5 + $0x38] sm:$0xff] }
0x163d   :  { %v2406_v23 = vpop.f32.mrb[26].mxu0 }
0x163e   :  { %v2407_v25 = vadd.f32 %v7069_v7, %v2406_v23  ;;  %v5567_v59 = vpop.f32.mrb[27].mxu0  ;;  %v5920_v23 = vpack.c.bf16 %v5083_v22, %v5082_v11  ;;  %v5085_v11 = vld [vmem:[%s7765_s6 + $0x1] ss:$0 sm:$0xff]  ;;  %s7811_s6 = smov 112  }
0x1640   :  { %v2420_v53 = vmax.f32 %v2407_v25, 0.0 }
0x1642   :  { %5591 = vmatmul.mubr.msk.f32.vlgmr.msra.gmra.mrb[24].mxu1 %vm2431_vm6, %v2420_v53 }
0x1643   :  { %5593 = vmatprep.mubr.msk.f32.mxu1 %vm6416_vm0, %v6417_v3 }
0x1687   :  { %v2250_v16 = vpop.xlane.xlu0 %2249 }
0x1688   :  { %v2253_v41 = vmul.f32 0.03125, %v2250_v16 }
0x168a   :  { %v2256_v27 = vsub.f32 %v7062_v17, %v2253_v41 }
0x168c   :  { %v2259_v51 = vmul.f32 %v2256_v27, %v2256_v27 }
0x168e   :  { %v2266_v54 = vsel %vm170_vm10, %v2259_v51, 0.0 }
0x168f   :  { %2267 = vadd.xlane.f32.xlu0 %v2266_v54 }
0x169d   :  { %v2411_v12 = vpop.f32.mrb[28].mxu0 }
0x169e   :  { %v2412_v29 = vadd.f32 %v7069_v7, %v2411_v12  ;;  %v5570_v30 = vpop.f32.mrb[29].mxu0 }
0x16a0   :  { %v2421_v33 = vmax.f32 %v2412_v29, 0.0 }
0x16a2   :  { %5594 = vmatmul.mubr.msk.f32.gmra.mrb[26].mxu1 %vm2431_vm6, %v2421_v33 }
0x16a3   :  { %5596 = vmatprep.mubr.msk.f32.mxu1 %vm6416_vm0, %v6417_v3 }
0x1715   :  { %v2507_v1 = vpop.f32.mrb[24].mxu1 }
0x1716   :  { %v2521_v42 = vadd.f32 %v2507_v1, %v6965_v45  ;;  %v5592_v44 = vpop.f32.mrb[25].mxu1  ;;  %v2307_v45 = vmul.f32 %v7015_v28, %v2256_v27 }
0x1718   :  { %v7088_v49 = vadd.f32 %v7084_v39, %v2521_v42 }
0x171a   :  { %v2538_v50 = vsel %vm163_vm3, %v7088_v49, 0.0 }
0x171b   :  { %2539 = vadd.xlane.f32.xlu0 %v2538_v50 }
0x171c   :  { %v2268_v55 = vpop.xlane.xlu0 %2267 }
0x171d   :  { %v2271_v10 = vmul.f32 0.032258064, %v2268_v55 }
0x171f   :  { %6311 = vrsqrt.f32 %v2271_v10  ;;  %vm2288_vm2 = vcmp.eq.f32.partialorder %v2271_v10, inf  ;;  %v2291_v40 = vand.u32 2147483648, %v2271_v10  ;;  %vm2290_vm1 = vcmp.eq.f32.partialorder %v2271_v10, 0.0 }
0x1729   :  { %v6312_v56 = vpop.eup %6311 }
0x172a   :  { %v2287_v57 = vmul.f32 %v6312_v56, %v2271_v10 }
0x172c   :  { %v2289_v61 = vsel %vm2288_vm2, %v2271_v10, %v2287_v57  ;;  %v7131_v57 = vld [vmem:[%s7764_s4 + $0x1] ss:$0 sm:$0xff] }
0x172d   :  { %v2292_v62 = vsel %vm2290_vm1, %v2291_v40, %v2289_v61 }
0x172e   :  { %v2295_v36 = vadd.f32 1e-06, %v2292_v62 }
0x1730   :  { %6313 = vrcp.f32 %v2295_v36 }
0x173a   :  { %v6314_v63 = vpop.eup %6313 }
0x173b   :  { %v2310_v2 = vmul.f32 %v6314_v63, %v2307_v45 }
0x173d   :  { %v2319_v15 = vadd.f32 %v7021_v8, %v2310_v2 }
0x173f   :  { %5572 = vmatmul.mubr.msk.f32.gmra.mrb[30].mxu0 %vm163_vm3, %v2319_v15 }
0x1740   :  { %5607 = vmatprep.mubr.msk.f32.mxu0 %vm6416_vm0, %v6417_v3 }
0x1775   :  { %v2512_v21 = vpop.f32.mrb[26].mxu1 }
0x1776   :  { %v2522_v52 = vadd.f32 %v2512_v21, %v6978_v60  ;;  %v5595_v4 = vpop.f32.mrb[27].mxu1  ;;  %v5080_v60 = vld [vmem:[%s7762_s5 + $0x20] sm:$0xff]  ;;  %s7815_s5 = smov 72  }
0x1777   :  { %v5917_v14 = vpack.c.bf16 %v5081_v9, %v5080_v60 }
0x1778   :  { %v7099_v5 = vadd.f32 %v7084_v39, %v2522_v52 }
0x1779   :  { %5918 = vmatpush3.bf16.msra.mxu0 %v5917_v14 }
0x177a   :  { %v2541_v58 = vsel %vm163_vm3, %v7099_v5, 0.0  ;;  %5919 = vmatprep.subr.bf16.mxu0 %v6415_v0 }
0x177b   :  { %2542 = vadd.xlane.f32.xlu1 %v2541_v58 }
0x177d   :  { %5921 = vmatpush3.bf16.msra.mxu0 %v5920_v23 }
0x17a8   :  { %v2540_v28 = vpop.xlane.xlu0 %2539 }
0x17a9   :  { %v2547_v34 = vmul.f32 0.03125, %v2540_v28 }
0x17ab   :  { %v2550_v8 = vsub.f32 %v7088_v49, %v2547_v34 }
0x17ad   :  { %v2553_v20 = vmul.f32 %v2550_v8, %v2550_v8 }
0x17af   :  { %v2556_v6 = vsel %vm163_vm3, %v2553_v20, 0.0 }
0x17b0   :  { %2557 = vadd.xlane.f32.xlu0 %v2556_v6 }
0x1808   :  { %v2543_v25 = vpop.xlane.xlu1 %2542 }
0x1809   :  { %v2548_v59 = vmul.f32 0.03125, %v2543_v25 }
0x180b   :  { %v2551_v53 = vsub.f32 %v7099_v5, %v2548_v59 }
0x180d   :  { %v2554_v16 = vmul.f32 %v2551_v53, %v2551_v53 }
0x180f   :  { %v2559_v41 = vsel %vm163_vm3, %v2554_v16, 0.0 }
0x1810   :  { %2560 = vadd.xlane.f32.xlu1 %v2559_v41 }
0x1812   :  { %v2416_v27 = vpop.f32.mrb[30].mxu0 }
0x1813   :  { %v2417_v51 = vadd.f32 %v7069_v7, %v2416_v27  ;;  %v5573_v54 = vpop.f32.mrb[31].mxu0  ;;  %v7125_v7 = vld [vmem:[%s7763_s3 + $0x1] ss:$0 sm:$0xff] }
0x1814   :  { %v2601_v10 = vmul.f32 %v7125_v7, %v2550_v8  ;;  %v2602_v4 = vmul.f32 %v7125_v7, %v2551_v53 }
0x1815   :  { %v2422_v12 = vmax.f32 %v2417_v51, 0.0 }
0x1817   :  { %5597 = vmatmul.mubr.msk.f32.gmra.mrb[28].mxu1 %vm2431_vm6, %v2422_v12 }
0x183d   :  { %v2558_v29 = vpop.xlane.xlu0 %2557 }
0x183e   :  { %v2565_v30 = vmul.f32 0.032258064, %v2558_v29 }
0x1840   :  { %6315 = vrsqrt.f32 %v2565_v30  ;;  %vm2570_vm1 = vcmp.eq.f32.partialorder %v2565_v30, inf  ;;  %v2573_v42 = vand.u32 2147483648, %v2565_v30  ;;  %vm2572_vm2 = vcmp.eq.f32.partialorder %v2565_v30, 0.0 }
0x184a   :  { %v6316_v33 = vpop.eup %6315 }
0x184b   :  { %v2569_v1 = vmul.f32 %v6316_v33, %v2565_v30 }
0x184d   :  { %v2571_v44 = vsel %vm2570_vm1, %v2565_v30, %v2569_v1 }
0x184e   :  { %v2574_v50 = vsel %vm2572_vm2, %v2573_v42, %v2571_v44 }
0x184f   :  { %v2589_v55 = vadd.f32 1e-06, %v2574_v50 }
0x1851   :  { %6317 = vrcp.f32 %v2589_v55 }
0x185b   :  { %v6318_v56 = vpop.eup %6317 }
0x185c   :  { %v2604_v40 = vmul.f32 %v6318_v56, %v2601_v10 }
0x185e   :  { %v2613_v61 = vadd.f32 %v7131_v57, %v2604_v40 }
0x1860   :  { %5608 = vmatmul.mubr.msk.f32.vlgmr.msra.gmra.mrb[32].mxu0 %vm163_vm3, %v2613_v61 }
0x1861   :  { %5610 = vmatprep.mubr.msk.f32.mxu0 %vm6416_vm0, %v6417_v3 }
0x189d   :  { %v2561_v62 = vpop.xlane.xlu1 %2560 }
0x189e   :  { %v2566_v36 = vmul.f32 0.032258064, %v2561_v62 }
0x18a0   :  { %6319 = vrsqrt.f32 %v2566_v36  ;;  %vm2577_vm1 = vcmp.eq.f32.partialorder %v2566_v36, inf  ;;  %v2580_v2 = vand.u32 2147483648, %v2566_v36  ;;  %vm2579_vm2 = vcmp.eq.f32.partialorder %v2566_v36, 0.0 }
0x18aa   :  { %v6320_v45 = vpop.eup %6319 }
0x18ab   :  { %v2576_v63 = vmul.f32 %v6320_v45, %v2566_v36 }
0x18ad   :  { %v2578_v15 = vsel %vm2577_vm1, %v2566_v36, %v2576_v63 }
0x18ae   :  { %v2581_v21 = vsel %vm2579_vm2, %v2580_v2, %v2578_v15 }
0x18af   :  { %v2590_v52 = vadd.f32 1e-06, %v2581_v21 }
0x18b1   :  { %6321 = vrcp.f32 %v2590_v52 }
0x18bb   :  { %v6322_v58 = vpop.eup %6321 }
0x18bc   :  { %v2605_v28 = vmul.f32 %v6322_v58, %v2602_v4 }
0x18be   :  { %v2614_v34 = vadd.f32 %v7131_v57, %v2605_v28 }
0x18c0   :  { %5611 = vmatmul.mubr.msk.f32.gmra.mrb[34].mxu0 %vm163_vm3, %v2614_v34 }
0x18c1   :  { %5613 = vmatprep.mubr.msk.f32.mxu0 %vm6416_vm0, %v6417_v3 }
0x18ea   :  { %v2517_v8 = vpop.f32.mrb[28].mxu1 }
0x18eb   :  { %v2523_v20 = vadd.f32 %v2517_v8, %v7062_v17  ;;  %v5598_v6 = vpop.f32.mrb[29].mxu1 }
0x18ed   :  { %v7144_v60 = vadd.f32 %v7084_v39, %v2523_v20 }
0x18ef   :  { %v2544_v9 = vsel %vm170_vm10, %v7144_v60, 0.0 }
0x18f0   :  { %2545 = vadd.xlane.f32.xlu0 %v2544_v9 }
0x1933   :  { %v2704_v14 = vpop.f32.mrb[32].mxu0 }
0x1934   :  { %v2705_v22 = vadd.f32 %v5085_v11, %v2704_v14  ;;  %v5609_v23 = vpop.f32.mrb[33].mxu0 }
0x1936   :  { %2718 = vst.msk [vmem:[#allocation2] sm:$0xff] %vm344_vm8, %v2705_v22 }
0x193d   :  { %v7155_v51 = vld [vmem:[#allocation2] sm:$0xff] }
0x197d   :  { %v2546_v25 = vpop.xlane.xlu0 %2545 }
0x197e   :  { %v2549_v59 = vmul.f32 0.03125, %v2546_v25 }
0x1980   :  { %v2552_v17 = vsub.f32 %v7144_v60, %v2549_v59 }
0x1982   :  { %v2555_v53 = vmul.f32 %v2552_v17, %v2552_v17  ;;  %v2603_v21 = vmul.f32 %v7125_v7, %v2552_v17 }
0x1984   :  { %v2562_v39 = vsel %vm170_vm10, %v2555_v53, 0.0 }
0x1985   :  { %2563 = vadd.xlane.f32.xlu1 %v2562_v39 }
0x1993   :  { %v2709_v16 = vpop.f32.mrb[34].mxu0 }
0x1994   :  { %v2710_v41 = vadd.f32 %v5085_v11, %v2709_v16  ;;  %v5612_v27 = vpop.f32.mrb[35].mxu0 }
0x1996   :  { %2719 = vst.msk [vmem:[#allocation2 + $0x8] sm:$0xff] %vm344_vm8, %v2710_v41 }
0x199d   :  { %v2722_v54 = vld [vmem:[#allocation2 + $0x8] sm:$0x1] }
0x199e   :  { %v2930_v12 = vld [vmem:[#allocation2 + $0x8] sm:$0x1]  ;;  %v7158_v29 = vpack.i.bf16 %v2722_v54, %v7155_v51 }
0x199f   :  { %v7161_v30 = vpack.i.bf16 %v2930_v12, %v7155_v51 }
0x19a0   :  { %6148 = vrot.lane.b32.xlu0 %v7158_v29, %s6419_s19 }
0x19a1   :  { %6153 = vrot.lane.b32.xlu1 %v7161_v30, %s6418_s1 }
0x19a5   :  { %2933 = vrot.lane.b32.xlu1 %v7155_v51, %s6420_s0 }
0x19a9   :  { %2935 = vrot.lane.b32.xlu1 %v2930_v12, %s6420_s0 }
0x1a12   :  { %v2564_v33 = vpop.xlane.xlu1 %2563  ;;  %v6149_v1 = vpop.permute.xlu0 %6148 }
0x1a13   :  { %v2567_v42 = vmul.f32 0.032258064, %v2564_v33  ;;  %v6151_v44 = vunpack.i.h.bf16 %v6149_v1  ;;  %v6150_v50 = vunpack.i.l.bf16 %v6149_v1 }
0x1a15   :  { %6323 = vrsqrt.f32 %v2567_v42  ;;  %v5922_v55 = vpack.c.bf16 %v6151_v44, %v6150_v50  ;;  %vm2584_vm8 = vcmp.eq.f32.partialorder %v2567_v42, inf  ;;  %v2587_v45 = vand.u32 2147483648, %v2567_v42 }
0x1a16   :  { %v6154_v10 = vpop.permute.xlu1 %6153  ;;  %vm2586_vm1 = vcmp.eq.f32.partialorder %v2567_v42, 0.0 }
0x1a17   :  { %v6156_v56 = vunpack.i.h.bf16 %v6154_v10  ;;  %v6155_v40 = vunpack.i.l.bf16 %v6154_v10  ;;  %5924 = vmatprep.subr.msk.bf16.mxu0 %vm6651_vm11, %v5922_v55 }
0x1a18   :  { %5927 = vmatpush3.bf16.xpose.msk.msra.mxu0 %vm6651_vm11, %v5922_v55 }
0x1a19   :  { %v5934_v61 = vpack.c.bf16 %v6156_v56, %v6155_v40 }
0x1a1a   :  { %v2934_v28 = vpop.permute.xlu1 %2933 }
0x1a1b   :  { %5936 = vmatprep.subr.msk.bf16.mxu0 %vm6651_vm11, %v5934_v61 }
0x1a1e   :  { %v2936_v34 = vpop.permute.xlu1 %2935 }
0x1a1f   :  { %v6324_v62 = vpop.eup %6323 }
0x1a20   :  { %v2583_v36 = vmul.f32 %v6324_v62, %v2567_v42 }
0x1a22   :  { %v2585_v63 = vsel %vm2584_vm8, %v2567_v42, %v2583_v36 }
0x1a23   :  { %v2588_v2 = vsel %vm2586_vm1, %v2587_v45, %v2585_v63 }
0x1a24   :  { %v2591_v15 = vadd.f32 1e-06, %v2588_v2 }
0x1a26   :  { %6325 = vrcp.f32 %v2591_v15  ;;  %v3155_v15 = vld [vmem:[#allocation2 + $0x8] sm:$0x1] }
0x1a30   :  { %v6326_v52 = vpop.eup %6325 }
0x1a31   :  { %v2606_v4 = vmul.f32 %v6326_v52, %v2603_v21  ;;  %v6167_v21 = vpack.i.bf16 %v3155_v15, %v7155_v51 }
0x1a33   :  { %v2615_v58 = vadd.f32 %v7131_v57, %v2606_v4 }
0x1a35   :  { %5614 = vmatmul.mubr.msk.f32.gmra.mrb[36].mxu0 %vm163_vm3, %v2615_v58 }
0x1a36   :  { %5620 = vmatprep.mubr.msk.f32.mxu0 %vm357_vm9, %v7155_v51 }
0x1a39   :  { %5621 = vmatmul.mubr.msk.f32.vlgmr.msra.gmra.mrb[38].mxu0 %vm357_vm9, %v2722_v54 }
0x1a3a   :  { %5939 = vmatpush3.bf16.xpose.msk.msra.mxu0 %vm6651_vm11, %v5934_v61  ;;  %5634 = vmatprep.mubr.msk.f32.mxu0 %vm357_vm9, %v2934_v28 }
0x1a41   :  { %5635 = vmatmul.mubr.msk.f32.vlgmr.msra.gmra.mrb[40].mxu0 %vm357_vm9, %v2936_v34 }
0x1b08   :  { %v2714_v7 = vpop.f32.mrb[36].mxu0 }
0x1b09   :  { %v2715_v8 = vadd.f32 %v5085_v11, %v2714_v7  ;;  %v5615_v20 = vpop.f32.mrb[37].mxu0 }
0x1b0b   :  { %2720 = vst.msk [vmem:[#allocation2 + $0x10] sm:$0x3] %vm347_vm5, %v2715_v8  ;;  %vm7812_vm5 = vcmask 57344  }
0x1b0c   :  { %v5622_v57 = vpop.f32.mrb[38].mxu0  ;;  %vm7817_vm2 = vmmov %vm7812_vm5 }
0x1b0d   :  { %v2813_v6 = vmul.f32 0.35355338, %v5622_v57  ;;  %v2803_v9 = vpop.f32.mrb[39].mxu0 }
0x1b0e   :  { %v2812_v14 = vmul.f32 0.35355338, %v2803_v9 }
0x1b0f   :  { %v2817_v22 = vsel %vm447_vm12, %v2813_v6, -inf }
0x1b10   :  { %2818 = vmax.xlane.f32.xlu1 %v2817_v22  ;;  %v2814_v23 = vsel %vm443_vm13, %v2812_v14, -inf }
0x1b11   :  { %2815 = vmax.xlane.f32.xlu0 %v2814_v23 }
0x1b14   :  { %v5636_v25 = vpop.f32.mrb[40].mxu0 }
0x1b15   :  { %v3015_v59 = vpop.f32.mrb[41].mxu0  ;;  %v3025_v53 = vmul.f32 0.35355338, %v5636_v25 }
0x1b16   :  { %v3024_v17 = vmul.f32 0.35355338, %v3015_v59 }
0x1b17   :  { %v3029_v11 = vsel %vm447_vm12, %v3025_v53, -inf }
0x1b18   :  { %v3026_v39 = vsel %vm443_vm13, %v3024_v17, -inf }
0x1b19   :  { %3027 = vmax.xlane.f32.xlu0 %v3026_v39 }
0x1b1d   :  { %3030 = vmax.xlane.f32.xlu0 %v3029_v11 }
0x1b9d   :  { %v2819_v16 = vpop.xlane.xlu1 %2818 }
0x1b9e   :  { %v2821_v41 = vsub.f32 %v2813_v6, %v2819_v16  ;;  %v2816_v27 = vpop.xlane.xlu0 %2815 }
0x1b9f   :  { %v2820_v54 = vsub.f32 %v2812_v14, %v2816_v27 }
0x1ba0   :  { %v2824_v12 = vmul.f32 1.442695, %v2821_v41 }
0x1ba1   :  { %v2822_v33 = vmul.f32 1.442695, %v2820_v54 }
0x1ba2   :  { %6327 = vpow2.f32 %v2824_v12 }
0x1ba3   :  { %6329 = vpow2.f32 %v2822_v33 }
0x1ba6   :  { %v3028_v1 = vpop.xlane.xlu0 %3027 }
0x1ba7   :  { %v3032_v42 = vsub.f32 %v3024_v17, %v3028_v1 }
0x1ba9   :  { %v3034_v44 = vmul.f32 1.442695, %v3032_v42 }
0x1baa   :  { %v3031_v50 = vpop.xlane.xlu0 %3030 }
0x1bab   :  { %6331 = vpow2.f32 %v3034_v44  ;;  %v3033_v55 = vsub.f32 %v3025_v53, %v3031_v50 }
0x1bac   :  { %v6328_v10 = vpop.eup %6327 }
0x1bad   :  { %v6330_v56 = vpop.eup %6329  ;;  %v3036_v40 = vmul.f32 1.442695, %v3033_v55  ;;  %v2829_v61 = vsel %vm447_vm12, %v6328_v10, 0.0 }
0x1bae   :  { %2830 = vadd.xlane.f32.xlu1 %v2829_v61  ;;  %v2826_v62 = vsel %vm443_vm13, %v6330_v56, 0.0  ;;  %v3380_v61 = vld [vmem:[#allocation2 + $0x8] sm:$0x1] }
0x1baf   :  { %6333 = vpow2.f32 %v3036_v40  ;;  %2827 = vadd.xlane.f32.xlu0 %v2826_v62 }
0x1bb5   :  { %v6332_v36 = vpop.eup %6331 }
0x1bb6   :  { %v3038_v45 = vsel %vm443_vm13, %v6332_v36, 0.0 }
0x1bb7   :  { %3039 = vadd.xlane.f32.xlu0 %v3038_v45 }
0x1bb9   :  { %v6334_v63 = vpop.eup %6333 }
0x1bba   :  { %v3041_v2 = vsel %vm447_vm12, %v6334_v63, 0.0 }
0x1bbb   :  { %3042 = vadd.xlane.f32.xlu1 %v3041_v2 }
0x1bcc   :  { %6163 = vrot.lane.b32.xlu1 %v7161_v30, %s6421_s26 }
0x1bcd   :  { %6158 = vrot.lane.b32.xlu0 %v7158_v29, %s6422_s2 }
0x1bd0   :  { %6168 = vrot.lane.b32.xlu1 %v6167_v21, %s6423_s23 }
0x1bd1   :  { %3160 = vrot.lane.b32.xlu0 %v3155_v15, %s7811_s6 }
0x1bd4   :  { %3158 = vrot.lane.b32.xlu1 %v7155_v51, %s7811_s6 }
0x1c3b   :  { %v2831_v52 = vpop.xlane.xlu1 %2830 }
0x1c3c   :  { %6335 = vrcp.f32 %v2831_v52  ;;  %v2828_v4 = vpop.xlane.xlu0 %2827 }
0x1c3d   :  { %6337 = vrcp.f32 %v2828_v4 }
0x1c44   :  { %v3040_v58 = vpop.xlane.xlu0 %3039 }
0x1c45   :  { %6339 = vrcp.f32 %v3040_v58 }
0x1c46   :  { %v6336_v28 = vpop.eup %6335 }
0x1c47   :  { %v6338_v30 = vpop.eup %6337  ;;  %v2835_v34 = vmul.f32 %v6336_v28, %v6328_v10 }
0x1c48   :  { %v3043_v7 = vpop.xlane.xlu1 %3042  ;;  %v6159_v29 = vpop.permute.xlu0 %6158  ;;  %v2834_v8 = vmul.f32 %v6338_v30, %v6330_v56 }
0x1c49   :  { %6341 = vrcp.f32 %v3043_v7  ;;  %v6161_v20 = vunpack.i.h.bf16 %v6159_v29  ;;  %v6160_v57 = vunpack.i.l.bf16 %v6159_v29  ;;  %5094 = vst.msk [vmem:[%s7766_s18 + $0x28] sm:$0x1] %vm447_vm12, %v2835_v34  ;;  %v6182_v29 = vpack.i.bf16 %v3380_v61, %v7155_v51 }
0x1c4a   :  { %5627 = vmatprep.mubr.msk.f32.mxu1 %vm443_vm13, %v2834_v8  ;;  %5093 = vst.msk [vmem:[%s7766_s18 + $0x20] sm:$0xff] %vm443_vm13, %v2834_v8 }
0x1c4b   :  { %v5928_v6 = vpack.c.bf16 %v6161_v20, %v6160_v57 }
0x1c4c   :  { %v6164_v9 = vpop.permute.xlu1 %6163  ;;  %v3161_v54 = vpop.permute.xlu0 %3160 }
0x1c4d   :  { %v6166_v14 = vunpack.i.h.bf16 %v6164_v9  ;;  %v6165_v22 = vunpack.i.l.bf16 %v6164_v9  ;;  %5930 = vmatprep.subr.msk.bf16.mxu1 %vm6696_vm4, %v5928_v6 }
0x1c4e   :  { %5933 = vmatpush3.bf16.msk.msra.mxu1 %vm6696_vm4, %v5928_v6 }
0x1c4f   :  { %v6340_v23 = vpop.eup %6339  ;;  %v5940_v25 = vpack.c.bf16 %v6166_v14, %v6165_v22 }
0x1c50   :  { %v6169_v59 = vpop.permute.xlu1 %6168  ;;  %v7217_v17 = vmul.f32 %v6340_v23, %v6332_v36 }
0x1c51   :  { %v6171_v53 = vunpack.i.h.bf16 %v6169_v59  ;;  %v6170_v39 = vunpack.i.l.bf16 %v6169_v59  ;;  %5628 = vmatmul.mubr.msk.f32.vlgmr.msra.gmra.mrb[30].mxu1 %vm443_vm13, %v2835_v34  ;;  %5942 = vmatprep.subr.msk.bf16.mxu1 %vm6696_vm4, %v5940_v25 }
0x1c52   :  { %5945 = vmatpush3.bf16.msk.msra.mxu1 %vm6696_vm4, %v5940_v25  ;;  %5641 = vmatprep.mubr.msk.f32.mxu1 %vm443_vm13, %v7217_v17 }
0x1c53   :  { %v6342_v11 = vpop.eup %6341  ;;  %v5946_v16 = vpack.c.bf16 %v6171_v53, %v6170_v39 }
0x1c54   :  { %v7226_v41 = vmul.f32 %v6342_v11, %v6334_v63  ;;  %v3159_v27 = vpop.permute.xlu1 %3158 }
0x1c55   :  { %5948 = vmatprep.subr.msk.bf16.mxu1 %vm6651_vm11, %v5946_v16 }
0x1c56   :  { %5642 = vmatmul.mubr.msk.f32.vlgmr.msra.gmra.mrb[32].mxu1 %vm443_vm13, %v7226_v41 }
0x1c57   :  { %5648 = vmatprep.mubr.msk.f32.mxu1 %vm357_vm9, %v3159_v27 }
0x1c5b   :  { %5951 = vmatpush3.bf16.xpose.msk.msra.mxu1 %vm6651_vm11, %v5946_v16 }
0x1c62   :  { %5649 = vmatmul.mubr.msk.f32.vlgmr.msra.gmra.mrb[34].mxu1 %vm357_vm9, %v3161_v54 }
0x1d24   :  { %v5629_v12 = vpop.f32.mrb[30].mxu1 }
0x1d25   :  { %2928 = vst.msk [vmem:[#allocation3 + $0x8] sm:$0x1] %vm7812_vm5, %v5629_v12  ;;  %v2918_v33 = vpop.f32.mrb[31].mxu1 }
0x1d26   :  { %2927 = vst.msk [vmem:[#allocation3] sm:$0xff] %vm357_vm9, %v2918_v33 }
0x1d29   :  { %v7238_v1 = vpop.f32.mrb[32].mxu1 }
0x1d2a   :  { %v7240_v42 = vpop.f32.mrb[33].mxu1 }
0x1d35   :  { %v5650_v44 = vpop.f32.mrb[34].mxu1 }
0x1d36   :  { %v3250_v50 = vmul.f32 0.35355338, %v5650_v44  ;;  %v3240_v55 = vpop.f32.mrb[35].mxu1 }
0x1d37   :  { %v3249_v10 = vmul.f32 0.35355338, %v3240_v55 }
0x1d38   :  { %v3254_v56 = vsel %vm447_vm12, %v3250_v50, -inf }
0x1d39   :  { %3255 = vmax.xlane.f32.xlu0 %v3254_v56  ;;  %v3251_v40 = vsel %vm443_vm13, %v3249_v10, -inf }
0x1d3a   :  { %3252 = vmax.xlane.f32.xlu1 %v3251_v40 }
0x1d4b   :  { %6173 = vrot.lane.b32.xlu1 %v6167_v21, %s7813_s20 }
0x1d4f   :  { %3383 = vrot.lane.b32.xlu1 %v7155_v51, %s7814_s21 }
0x1d53   :  { %3385 = vrot.lane.b32.xlu1 %v3380_v61, %s7814_s21 }
0x1dc6   :  { %v3256_v62 = vpop.xlane.xlu0 %3255 }
0x1dc7   :  { %v3258_v36 = vsub.f32 %v3250_v50, %v3256_v62  ;;  %v3253_v45 = vpop.xlane.xlu1 %3252 }
0x1dc8   :  { %v3257_v63 = vsub.f32 %v3249_v10, %v3253_v45 }
0x1dc9   :  { %v3261_v2 = vmul.f32 1.442695, %v3258_v36 }
0x1dca   :  { %v3259_v15 = vmul.f32 1.442695, %v3257_v63 }
0x1dcb   :  { %6343 = vpow2.f32 %v3261_v2  ;;  %v6174_v52 = vpop.permute.xlu1 %6173 }
0x1dcc   :  { %v6176_v4 = vunpack.i.h.bf16 %v6174_v52  ;;  %v6175_v58 = vunpack.i.l.bf16 %v6174_v52  ;;  %6345 = vpow2.f32 %v3259_v15 }
0x1dce   :  { %v5952_v28 = vpack.c.bf16 %v6176_v4, %v6175_v58  ;;  %v7283_v58 = vld [vmem:[#allocation2 + $0x9] sm:$0xff] }
0x1dcf   :  { %v3384_v51 = vpop.permute.xlu1 %3383 }
0x1dd0   :  { %5954 = vmatprep.subr.msk.bf16.mxu0 %vm6696_vm4, %v5952_v28 }
0x1dd1   :  { %5957 = vmatpush3.bf16.msk.msra.mxu0 %vm6696_vm4, %v5952_v28  ;;  %v3605_v28 = vld [vmem:[#allocation2 + $0x11] sm:$0x1] }
0x1dd3   :  { %v3386_v53 = vpop.permute.xlu1 %3385 }
0x1dd5   :  { %v6344_v21 = vpop.eup %6343 }
0x1dd6   :  { %v3266_v30 = vsel %vm447_vm12, %v6344_v21, 0.0  ;;  %v6346_v34 = vpop.eup %6345 }
0x1dd7   :  { %3267 = vadd.xlane.f32.xlu0 %v3266_v30  ;;  %v3263_v7 = vsel %vm443_vm13, %v6346_v34, 0.0 }
0x1ddb   :  { %3264 = vadd.xlane.f32.xlu0 %v3263_v7 }
0x1df1   :  { %6178 = vrot.lane.b32.xlu0 %v6182_v29, %s7815_s5 }
0x1e64   :  { %v3268_v8 = vpop.xlane.xlu0 %3267 }
0x1e65   :  { %6347 = vrcp.f32 %v3268_v8 }
0x1e68   :  { %v3265_v20 = vpop.xlane.xlu0 %3264 }
0x1e69   :  { %6349 = vrcp.f32 %v3265_v20 }
0x1e6c   :  { %v6179_v57 = vpop.permute.xlu0 %6178 }
0x1e6d   :  { %v6181_v6 = vunpack.i.h.bf16 %v6179_v57  ;;  %v6180_v9 = vunpack.i.l.bf16 %v6179_v57 }
0x1e6f   :  { %v5958_v14 = vpack.c.bf16 %v6181_v6, %v6180_v9  ;;  %v6348_v22 = vpop.eup %6347 }
0x1e70   :  { %v7260_v59 = vmul.f32 %v6348_v22, %v6344_v21  ;;  %v6187_v21 = vpack.i.bf16 %v3605_v28, %v7283_v58 }
0x1e71   :  { %5960 = vmatprep.subr.msk.bf16.mxu0 %vm6651_vm11, %v5958_v14 }
0x1e73   :  { %v6350_v23 = vpop.eup %6349 }
0x1e74   :  { %v7258_v25 = vmul.f32 %v6350_v23, %v6346_v34 }
0x1e76   :  { %5655 = vmatprep.mubr.msk.f32.mxu0 %vm443_vm13, %v7258_v25 }
0x1e77   :  { %5656 = vmatmul.mubr.msk.f32.vlgmr.msra.gmra.mrb[42].mxu0 %vm443_vm13, %v7260_v59 }
0x1e78   :  { %5963 = vmatpush3.bf16.xpose.msk.msra.mxu0 %vm6651_vm11, %v5958_v14  ;;  %5662 = vmatprep.mubr.msk.f32.mxu0 %vm357_vm9, %v3384_v51 }
0x1e7f   :  { %5663 = vmatmul.mubr.msk.f32.vlgmr.msra.gmra.mrb[44].mxu0 %vm357_vm9, %v3386_v53 }
0x1f4a   :  { %v7270_v39 = vpop.f32.mrb[42].mxu0 }
0x1f4b   :  { %v7272_v11 = vpop.f32.mrb[43].mxu0 }
0x1f52   :  { %v5664_v16 = vpop.f32.mrb[44].mxu0 }
0x1f53   :  { %v3475_v27 = vmul.f32 0.35355338, %v5664_v16  ;;  %v3465_v54 = vpop.f32.mrb[45].mxu0 }
0x1f54   :  { %v3474_v12 = vmul.f32 0.35355338, %v3465_v54 }
0x1f55   :  { %v3479_v33 = vsel %vm447_vm12, %v3475_v27, -inf }
0x1f56   :  { %3480 = vmax.xlane.f32.xlu0 %v3479_v33  ;;  %v3476_v44 = vsel %vm443_vm13, %v3474_v12, -inf }
0x1f57   :  { %3477 = vmax.xlane.f32.xlu1 %v3476_v44 }
0x1f68   :  { %6183 = vrot.lane.b32.xlu1 %v6182_v29, %s7816_s28 }
0x1fe3   :  { %v3481_v50 = vpop.xlane.xlu0 %3480 }
0x1fe4   :  { %v3483_v55 = vsub.f32 %v3475_v27, %v3481_v50  ;;  %v3478_v10 = vpop.xlane.xlu1 %3477 }
0x1fe5   :  { %v3482_v56 = vsub.f32 %v3474_v12, %v3478_v10 }
0x1fe6   :  { %v3486_v40 = vmul.f32 1.442695, %v3483_v55 }
0x1fe7   :  { %v3484_v61 = vmul.f32 1.442695, %v3482_v56 }
0x1fe8   :  { %6351 = vpow2.f32 %v3486_v40  ;;  %v6184_v62 = vpop.permute.xlu1 %6183 }
0x1fe9   :  { %v6186_v36 = vunpack.i.h.bf16 %v6184_v62  ;;  %v6185_v45 = vunpack.i.l.bf16 %v6184_v62  ;;  %6353 = vpow2.f32 %v3484_v61 }
0x1feb   :  { %v5964_v63 = vpack.c.bf16 %v6186_v36, %v6185_v45 }
0x1fed   :  { %5966 = vmatprep.subr.msk.bf16.mxu1 %vm6696_vm4, %v5964_v63 }
0x1fee   :  { %5969 = vmatpush3.bf16.msk.msra.mxu1 %vm6696_vm4, %v5964_v63 }
0x1ff2   :  { %v6352_v2 = vpop.eup %6351 }
0x1ff3   :  { %v3491_v15 = vsel %vm447_vm12, %v6352_v2, 0.0  ;;  %v6354_v52 = vpop.eup %6353 }
0x1ff4   :  { %3492 = vadd.xlane.f32.xlu0 %v3491_v15  ;;  %v3488_v4 = vsel %vm443_vm13, %v6354_v52, 0.0 }
0x1ff8   :  { %3489 = vadd.xlane.f32.xlu0 %v3488_v4 }
0x200e   :  { %6188 = vrot.lane.b32.xlu0 %v6187_v21, %s6419_s19 }
0x2081   :  { %v3493_v30 = vpop.xlane.xlu0 %3492 }
0x2082   :  { %6355 = vrcp.f32 %v3493_v30 }
0x2085   :  { %v3490_v34 = vpop.xlane.xlu0 %3489 }
0x2086   :  { %6357 = vrcp.f32 %v3490_v34 }
0x2089   :  { %v6189_v7 = vpop.permute.xlu0 %6188 }
0x208a   :  { %v6191_v29 = vunpack.i.h.bf16 %v6189_v7  ;;  %v6190_v8 = vunpack.i.l.bf16 %v6189_v7 }
0x208c   :  { %v5970_v20 = vpack.c.bf16 %v6191_v29, %v6190_v8  ;;  %v6356_v57 = vpop.eup %6355 }
0x208d   :  { %v7291_v14 = vmul.f32 %v6356_v57, %v6352_v2 }
0x208e   :  { %5972 = vmatprep.subr.msk.bf16.mxu1 %vm6651_vm11, %v5970_v20 }
0x2090   :  { %v6358_v6 = vpop.eup %6357 }
0x2091   :  { %v7289_v9 = vmul.f32 %v6358_v6, %v6354_v52  ;;  %v3813_v52 = vld [vmem:[#allocation2 + $0x11] sm:$0x1] }
0x2092   :  { %v6202_v4 = vpack.i.bf16 %v3813_v52, %v7283_v58 }
0x2093   :  { %5669 = vmatprep.mubr.msk.f32.mxu1 %vm443_vm13, %v7289_v9 }
0x2094   :  { %5670 = vmatmul.mubr.msk.f32.vlgmr.msra.gmra.mrb[36].mxu1 %vm443_vm13, %v7291_v14 }
0x2095   :  { %5975 = vmatpush3.bf16.xpose.msk.msra.mxu1 %vm6651_vm11, %v5970_v20  ;;  %5676 = vmatprep.mubr.msk.f32.mxu1 %vm357_vm9, %v7283_v58 }
0x209c   :  { %5677 = vmatmul.mubr.msk.f32.vlgmr.msra.gmra.mrb[38].mxu1 %vm357_vm9, %v3605_v28 }
0x2167   :  { %v7302_v22 = vpop.f32.mrb[36].mxu1 }
0x2168   :  { %v7304_v23 = vpop.f32.mrb[37].mxu1 }
0x216f   :  { %v5678_v51 = vpop.f32.mrb[38].mxu1 }
0x2170   :  { %v3696_v53 = vmul.f32 0.35355338, %v5678_v51  ;;  %v3686_v16 = vpop.f32.mrb[39].mxu1 }
0x2171   :  { %v3695_v27 = vmul.f32 0.35355338, %v3686_v16 }
0x2172   :  { %v3700_v54 = vsel %vm447_vm12, %v3696_v53, -inf }
0x2173   :  { %3701 = vmax.xlane.f32.xlu0 %v3700_v54  ;;  %v3697_v12 = vsel %vm443_vm13, %v3695_v27, -inf }
0x2174   :  { %3698 = vmax.xlane.f32.xlu1 %v3697_v12 }
0x2185   :  { %6193 = vrot.lane.b32.xlu1 %v6187_v21, %s6422_s2 }
0x2189   :  { %3816 = vrot.lane.b32.xlu1 %v7283_v58, %s6420_s0 }
0x2200   :  { %v3702_v33 = vpop.xlane.xlu0 %3701 }
0x2201   :  { %v3704_v44 = vsub.f32 %v3696_v53, %v3702_v33  ;;  %v3699_v50 = vpop.xlane.xlu1 %3698 }
0x2202   :  { %v3703_v55 = vsub.f32 %v3695_v27, %v3699_v50 }
0x2203   :  { %v3707_v10 = vmul.f32 1.442695, %v3704_v44 }
0x2204   :  { %v3705_v56 = vmul.f32 1.442695, %v3703_v55 }
0x2205   :  { %6359 = vpow2.f32 %v3707_v10  ;;  %v6194_v40 = vpop.permute.xlu1 %6193  ;;  %v4038_v10 = vld [vmem:[#allocation2 + $0x11] sm:$0x1] }
0x2206   :  { %6361 = vpow2.f32 %v3705_v56  ;;  %v6196_v61 = vunpack.i.h.bf16 %v6194_v40  ;;  %v6195_v62 = vunpack.i.l.bf16 %v6194_v40 }
0x2208   :  { %v5976_v36 = vpack.c.bf16 %v6196_v61, %v6195_v62 }
0x2209   :  { %v3817_v28 = vpop.permute.xlu1 %3816 }
0x220a   :  { %5978 = vmatprep.subr.msk.bf16.mxu0 %vm6696_vm4, %v5976_v36 }
0x220b   :  { %5981 = vmatpush3.bf16.msk.msra.mxu0 %vm6696_vm4, %v5976_v36 }
0x220f   :  { %v6360_v45 = vpop.eup %6359 }
0x2210   :  { %v6362_v63 = vpop.eup %6361  ;;  %v3712_v2 = vsel %vm447_vm12, %v6360_v45, 0.0 }
0x2211   :  { %3713 = vadd.xlane.f32.xlu0 %v3712_v2  ;;  %v3709_v15 = vsel %vm443_vm13, %v6362_v63, 0.0 }
0x2212   :  { %3710 = vadd.xlane.f32.xlu1 %v3709_v15 }
0x2223   :  { %3818 = vrot.lane.b32.xlu1 %v3813_v52, %s6420_s0 }
0x2227   :  { %6198 = vrot.lane.b32.xlu0 %v6202_v4, %s6418_s1  ;;  %s6434_s1 = smov 18  }
0x229e   :  { %v3714_v21 = vpop.xlane.xlu0 %3713 }
0x229f   :  { %6363 = vrcp.f32 %v3714_v21  ;;  %v3711_v30 = vpop.xlane.xlu1 %3710 }
0x22a0   :  { %6365 = vrcp.f32 %v3711_v30 }
0x22a2   :  { %v6199_v34 = vpop.permute.xlu0 %6198 }
0x22a3   :  { %v6201_v7 = vunpack.i.h.bf16 %v6199_v34  ;;  %v6200_v29 = vunpack.i.l.bf16 %v6199_v34  ;;  %v3819_v53 = vpop.permute.xlu1 %3818  ;;  %v6212_v34 = vpack.i.bf16 %v4038_v10, %v7283_v58 }
0x22a5   :  { %v5982_v8 = vpack.c.bf16 %v6201_v7, %v6200_v29 }
0x22a7   :  { %5984 = vmatprep.subr.msk.bf16.mxu0 %vm6651_vm11, %v5982_v8 }
0x22a9   :  { %v6364_v20 = vpop.eup %6363 }
0x22aa   :  { %v6366_v57 = vpop.eup %6365  ;;  %v3718_v6 = vmul.f32 %v6364_v20, %v6360_v45 }
0x22ab   :  { %v3717_v51 = vmul.f32 %v6366_v57, %v6362_v63 }
0x22ac   :  { %5130 = vst.msk [vmem:[%s7766_s18 + $0x38] sm:$0x1] %vm447_vm12, %v3718_v6 }
0x22ad   :  { %5683 = vmatprep.mubr.msk.f32.mxu0 %vm443_vm13, %v3717_v51  ;;  %5129 = vst.msk [vmem:[%s7766_s18 + $0x30] sm:$0xff] %vm443_vm13, %v3717_v51 }
0x22ae   :  { %5684 = vmatmul.mubr.msk.f32.vlgmr.msra.gmra.mrb[46].mxu0 %vm443_vm13, %v3718_v6 }
0x22af   :  { %5987 = vmatpush3.bf16.xpose.msk.msra.mxu0 %vm6651_vm11, %v5982_v8  ;;  %5690 = vmatprep.mubr.msk.f32.mxu0 %vm357_vm9, %v3817_v28 }
0x22b6   :  { %5691 = vmatmul.mubr.msk.f32.vlgmr.msra.gmra.mrb[48].mxu0 %vm357_vm9, %v3819_v53 }
0x2381   :  { %v5685_v16 = vpop.f32.mrb[46].mxu0 }
0x2382   :  { %3811 = vst.msk [vmem:[#allocation3 + $0x11] sm:$0x1] %vm7817_vm2, %v5685_v16  ;;  %v3801_v27 = vpop.f32.mrb[47].mxu0 }
0x2383   :  { %3810 = vst.msk [vmem:[#allocation3 + $0x9] sm:$0xff] %vm357_vm9, %v3801_v27 }
0x2389   :  { %v5692_v54 = vpop.f32.mrb[48].mxu0 }
0x238a   :  { %v3908_v12 = vmul.f32 0.35355338, %v5692_v54  ;;  %v3898_v33 = vpop.f32.mrb[49].mxu0 }
0x238b   :  { %v3907_v44 = vmul.f32 0.35355338, %v3898_v33 }
0x238c   :  { %v3912_v50 = vsel %vm447_vm12, %v3908_v12, -inf }
0x238d   :  { %3913 = vmax.xlane.f32.xlu0 %v3912_v50  ;;  %v3909_v55 = vsel %vm443_vm13, %v3907_v44, -inf }
0x238e   :  { %3910 = vmax.xlane.f32.xlu1 %v3909_v55 }
0x239f   :  { %6203 = vrot.lane.b32.xlu1 %v6202_v4, %s6421_s26  ;;  %s7818_s26 = smov 16  }
0x23a3   :  { %4041 = vrot.lane.b32.xlu1 %v7283_v58, %s7811_s6 }
0x23a7   :  { %4043 = vrot.lane.b32.xlu1 %v4038_v10, %s7811_s6 }
0x241a   :  { %v3914_v56 = vpop.xlane.xlu0 %3913 }
0x241b   :  { %v3916_v40 = vsub.f32 %v3908_v12, %v3914_v56  ;;  %v3911_v61 = vpop.xlane.xlu1 %3910 }
0x241c   :  { %v3915_v62 = vsub.f32 %v3907_v44, %v3911_v61 }
0x241d   :  { %v3919_v36 = vmul.f32 1.442695, %v3916_v40 }
0x241e   :  { %v3917_v45 = vmul.f32 1.442695, %v3915_v62  ;;  %v4263_v62 = vld [vmem:[#allocation2 + $0x11] sm:$0x1] }
0x241f   :  { %6367 = vpow2.f32 %v3919_v36  ;;  %v6204_v63 = vpop.permute.xlu1 %6203 }
0x2420   :  { %v6206_v2 = vunpack.i.h.bf16 %v6204_v63  ;;  %v6205_v15 = vunpack.i.l.bf16 %v6204_v63  ;;  %6369 = vpow2.f32 %v3917_v45 }
0x2422   :  { %v5988_v52 = vpack.c.bf16 %v6206_v2, %v6205_v15 }
0x2423   :  { %v4042_v54 = vpop.permute.xlu1 %4041 }
0x2424   :  { %5990 = vmatprep.subr.msk.bf16.mxu1 %vm6696_vm4, %v5988_v52 }
0x2425   :  { %5993 = vmatpush3.bf16.msk.msra.mxu1 %vm6696_vm4, %v5988_v52 }
0x2427   :  { %v4044_v12 = vpop.permute.xlu1 %4043 }
0x2429   :  { %v6368_v4 = vpop.eup %6367 }
0x242a   :  { %v3924_v28 = vsel %vm447_vm12, %v6368_v4, 0.0  ;;  %v6370_v21 = vpop.eup %6369 }
0x242b   :  { %3925 = vadd.xlane.f32.xlu0 %v3924_v28  ;;  %v3921_v30 = vsel %vm443_vm13, %v6370_v21, 0.0 }
0x242f   :  { %3922 = vadd.xlane.f32.xlu0 %v3921_v30 }
0x2445   :  { %6208 = vrot.lane.b32.xlu0 %v6212_v34, %s6423_s23  ;;  %s7819_s23 = smov 24  }
0x24b8   :  { %v3926_v7 = vpop.xlane.xlu0 %3925 }
0x24b9   :  { %6371 = vrcp.f32 %v3926_v7 }
0x24bc   :  { %v3923_v29 = vpop.xlane.xlu0 %3922 }
0x24bd   :  { %6373 = vrcp.f32 %v3923_v29 }
0x24c0   :  { %v6209_v8 = vpop.permute.xlu0 %6208 }
0x24c1   :  { %v6211_v20 = vunpack.i.h.bf16 %v6209_v8  ;;  %v6210_v57 = vunpack.i.l.bf16 %v6209_v8 }
0x24c3   :  { %v5994_v6 = vpack.c.bf16 %v6211_v20, %v6210_v57  ;;  %v6372_v51 = vpop.eup %6371  ;;  %v6222_v20 = vpack.i.bf16 %v4263_v62, %v7283_v58 }
0x24c4   :  { %v7356_v27 = vmul.f32 %v6372_v51, %v6368_v4 }
0x24c5   :  { %5996 = vmatprep.subr.msk.bf16.mxu1 %vm6651_vm11, %v5994_v6 }
0x24c7   :  { %v6374_v53 = vpop.eup %6373 }
0x24c8   :  { %v7354_v16 = vmul.f32 %v6374_v53, %v6370_v21 }
0x24ca   :  { %5697 = vmatprep.mubr.msk.f32.mxu1 %vm443_vm13, %v7354_v16 }
0x24cb   :  { %5698 = vmatmul.mubr.msk.f32.vlgmr.msra.gmra.mrb[40].mxu1 %vm443_vm13, %v7356_v27 }
0x24cc   :  { %5999 = vmatpush3.bf16.xpose.msk.msra.mxu1 %vm6651_vm11, %v5994_v6  ;;  %5704 = vmatprep.mubr.msk.f32.mxu1 %vm357_vm9, %v4042_v54 }
0x24d3   :  { %5705 = vmatmul.mubr.msk.f32.vlgmr.msra.gmra.mrb[42].mxu1 %vm357_vm9, %v4044_v12 }
0x259e   :  { %v7366_v33 = vpop.f32.mrb[40].mxu1 }
0x259f   :  { %v7368_v44 = vpop.f32.mrb[41].mxu1 }
0x25a6   :  { %v5706_v50 = vpop.f32.mrb[42].mxu1 }
0x25a7   :  { %v4133_v55 = vmul.f32 0.35355338, %v5706_v50  ;;  %v4123_v10 = vpop.f32.mrb[43].mxu1 }
0x25a8   :  { %v4132_v56 = vmul.f32 0.35355338, %v4123_v10 }
0x25a9   :  { %v4137_v40 = vsel %vm447_vm12, %v4133_v55, -inf }
0x25aa   :  { %4138 = vmax.xlane.f32.xlu0 %v4137_v40  ;;  %v4134_v61 = vsel %vm443_vm13, %v4132_v56, -inf }
0x25ab   :  { %4135 = vmax.xlane.f32.xlu1 %v4134_v61 }
0x25bc   :  { %6213 = vrot.lane.b32.xlu1 %v6212_v34, %s7813_s20 }
0x25c0   :  { %4266 = vrot.lane.b32.xlu1 %v7283_v58, %s7814_s21 }
0x25c4   :  { %4268 = vrot.lane.b32.xlu1 %v4263_v62, %s7814_s21 }
0x2637   :  { %v4139_v36 = vpop.xlane.xlu0 %4138 }
0x2638   :  { %v4141_v45 = vsub.f32 %v4133_v55, %v4139_v36  ;;  %v4136_v63 = vpop.xlane.xlu1 %4135 }
0x2639   :  { %v4140_v2 = vsub.f32 %v4132_v56, %v4136_v63 }
0x263a   :  { %v4144_v15 = vmul.f32 1.442695, %v4141_v45 }
0x263b   :  { %v4142_v52 = vmul.f32 1.442695, %v4140_v2 }
0x263c   :  { %6375 = vpow2.f32 %v4144_v15  ;;  %v6214_v4 = vpop.permute.xlu1 %6213 }
0x263d   :  { %v6216_v28 = vunpack.i.h.bf16 %v6214_v4  ;;  %v6215_v21 = vunpack.i.l.bf16 %v6214_v4  ;;  %6377 = vpow2.f32 %v4142_v52 }
0x263f   :  { %v6000_v30 = vpack.c.bf16 %v6216_v28, %v6215_v21 }
0x2640   :  { %v4267_v58 = vpop.permute.xlu1 %4266 }
0x2641   :  { %6002 = vmatprep.subr.msk.bf16.mxu0 %vm6696_vm4, %v6000_v30 }
0x2642   :  { %6005 = vmatpush3.bf16.msk.msra.mxu0 %vm6696_vm4, %v6000_v30 }
0x2644   :  { %v4269_v40 = vpop.permute.xlu1 %4268 }
0x2646   :  { %v6376_v34 = vpop.eup %6375 }
0x2647   :  { %v4149_v7 = vsel %vm447_vm12, %v6376_v34, 0.0  ;;  %v6378_v29 = vpop.eup %6377 }
0x2648   :  { %4150 = vadd.xlane.f32.xlu0 %v4149_v7  ;;  %v4146_v8 = vsel %vm443_vm13, %v6378_v29, 0.0 }
0x264c   :  { %4147 = vadd.xlane.f32.xlu0 %v4146_v8 }
0x2662   :  { %6218 = vrot.lane.b32.xlu0 %v6222_v20, %s7815_s5 }
0x26d5   :  { %v4151_v57 = vpop.xlane.xlu0 %4150 }
0x26d6   :  { %6379 = vrcp.f32 %v4151_v57 }
0x26d9   :  { %v4148_v6 = vpop.xlane.xlu0 %4147 }
0x26da   :  { %6381 = vrcp.f32 %v4148_v6 }
0x26dd   :  { %v6219_v51 = vpop.permute.xlu0 %6218 }
0x26de   :  { %v6221_v53 = vunpack.i.h.bf16 %v6219_v51  ;;  %v6220_v54 = vunpack.i.l.bf16 %v6219_v51 }
0x26e0   :  { %v6006_v12 = vpack.c.bf16 %v6221_v53, %v6220_v54  ;;  %v6380_v50 = vpop.eup %6379 }
0x26e1   :  { %v7388_v56 = vmul.f32 %v6380_v50, %v6376_v34 }
0x26e2   :  { %6008 = vmatprep.subr.msk.bf16.mxu0 %vm6651_vm11, %v6006_v12 }
0x26e4   :  { %v6382_v55 = vpop.eup %6381 }
0x26e5   :  { %v7386_v10 = vmul.f32 %v6382_v55, %v6378_v29 }
0x26e7   :  { %5711 = vmatprep.mubr.msk.f32.mxu0 %vm443_vm13, %v7386_v10 }
0x26e8   :  { %5712 = vmatmul.mubr.msk.f32.vlgmr.msra.gmra.mrb[50].mxu0 %vm443_vm13, %v7388_v56 }
0x26e9   :  { %6011 = vmatpush3.bf16.xpose.msk.msra.mxu0 %vm6651_vm11, %v6006_v12  ;;  %5718 = vmatprep.mubr.msk.f32.mxu0 %vm357_vm9, %v4267_v58  ;;  %vm7822_vm11 = vcmask 195712  }
0x26ea   :  { %6024 = vmatprep.subr.bf16.mxu0 %v6415_v0 }
0x26f0   :  { %5719 = vmatmul.mubr.msk.f32.vlgmr.msra.gmra.mrb[52].mxu0 %vm357_vm9, %v4269_v40  ;;  %vm7821_vm9 = vcmask 130112  }
0x26f1   :  { %5753 = vmatprep.mubr.msk.f32.mxu0 %vm6416_vm0, %v6417_v3 }
0x27bb   :  { %v7401_v61 = vpop.f32.mrb[50].mxu0 }
0x27bc   :  { %v4243_v62 = vpop.f32.mrb[51].mxu0 }
0x27c3   :  { %v5720_v36 = vpop.f32.mrb[52].mxu0 }
0x27c4   :  { %v4358_v45 = vmul.f32 0.35355338, %v5720_v36  ;;  %v4348_v63 = vpop.f32.mrb[53].mxu0 }
0x27c5   :  { %v4357_v2 = vmul.f32 0.35355338, %v4348_v63  ;;  %v5163_v63 = vld [vmem:[%s7767_s7 + $0x30] sm:$0xff] }
0x27c6   :  { %v4362_v24 = vsel %vm447_vm12, %v4358_v45, -inf }
0x27c7   :  { %4363 = vmax.xlane.f32.xlu0 %v4362_v24  ;;  %v4359_v15 = vsel %vm443_vm13, %v4357_v2, -inf }
0x27c8   :  { %4360 = vmax.xlane.f32.xlu1 %v4359_v15 }
0x27d9   :  { %6223 = vrot.lane.b32.xlu1 %v6222_v20, %s7816_s28  ;;  %s6435_s28 = smov 27  }
0x27dd   :  { %3371 = vrot.lane.b32.xlu1 %v7272_v11, %s7818_s26 }
0x27e1   :  { %3596 = vrot.lane.b32.xlu1 %v7304_v23, %s7819_s23 }
0x27e5   :  { %3148 = vrot.lane.b32.xlu1 %v7238_v1, %s7820_s24 }
0x27e9   :  { %3373 = vrot.lane.b32.xlu1 %v7270_v39, %s7818_s26 }
0x27ed   :  { %3598 = vrot.lane.b32.xlu1 %v7302_v22, %s7819_s23 }
0x27f1   :  { %4031 = vrot.lane.b32.xlu1 %v7366_v33, %s7820_s24 }
0x2854   :  { %v4364_v52 = vpop.xlane.xlu0 %4363 }
0x2855   :  { %v4366_v4 = vsub.f32 %v4358_v45, %v4364_v52  ;;  %v4361_v28 = vpop.xlane.xlu1 %4360 }
0x2856   :  { %v4365_v21 = vsub.f32 %v4357_v2, %v4361_v28  ;;  %v5164_v2 = vld [vmem:[%s7767_s7 + $0x38] sm:$0xff] }
0x2857   :  { %v4369_v11 = vmul.f32 1.442695, %v4366_v4  ;;  %v6022_v24 = vpack.c.bf16 %v5164_v2, %v5163_v63 }
0x2858   :  { %v4367_v30 = vmul.f32 1.442695, %v4365_v21 }
0x2859   :  { %v6224_v34 = vpop.permute.xlu1 %6223 }
0x285a   :  { %6383 = vpow2.f32 %v4367_v30  ;;  %v6226_v23 = vunpack.i.h.bf16 %v6224_v34  ;;  %v6225_v7 = vunpack.i.l.bf16 %v6224_v34  ;;  %v5169_v30 = vld [vmem:[%s7768_s8 + $0x1] ss:$0 sm:$0xff] }
0x285b   :  { %6385 = vpow2.f32 %v4369_v11 }
0x285c   :  { %v6012_v1 = vpack.c.bf16 %v6226_v23, %v6225_v7 }
0x285d   :  { %v3372_v29 = vpop.permute.xlu1 %3371 }
0x285e   :  { %6014 = vmatprep.subr.msk.bf16.mxu1 %vm6696_vm4, %v6012_v1 }
0x285f   :  { %6017 = vmatpush3.bf16.msk.msra.mxu1 %vm6696_vm4, %v6012_v1  ;;  %vm7824_vm4 = vmmov %vm7821_vm9 }
0x2860   :  { %6018 = vmatprep.subr.bf16.mxu1 %v6415_v0 }
0x2861   :  { %v3597_v39 = vpop.permute.xlu1 %3596 }
0x2864   :  { %v6384_v22 = vpop.eup %6383 }
0x2865   :  { %v3149_v33 = vpop.permute.xlu1 %3148  ;;  %v4371_v8 = vsel %vm443_vm13, %v6384_v22, 0.0  ;;  %v6386_v20 = vpop.eup %6385 }
0x2866   :  { %3153 = vst.msk [vmem:[#allocation3 + $0x8] sm:$0x1] %vm788_vm7, %v3149_v33  ;;  %4372 = vadd.xlane.f32.xlu0 %v4371_v8  ;;  %v4374_v6 = vsel %vm447_vm12, %v6386_v20, 0.0  ;;  %vm7823_vm12 = vcmask 261312  }
0x2869   :  { %v3374_v57 = vpop.permute.xlu1 %3373 }
0x286a   :  { %3378 = vst.msk [vmem:[#allocation3 + $0x8] sm:$0x1] %vm1017_vm14, %v3374_v57  ;;  %4375 = vadd.xlane.f32.xlu0 %v4374_v6 }
0x286d   :  { %v3599_v51 = vpop.permute.xlu1 %3598 }
0x286e   :  { %3603 = vst.msk [vmem:[#allocation3 + $0x8] sm:$0x1] %vm1246_vm15, %v3599_v51 }
0x2871   :  { %v4032_v35 = vpop.permute.xlu1 %4031 }
0x2872   :  { %4036 = vst.msk [vmem:[#allocation3 + $0x11] sm:$0x1] %vm788_vm7, %v4032_v35  ;;  %vm7825_vm7 = vmmov %vm7822_vm11 }
0x2880   :  { %3146 = vrot.lane.b32.xlu0 %v7240_v42, %s7820_s24  ;;  %v5161_v42 = vld [vmem:[%s7767_s7 + $0x20] sm:$0xff] }
0x2884   :  { %4029 = vrot.lane.b32.xlu0 %v7368_v44, %s7820_s24  ;;  %v5162_v44 = vld [vmem:[%s7767_s7 + $0x28] sm:$0xff] }
0x2888   :  { %4254 = vrot.lane.b32.xlu0 %v4243_v62, %s7818_s26  ;;  %v6019_v62 = vpack.c.bf16 %v5162_v44, %v5161_v42  ;;  %v5174_v42 = vld [vmem:[%s7769_s11 + $0x20] sm:$0xff]  ;;  %v5176_v44 = vld [vmem:[%s7769_s11 + $0x30] sm:$0xff] }
0x28f3   :  { %v4373_v53 = vpop.xlane.xlu0 %4372 }
0x28f4   :  { %6387 = vrcp.f32 %v4373_v53 }
0x28f7   :  { %v4376_v54 = vpop.xlane.xlu0 %4375 }
0x28f8   :  { %6389 = vrcp.f32 %v4376_v54 }
0x28fb   :  { %v3147_v12 = vpop.permute.xlu0 %3146 }
0x28fc   :  { %3152 = vst.msk [vmem:[#allocation3] sm:$0xff] %vm7821_vm9, %v3147_v12  ;;  %vm917_vm9 = vcmask 220304  }
0x28fd   :  { %3377 = vst.msk [vmem:[#allocation3] sm:$0xff] %vm7822_vm11, %v3372_v29 }
0x28fe   :  { %v6388_v50 = vpop.eup %6387  ;;  %3602 = vst.msk [vmem:[#allocation3] sm:$0xff] %vm7823_vm12, %v3597_v39 }
0x28ff   :  { %v4030_v55 = vpop.permute.xlu0 %4029  ;;  %v7437_v58 = vmul.f32 %v6388_v50, %v6384_v22 }
0x2900   :  { %4035 = vst.msk [vmem:[#allocation3 + $0x9] sm:$0xff] %vm7824_vm4, %v4030_v55  ;;  %vm919_vm4 = vcmask 213136  }
0x2901   :  { %5725 = vmatprep.mubr.msk.f32.mxu1 %vm443_vm13, %v7437_v58 }
0x2902   :  { %v6390_v40 = vpop.eup %6389 }
0x2903   :  { %v7448_v36 = vmul.f32 %v6390_v40, %v6386_v20  ;;  %v4255_v45 = vpop.permute.xlu0 %4254 }
0x2904   :  { %4260 = vst.msk [vmem:[#allocation3 + $0x9] sm:$0xff] %vm7825_vm7, %v4255_v45  ;;  %vm1148_vm7 = vcmask 286936  }
0x2905   :  { %5726 = vmatmul.mubr.msk.f32.vlgmr.msra.gmra.mrb[44].mxu1 %vm443_vm13, %v7448_v36  ;;  %v4487_v15 = vld [vmem:[#allocation3] sm:$0xff]  ;;  %vm7826_vm13 = vmmov %vm7823_vm12 }
0x2906   :  { %6020 = vmatpush3.bf16.msra.mxu1 %v6019_v62  ;;  %5736 = vmatprep.mubr.msk.f32.mxu1 %vm6416_vm0, %v6417_v3  ;;  %v5177_v62 = vld [vmem:[%s7769_s11 + $0x38] sm:$0xff] }
0x2907   :  { %6021 = vmatprep.subr.bf16.mxu1 %v6415_v0  ;;  %v6028_v45 = vpack.c.bf16 %v5177_v62, %v5176_v44  ;;  %v5188_v44 = vld [vmem:[%s7772_s13 + $0x68] sm:$0xff]  ;;  %v5189_v62 = vld [vmem:[%s7772_s13 + $0x70] sm:$0xff] }
0x290a   :  { %6023 = vmatpush3.bf16.msra.mxu1 %v6022_v24 }
0x290b   :  { %6030 = vmatprep.subr.bf16.mxu1 %v6415_v0 }
0x290d   :  { %5737 = vmatmul.mubr.msk.f32.vlgmr.msra.gmra.mrb[46].mxu1 %vm163_vm3, %v4487_v15 }
0x290e   :  { %5739 = vmatprep.mubr.msk.f32.mxu1 %vm6416_vm0, %v6417_v3 }
0x29d8   :  { %v5727_v52 = vpop.f32.mrb[44].mxu1 }
0x29d9   :  { %4481 = vrot.lane.b32.xlu1 %v5727_v52, %s7819_s23  ;;  %v4468_v4 = vpop.f32.mrb[45].mxu1 }
0x29da   :  { %4479 = vrot.lane.b32.xlu0 %v4468_v4, %s7819_s23 }
0x29de   :  { %4256 = vrot.lane.b32.xlu0 %v7401_v61, %s7818_s26 }
0x29e0   :  { %v4570_v28 = vpop.f32.mrb[46].mxu1 }
0x29e1   :  { %v5738_v21 = vpop.f32.mrb[47].mxu1  ;;  %v4584_v11 = vadd.f32 %v4570_v28, %v7088_v49 }
0x29e3   :  { %v7474_v34 = vadd.f32 %v5169_v30, %v4584_v11 }
0x29e5   :  { %v4602_v23 = vsel %vm163_vm3, %v7474_v34, 0.0 }
0x29fd   :  { %4603 = vadd.xlane.f32.xlu0 %v4602_v23 }
0x2a4b   :  { %v4482_v29 = vpop.permute.xlu1 %4481 }
0x2a4c   :  { %v4480_v7 = vpop.permute.xlu0 %4479 }
0x2a4d   :  { %4485 = vst.msk [vmem:[#allocation3 + $0x9] sm:$0xff] %vm7826_vm13, %v4480_v7  ;;  %vm1146_vm13 = vcmask 294104  }
0x2a50   :  { %v4257_v1 = vpop.permute.xlu0 %4256 }
0x2a51   :  { %4261 = vst.msk [vmem:[#allocation3 + $0x11] sm:$0x1] %vm1017_vm14, %v4257_v1 }
0x2a52   :  { %4486 = vst.msk [vmem:[#allocation3 + $0x11] sm:$0x1] %vm1246_vm15, %v4482_v29 }
0x2a54   :  { %v4488_v49 = vld [vmem:[#allocation3 + $0x8] sm:$0xff] }
0x2a55   :  { %5740 = vmatmul.mubr.msk.f32.gmra.mrb[48].mxu1 %vm163_vm3, %v4488_v49 }
0x2a56   :  { %5742 = vmatprep.mubr.msk.f32.mxu1 %vm6416_vm0, %v6417_v3 }
0x2a59   :  { %v4489_v61 = vld [vmem:[#allocation3 + $0x10] sm:$0x3] }
0x2a5a   :  { %5743 = vmatmul.mubr.msk.f32.gmra.mrb[50].mxu1 %vm163_vm3, %v4489_v61 }
0x2a5b   :  { %5778 = vmatprep.mubr.msk.f32.mxu1 %vm6416_vm0, %v6417_v3 }
0x2a8a   :  { %v4604_v39 = vpop.xlane.xlu0 %4603 }
0x2a8b   :  { %v4611_v20 = vmul.f32 0.03125, %v4604_v39 }
0x2a8d   :  { %v4614_v35 = vsub.f32 %v7474_v34, %v4611_v20 }
0x2b28   :  { %v4575_v22 = vpop.f32.mrb[48].mxu1 }
0x2b29   :  { %v4585_v33 = vadd.f32 %v4575_v22, %v7099_v5  ;;  %v5741_v8 = vpop.f32.mrb[49].mxu1  ;;  %v4617_v5 = vmul.f32 %v4614_v35, %v4614_v35 }
0x2b2b   :  { %v7488_v57 = vadd.f32 %v5169_v30, %v4585_v33  ;;  %v4620_v55 = vsel %vm163_vm3, %v4617_v5, 0.0  ;;  %v5172_v33 = vld [vmem:[%s7770_s9 + $0x1] ss:$0 sm:$0xff] }
0x2b2c   :  { %v4665_v8 = vmul.f32 %v5172_v33, %v4614_v35  ;;  %v5184_v35 = vld [vmem:[%s7772_s13 + $0x48] sm:$0xff] }
0x2b2d   :  { %v4580_v6 = vpop.f32.mrb[50].mxu1  ;;  %v4605_v51 = vsel %vm163_vm3, %v7488_v57, 0.0 }
0x2b2e   :  { %v4586_v53 = vadd.f32 %v4580_v6, %v7144_v60  ;;  %4606 = vadd.xlane.f32.xlu1 %v4605_v51  ;;  %v5744_v54 = vpop.f32.mrb[51].mxu1  ;;  %v5175_v60 = vld [vmem:[%s7769_s11 + $0x28] sm:$0xff]  ;;  %v5173_v6 = vld [vmem:[%s7771_s10 + $0x1] ss:$0 sm:$0xff] }
0x2b2f   :  { %v6025_v40 = vpack.c.bf16 %v5175_v60, %v5174_v42  ;;  %v5183_v54 = vld [vmem:[%s7772_s13 + $0x40] sm:$0xff] }
0x2b30   :  { %v7494_v12 = vadd.f32 %v5169_v30, %v4586_v53  ;;  %v6031_v5 = vpack.c.bf16 %v5184_v35, %v5183_v54  ;;  %v5187_v60 = vld [vmem:[%s7772_s13 + $0x60] sm:$0xff] }
0x2b31   :  { %6026 = vmatpush3.bf16.msra.mxu0 %v6025_v40  ;;  %v6037_v40 = vpack.c.bf16 %v5188_v44, %v5187_v60 }
0x2b32   :  { %v4608_v50 = vsel %vm170_vm10, %v7494_v12, 0.0  ;;  %6027 = vmatprep.subr.bf16.mxu0 %v6415_v0  ;;  %6032 = vmatpush3.bf16.msra.mxu1 %v6031_v5 }
0x2b33   :  { %4609 = vadd.xlane.f32.xlu0 %v4608_v50  ;;  %v5185_v50 = vld [vmem:[%s7772_s13 + $0x50] sm:$0xff]  ;;  %6033 = vmatprep.subr.bf16.mxu1 %v6415_v0 }
0x2b35   :  { %6029 = vmatpush3.bf16.msra.mxu0 %v6028_v45  ;;  %v5190_v45 = vld [vmem:[%s7772_s13 + $0x78] sm:$0xff] }
0x2b37   :  { %4621 = vadd.xlane.f32.xlu0 %v4620_v55  ;;  %v5186_v55 = vld [vmem:[%s7772_s13 + $0x58] sm:$0xff] }
0x2b38   :  { %v6034_v42 = vpack.c.bf16 %v5186_v55, %v5185_v50  ;;  %v5179_v55 = vld [vmem:[%s7773_s12 + $0x1] ss:$0 sm:$0xff] }
0x2b3a   :  { %6035 = vmatpush3.bf16.msra.mxu1 %v6034_v42 }
0x2b3b   :  { %6036 = vmatprep.subr.bf16.mxu1 %v6415_v0 }
0x2b3e   :  { %6038 = vmatpush3.bf16.msra.mxu1 %v6037_v40 }
0x2b3f   :  { %6039 = vmatprep.subr.bf16.mxu1 %v6415_v0 }
0x2bbb   :  { %v4607_v63 = vpop.xlane.xlu1 %4606 }
0x2bbc   :  { %v4612_v2 = vmul.f32 0.03125, %v4607_v63  ;;  %v6040_v63 = vpack.c.bf16 %v5190_v45, %v5189_v62 }
0x2bbe   :  { %v7513_v24 = vsub.f32 %v7488_v57, %v4612_v2  ;;  %6041 = vmatpush3.bf16.msra.mxu1 %v6040_v63 }
0x2bc0   :  { %v4610_v15 = vpop.xlane.xlu0 %4609  ;;  %v4618_v52 = vmul.f32 %v7513_v24, %v7513_v24 }
0x2bc1   :  { %v4613_v4 = vmul.f32 0.03125, %v4610_v15 }
0x2bc2   :  { %v4623_v28 = vsel %vm163_vm3, %v4618_v52, 0.0 }
0x2bc3   :  { %v7519_v21 = vsub.f32 %v7494_v12, %v4613_v4  ;;  %4624 = vadd.xlane.f32.xlu0 %v4623_v28 }
0x2bc4   :  { %v4622_v11 = vpop.xlane.xlu0 %4621 }
0x2bc5   :  { %v4629_v30 = vmul.f32 0.032258064, %v4622_v11  ;;  %v4619_v23 = vmul.f32 %v7519_v21, %v7519_v21  ;;  %v4667_v54 = vmul.f32 %v5172_v33, %v7519_v21 }
0x2bc7   :  { %6391 = vrsqrt.f32 %v4629_v30  ;;  %v4626_v7 = vsel %vm170_vm10, %v4619_v23, 0.0  ;;  %vm4634_vm14 = vcmp.eq.f32.partialorder %v4629_v30, inf  ;;  %v4637_v49 = vand.u32 2147483648, %v4629_v30 }
0x2bc8   :  { %4627 = vadd.xlane.f32.xlu1 %v4626_v7  ;;  %vm4636_vm15 = vcmp.eq.f32.partialorder %v4629_v30, 0.0 }
0x2bd1   :  { %v6392_v1 = vpop.eup %6391 }
0x2bd2   :  { %v4633_v29 = vmul.f32 %v6392_v1, %v4629_v30 }
0x2bd4   :  { %v4635_v61 = vsel %vm4634_vm14, %v4629_v30, %v4633_v29 }
0x2bd5   :  { %v4638_v39 = vsel %vm4636_vm15, %v4637_v49, %v4635_v61 }
0x2bd6   :  { %v4653_v22 = vadd.f32 1e-06, %v4638_v39 }
0x2bd8   :  { %6393 = vrcp.f32 %v4653_v22 }
0x2be2   :  { %v6394_v20 = vpop.eup %6393 }
0x2be3   :  { %v4668_v51 = vmul.f32 %v6394_v20, %v4665_v8  ;;  %v4666_v8 = vmul.f32 %v5172_v33, %v7513_v24 }
0x2be5   :  { %v4677_v53 = vadd.f32 %v5173_v6, %v4668_v51 }
0x2be7   :  { %5754 = vmatmul.mubr.msk.f32.vlgmr.msra.gmra.mrb[54].mxu0 %vm163_vm3, %v4677_v53 }
0x2be8   :  { %5756 = vmatprep.mubr.msk.f32.mxu0 %vm6416_vm0, %v6417_v3 }
0x2c50   :  { %v4625_v2 = vpop.xlane.xlu0 %4624 }
0x2c51   :  { %v4630_v15 = vmul.f32 0.032258064, %v4625_v2 }
0x2c53   :  { %6395 = vrsqrt.f32 %v4630_v15  ;;  %vm4641_vm8 = vcmp.eq.f32.partialorder %v4630_v15, inf  ;;  %v4644_v0 = vand.u32 2147483648, %v4630_v15  ;;  %vm4643_vm1 = vcmp.eq.f32.partialorder %v4630_v15, 0.0 }
0x2c55   :  { %v4628_v52 = vpop.xlane.xlu1 %4627 }
0x2c56   :  { %v4631_v4 = vmul.f32 0.032258064, %v4628_v52  ;;  %v5195_v52 = vld [vmem:[%s7774_s14 + $0x1] ss:$0 sm:$0xff]  ;;  %s6433_s14 = smov 9  }
0x2c58   :  { %6397 = vrsqrt.f32 %v4631_v4  ;;  %vm4648_vm5 = vcmp.eq.f32.partialorder %v4631_v4, inf  ;;  %v4651_v49 = vand.u32 2147483648, %v4631_v4  ;;  %vm4650_vm2 = vcmp.eq.f32.partialorder %v4631_v4, 0.0 }
0x2c5d   :  { %v6396_v28 = vpop.eup %6395 }
0x2c5e   :  { %v4640_v11 = vmul.f32 %v6396_v28, %v4630_v15 }
0x2c60   :  { %v4642_v30 = vsel %vm4641_vm8, %v4630_v15, %v4640_v11 }
0x2c61   :  { %v4645_v23 = vsel %vm4643_vm1, %v4644_v0, %v4642_v30 }
0x2c62   :  { %v4654_v7 = vadd.f32 1e-06, %v4645_v23  ;;  %v6398_v1 = vpop.eup %6397 }
0x2c63   :  { %v4647_v29 = vmul.f32 %v6398_v1, %v4631_v4 }
0x2c64   :  { %6399 = vrcp.f32 %v4654_v7 }
0x2c65   :  { %v4649_v61 = vsel %vm4648_vm5, %v4631_v4, %v4647_v29 }
0x2c66   :  { %v4652_v39 = vsel %vm4650_vm2, %v4651_v49, %v4649_v61 }
0x2c67   :  { %v4655_v22 = vadd.f32 1e-06, %v4652_v39 }
0x2c69   :  { %6401 = vrcp.f32 %v4655_v22 }
0x2c6e   :  { %v6400_v20 = vpop.eup %6399 }
0x2c6f   :  { %v4669_v51 = vmul.f32 %v6400_v20, %v4666_v8 }
0x2c71   :  { %v4678_v53 = vadd.f32 %v5173_v6, %v4669_v51 }
0x2c73   :  { %5757 = vmatmul.mubr.msk.f32.gmra.mrb[56].mxu0 %vm163_vm3, %v4678_v53  ;;  %v6402_v35 = vpop.eup %6401 }
0x2c74   :  { %5759 = vmatprep.mubr.msk.f32.mxu0 %vm6416_vm0, %v6417_v3  ;;  %v4670_v50 = vmul.f32 %v6402_v35, %v4667_v54 }
0x2c76   :  { %v4679_v5 = vadd.f32 %v5173_v6, %v4670_v50 }
0x2c78   :  { %5760 = vmatmul.mubr.msk.f32.gmra.mrb[58].mxu0 %vm163_vm3, %v4679_v5 }
0x2cba   :  { %v4768_v24 = vpop.f32.mrb[54].mxu0 }
0x2cbb   :  { %v4769_v42 = vadd.f32 %v5179_v55, %v4768_v24  ;;  %v5755_v60 = vpop.f32.mrb[55].mxu0 }
0x2cbd   :  { %v4782_v44 = vmax.f32 %v4769_v42, 0.0 }
0x2cbf   :  { %5779 = vmatmul.mubr.msk.f32.vlgmr.msra.gmra.mrb[52].mxu1 %vm2431_vm6, %v4782_v44 }
0x2cc0   :  { %5781 = vmatprep.mubr.msk.f32.mxu1 %vm6416_vm0, %v6417_v3 }
0x2d46   :  { %v4773_v21 = vpop.f32.mrb[56].mxu0 }
0x2d47   :  { %v4774_v33 = vadd.f32 %v5179_v55, %v4773_v21  ;;  %v5758_v40 = vpop.f32.mrb[57].mxu0 }
0x2d49   :  { %v4783_v62 = vmax.f32 %v4774_v33, 0.0 }
0x2d4b   :  { %5782 = vmatmul.mubr.msk.f32.gmra.mrb[54].mxu1 %vm2431_vm6, %v4783_v62  ;;  %v4778_v6 = vpop.f32.mrb[58].mxu0 }
0x2d4c   :  { %5784 = vmatprep.mubr.msk.f32.mxu1 %vm6416_vm0, %v6417_v3  ;;  %v4779_v45 = vadd.f32 %v5179_v55, %v4778_v6  ;;  %v5761_v63 = vpop.f32.mrb[59].mxu0  ;;  %vm688_vm0 = vcmask 146504   ;;  %v7672_v6 = vld [vmem:[%s7775_s15] ss:$0 sm:$0xff] }
0x2d4e   :  { %v4784_v2 = vmax.f32 %v4779_v45, 0.0 }
0x2d50   :  { %5785 = vmatmul.mubr.msk.f32.gmra.mrb[56].mxu1 %vm2431_vm6, %v4784_v2  ;;  %vm690_vm6 = vcmask 139336  }
0x2d92   :  { %v4869_v15 = vpop.f32.mrb[52].mxu1 }
0x2d93   :  { %v4883_v4 = vadd.f32 %v4869_v15, %v7474_v34  ;;  %v5780_v28 = vpop.f32.mrb[53].mxu1 }
0x2d95   :  { %v4894_v11 = vadd.f32 %v5195_v52, %v4883_v4 }
0x2d97   :  { %v4899_v0 = vsel %vm163_vm3, %v4894_v11, 0.0 }
0x2d98   :  { %4900 = vadd.xlane.f32.xlu0 %v4899_v0 }
0x2e1e   :  { %v4874_v30 = vpop.f32.mrb[54].mxu1 }
0x2e1f   :  { %v4884_v3 = vadd.f32 %v4874_v30, %v7488_v57  ;;  %v5783_v23 = vpop.f32.mrb[55].mxu1 }
0x2e21   :  { %v4895_v7 = vadd.f32 %v5195_v52, %v4884_v3 }
0x2e23   :  { %v4902_v1 = vsel %vm163_vm3, %v4895_v7, 0.0  ;;  %v4879_v29 = vpop.f32.mrb[56].mxu1 }
0x2e24   :  { %4903 = vadd.xlane.f32.xlu1 %v4902_v1  ;;  %v4885_v49 = vadd.f32 %v4879_v29, %v7494_v12  ;;  %v5786_v61 = vpop.f32.mrb[57].mxu1 }
0x2e25   :  { %v4901_v39 = vpop.xlane.xlu0 %4900 }
0x2e26   :  { %v4908_v22 = vmul.f32 0.03125, %v4901_v39  ;;  %v4896_v34 = vadd.f32 %v5195_v52, %v4885_v49 }
0x2e28   :  { %v7584_v8 = vsub.f32 %v4894_v11, %v4908_v22  ;;  %v4905_v20 = vsel %vm170_vm10, %v4896_v34, 0.0 }
0x2e29   :  { %4906 = vadd.xlane.f32.xlu0 %v4905_v20 }
0x2e2a   :  { %v4914_v57 = vmul.f32 %v7584_v8, %v7584_v8 }
0x2e2c   :  { %v4917_v51 = vsel %vm163_vm3, %v4914_v57, 0.0 }
0x2e2d   :  { %4918 = vadd.xlane.f32.xlu1 %v4917_v51 }
0x2e3e   :  { %684 = vrot.lane.b32.xlu1 %v6717_v48, %s6433_s14 }
0x2e3f   :  { %682 = vrot.lane.b32.xlu0 %v6708_v43, %s6433_s14 }
0x2e42   :  { %1577 = vrot.lane.b32.xlu1 %v6848_v46, %s6433_s14 }
0x2e43   :  { %3050 = vrot.lane.b32.xlu0 %v7217_v17, %s6433_s14 }
0x2e46   :  { %1579 = vrot.lane.b32.xlu1 %v6850_v47, %s6433_s14 }
0x2e47   :  { %3933 = vrot.lane.b32.xlu0 %v7354_v16, %s6433_s14 }
0x2e4a   :  { %3052 = vrot.lane.b32.xlu1 %v7226_v41, %s6433_s14 }
0x2e4b   :  { %911 = vrot.lane.b32.xlu0 %v6752_v31, %s6434_s1 }
0x2e4e   :  { %3935 = vrot.lane.b32.xlu1 %v7356_v27, %s6433_s14 }
0x2e4f   :  { %1802 = vrot.lane.b32.xlu0 %v6880_v37, %s6434_s1 }
0x2e52   :  { %913 = vrot.lane.b32.xlu1 %v6754_v32, %s6434_s1 }
0x2e56   :  { %1804 = vrot.lane.b32.xlu1 %v6882_v38, %s6434_s1 }
0x2e5a   :  { %3277 = vrot.lane.b32.xlu1 %v7260_v59, %s6434_s1 }
0x2e5e   :  { %4160 = vrot.lane.b32.xlu1 %v7388_v56, %s6434_s1 }
0x2eb1   :  { %v4904_v43 = vpop.xlane.xlu1 %4903 }
0x2eb2   :  { %v4909_v48 = vmul.f32 0.03125, %v4904_v43 }
0x2eb4   :  { %v7610_v31 = vsub.f32 %v4895_v7, %v4909_v48 }
0x2eb6   :  { %v4915_v46 = vmul.f32 %v7610_v31, %v7610_v31  ;;  %v4907_v47 = vpop.xlane.xlu0 %4906  ;;  %v4963_v43 = vmul.f32 %v7672_v6, %v7610_v31 }
0x2eb7   :  { %v4910_v37 = vmul.f32 0.03125, %v4907_v47 }
0x2eb8   :  { %v4920_v32 = vsel %vm163_vm3, %v4915_v46, 0.0 }
0x2eb9   :  { %4921 = vadd.xlane.f32.xlu0 %v4920_v32  ;;  %v7615_v38 = vsub.f32 %v4896_v34, %v4910_v37 }
0x2eba   :  { %v4919_v17 = vpop.xlane.xlu1 %4918  ;;  %v683_v59 = vpop.permute.xlu0 %682 }
0x2ebb   :  { %v4926_v41 = vmul.f32 0.032258064, %v4919_v17  ;;  %689 = vst.msk [vmem:[%s7766_s18] sm:$0xff] %vm688_vm0, %v683_v59  ;;  %v4916_v16 = vmul.f32 %v7615_v38, %v7615_v38  ;;  %v4964_v37 = vmul.f32 %v7672_v6, %v7615_v38 }
0x2ebd   :  { %6403 = vrsqrt.f32 %v4926_v41  ;;  %v4923_v56 = vsel %vm170_vm10, %v4916_v16, 0.0  ;;  %vm4931_vm11 = vcmp.eq.f32.partialorder %v4926_v41, inf  ;;  %v4934_v24 = vand.u32 2147483648, %v4926_v41 }
0x2ebe   :  { %v685_v27 = vpop.permute.xlu1 %684  ;;  %4924 = vadd.xlane.f32.xlu1 %v4923_v56  ;;  %v3051_v12 = vpop.permute.xlu0 %3050  ;;  %vm4933_vm12 = vcmp.eq.f32.partialorder %v4926_v41, 0.0 }
0x2ebf   :  { %691 = vst.msk [vmem:[%s7766_s18 + $0x8] sm:$0x1] %vm690_vm6, %v685_v27 }
0x2ec0   :  { %5102 = vst.msk [vmem:[%s7766_s18 + $0x20] sm:$0xff] %vm688_vm0, %v3051_v12 }
0x2ec2   :  { %v1578_v53 = vpop.permute.xlu1 %1577  ;;  %v3934_v54 = vpop.permute.xlu0 %3933 }
0x2ec3   :  { %5039 = vst.msk [vmem:[%s7766_s18 + $0x10] sm:$0xff] %vm688_vm0, %v1578_v53  ;;  %5138 = vst.msk [vmem:[%s7766_s18 + $0x30] sm:$0xff] %vm688_vm0, %v3934_v54 }
0x2ec6   :  { %v1580_v35 = vpop.permute.xlu1 %1579  ;;  %v912_v5 = vpop.permute.xlu0 %911 }
0x2ec7   :  { %v6404_v50 = vpop.eup %6403  ;;  %5040 = vst.msk [vmem:[%s7766_s18 + $0x18] sm:$0x1] %vm690_vm6, %v1580_v35 }
0x2ec8   :  { %v4930_v55 = vmul.f32 %v6404_v50, %v4926_v41  ;;  %918 = vst.msk [vmem:[%s7766_s18] sm:$0xff] %vm917_vm9, %v912_v5 }
0x2eca   :  { %v4932_v42 = vsel %vm4931_vm11, %v4926_v41, %v4930_v55  ;;  %v3053_v60 = vpop.permute.xlu1 %3052  ;;  %v1803_v21 = vpop.permute.xlu0 %1802 }
0x2ecb   :  { %v4935_v44 = vsel %vm4933_vm12, %v4934_v24, %v4932_v42  ;;  %5103 = vst.msk [vmem:[%s7766_s18 + $0x28] sm:$0x1] %vm690_vm6, %v3053_v60 }
0x2ecc   :  { %v4950_v33 = vadd.f32 1e-06, %v4935_v44  ;;  %5048 = vst.msk [vmem:[%s7766_s18 + $0x10] sm:$0xff] %vm917_vm9, %v1803_v21 }
0x2ece   :  { %6405 = vrcp.f32 %v4950_v33  ;;  %v3936_v40 = vpop.permute.xlu1 %3935 }
0x2ecf   :  { %5139 = vst.msk [vmem:[%s7766_s18 + $0x38] sm:$0x1] %vm690_vm6, %v3936_v40  ;;  %3275 = vrot.lane.b32.xlu0 %v7258_v25, %s6434_s1  ;;  %1142 = vrot.lane.b32.xlu1 %v6785_v19, %s6435_s28  ;;  %v4962_v19 = vmul.f32 %v7672_v6, %v7584_v8 }
0x2ed2   :  { %v914_v62 = vpop.permute.xlu1 %913 }
0x2ed3   :  { %920 = vst.msk [vmem:[%s7766_s18 + $0x8] sm:$0x1] %vm919_vm4, %v914_v62  ;;  %4158 = vrot.lane.b32.xlu0 %v7386_v10, %s6434_s1  ;;  %2029 = vrot.lane.b32.xlu1 %v6939_v13, %s6435_s28  ;;  %v7685_v10 = vld [vmem:[%s7776_s16] ss:$0 sm:$0xff] }
0x2ed6   :  { %v1805_v25 = vpop.permute.xlu1 %1804 }
0x2ed7   :  { %5049 = vst.msk [vmem:[%s7766_s18 + $0x18] sm:$0x1] %vm919_vm4, %v1805_v25  ;;  %1140 = vrot.lane.b32.xlu0 %v6783_v18, %s6435_s28  ;;  %3502 = vrot.lane.b32.xlu1 %v7291_v14, %s6435_s28 }
0x2ed8   :  { %v6406_v45 = vpop.eup %6405 }
0x2ed9   :  { %v4965_v13 = vmul.f32 %v6406_v45, %v4962_v19 }
0x2eda   :  { %v3278_v63 = vpop.permute.xlu1 %3277 }
0x2edb   :  { %v4974_v2 = vadd.f32 %v7685_v10, %v4965_v13  ;;  %5112 = vst.msk [vmem:[%s7766_s18 + $0x28] sm:$0x1] %vm919_vm4, %v3278_v63  ;;  %2027 = vrot.lane.b32.xlu0 %v6928_v26, %s6435_s28  ;;  %4385 = vrot.lane.b32.xlu1 %v7448_v36, %s6435_s28 }
0x2edd   :  { %4977 = vst.msk [vmem:[%s7777_s17] sm:$0xff] %vm163_vm3, %v4974_v2 }
0x2ede   :  { %v4161_v18 = vpop.permute.xlu1 %4160 }
0x2edf   :  { %5148 = vst.msk [vmem:[%s7766_s18 + $0x38] sm:$0x1] %vm919_vm4, %v4161_v18  ;;  %3500 = vrot.lane.b32.xlu0 %v7289_v9, %s6435_s28 }
0x2ee3   :  { %4383 = vrot.lane.b32.xlu0 %v7437_v58, %s6435_s28 }
0x2f46   :  { %v4922_v14 = vpop.xlane.xlu0 %4921 }
0x2f47   :  { %v4927_v15 = vmul.f32 0.032258064, %v4922_v14 }
0x2f49   :  { %6407 = vrsqrt.f32 %v4927_v15  ;;  %vm4938_vm14 = vcmp.eq.f32.partialorder %v4927_v15, inf  ;;  %v4941_v30 = vand.u32 2147483648, %v4927_v15  ;;  %vm4940_vm15 = vcmp.eq.f32.partialorder %v4927_v15, 0.0 }
0x2f4a   :  { %v3276_v26 = vpop.permute.xlu0 %3275 }
0x2f4b   :  { %5111 = vst.msk [vmem:[%s7766_s18 + $0x20] sm:$0xff] %vm917_vm9, %v3276_v26  ;;  %v4925_v36 = vpop.xlane.xlu1 %4924 }
0x2f4c   :  { %v4928_v52 = vmul.f32 0.032258064, %v4925_v36 }
0x2f4e   :  { %v4159_v4 = vpop.permute.xlu0 %4158  ;;  %6409 = vrsqrt.f32 %v4928_v52  ;;  %vm4945_vm8 = vcmp.eq.f32.partialorder %v4928_v52, inf  ;;  %v4948_v22 = vand.u32 2147483648, %v4928_v52  ;;  %vm4947_vm1 = vcmp.eq.f32.partialorder %v4928_v52, 0.0 }
0x2f4f   :  { %5147 = vst.msk [vmem:[%s7766_s18 + $0x30] sm:$0xff] %vm917_vm9, %v4159_v4  ;;  %v1143_v9 = vpop.permute.xlu1 %1142 }
0x2f50   :  { %1149 = vst.msk [vmem:[%s7766_s18 + $0x8] sm:$0x1] %vm1148_vm7, %v1143_v9 }
0x2f52   :  { %v1141_v58 = vpop.permute.xlu0 %1140 }
0x2f53   :  { %v6408_v28 = vpop.eup %6407  ;;  %1147 = vst.msk [vmem:[%s7766_s18] sm:$0xff] %vm1146_vm13, %v1141_v58  ;;  %v2030_v0 = vpop.permute.xlu1 %2029 }
0x2f54   :  { %v4937_v11 = vmul.f32 %v6408_v28, %v4927_v15  ;;  %5058 = vst.msk [vmem:[%s7766_s18 + $0x18] sm:$0x1] %vm1148_vm7, %v2030_v0 }
0x2f56   :  { %v4939_v3 = vsel %vm4938_vm14, %v4927_v15, %v4937_v11  ;;  %v2028_v23 = vpop.permute.xlu0 %2027 }
0x2f57   :  { %v4942_v7 = vsel %vm4940_vm15, %v4941_v30, %v4939_v3  ;;  %5057 = vst.msk [vmem:[%s7766_s18 + $0x10] sm:$0xff] %vm1146_vm13, %v2028_v23  ;;  %v3503_v29 = vpop.permute.xlu1 %3502 }
0x2f58   :  { %v4951_v1 = vadd.f32 1e-06, %v4942_v7  ;;  %v6410_v49 = vpop.eup %6409  ;;  %5121 = vst.msk [vmem:[%s7766_s18 + $0x28] sm:$0x1] %vm1148_vm7, %v3503_v29 }
0x2f59   :  { %v4944_v61 = vmul.f32 %v6410_v49, %v4928_v52 }
0x2f5a   :  { %6411 = vrcp.f32 %v4951_v1  ;;  %v3501_v39 = vpop.permute.xlu0 %3500 }
0x2f5b   :  { %5120 = vst.msk [vmem:[%s7766_s18 + $0x20] sm:$0xff] %vm1146_vm13, %v3501_v39  ;;  %v4946_v34 = vsel %vm4945_vm8, %v4928_v52, %v4944_v61  ;;  %v4386_v8 = vpop.permute.xlu1 %4385 }
0x2f5c   :  { %v4949_v20 = vsel %vm4947_vm1, %v4948_v22, %v4946_v34  ;;  %5157 = vst.msk [vmem:[%s7766_s18 + $0x38] sm:$0x1] %vm1148_vm7, %v4386_v8 }
0x2f5d   :  { %v4952_v57 = vadd.f32 1e-06, %v4949_v20 }
0x2f5e   :  { %v4384_v51 = vpop.permute.xlu0 %4383 }
0x2f5f   :  { %5156 = vst.msk [vmem:[%s7766_s18 + $0x30] sm:$0xff] %vm1146_vm13, %v4384_v51  ;;  %6413 = vrcp.f32 %v4952_v57 }
0x2f64   :  { %v6412_v48 = vpop.eup %6411 }
0x2f65   :  { %v4966_v46 = vmul.f32 %v6412_v48, %v4963_v43 }
0x2f67   :  { %v4975_v47 = vadd.f32 %v7685_v10, %v4966_v46 }
0x2f69   :  { %4978 = vst.msk [vmem:[%s7777_s17 + $0x8] sm:$0xff] %vm163_vm3, %v4975_v47  ;;  %v6414_v32 = vpop.eup %6413 }
0x2f6a   :  { %v4967_v17 = vmul.f32 %v6414_v32, %v4964_v37 }
0x2f6c   :  { %v4976_v41 = vadd.f32 %v7685_v10, %v4967_v17 }
0x2f6e   :  { %4979 = vst.msk [vmem:[%s7777_s17 + $0x10] sm:$0x3] %vm170_vm10, %v4976_v41 }

</bundles_post_ra>
